<compile_context>
chip_gen: v6e
topology: v6e:2x2x1
jax: 0.10.0
libtpu: 0.0.40
codegen_flags: <defaults>
</compile_context>

<pallas_src>
import functools
import math

import jax
import jax.numpy as jnp
from jax.experimental import pallas as pl
from jax.experimental.pallas import tpu as pltpu

# Large finite negative (avoids exp(-inf + inf) = NaN in the online softmax).
_NEG_INF = -0.7 * float(jnp.finfo(jnp.float32).max)


def _sdpa_kernel(q_ref, k_ref, v_ref, mask_ref, o_ref,
                 qs_sc, m_sc, l_sc, acc_sc, *, scale):
    # Refs are 2-D (batch dim squeezed by the BlockSpec):
    #   q_ref: (tq, D), k_ref/v_ref: (tk, D)/(tk, Dv), mask_ref: (tq, tk)
    kv = pl.program_id(2)

    @pl.when(kv == 0)
    def _init():
        # Q block is invariant along the kv axis: scale + cast it exactly once
        # per (batch, q-tile) instead of every kv step.
        qs_sc[...] = (q_ref[...].astype(jnp.float32) * scale).astype(qs_sc.dtype)
        m_sc[...] = jnp.full(m_sc.shape, _NEG_INF, dtype=m_sc.dtype)
        l_sc[...] = jnp.zeros(l_sc.shape, dtype=l_sc.dtype)
        acc_sc[...] = jnp.zeros(acc_sc.shape, dtype=acc_sc.dtype)

    # scores = (Q*scale) @ K^T, contraction over the last dims (no materialized
    # transpose); bf16 operands, f32 accumulation on the MXU.
    s = jax.lax.dot_general(
        qs_sc[...], k_ref[...],
        dimension_numbers=(((1,), (1,)), ((), ())),
        preferred_element_type=jnp.float32,
    )
    s = s + mask_ref[...].astype(jnp.float32)

    # Online (flash) softmax update, all f32.
    m_prev = m_sc[...]
    m_new = jnp.maximum(m_prev, jnp.max(s, axis=-1, keepdims=True))
    alpha = jnp.exp(m_prev - m_new)
    p = jnp.exp(s - m_new)
    l_sc[...] = alpha * l_sc[...] + jnp.sum(p, axis=-1, keepdims=True)
    acc_sc[...] = alpha * acc_sc[...] + jnp.dot(
        p.astype(v_ref.dtype), v_ref[...], preferred_element_type=jnp.float32
    )
    m_sc[...] = m_new

    @pl.when(kv == pl.num_programs(2) - 1)
    def _finalize():
        l = l_sc[...]
        # Guard fully-masked rows (l == 0): emit 0 instead of NaN.
        # TODO(synk): PyTorch softmax over an all -inf row yields NaN; we emit 0.
        inv_l = pl.reciprocal(jnp.where(l == 0.0, 1.0, l), approx=True)  # EUP vrcp
        o_ref[...] = (acc_sc[...] * inv_l).astype(o_ref.dtype)


def sdpa(query, key, value, attn_mask, *, block_q=256, block_k=256,
         compute_dtype=jnp.bfloat16):
    B, Lq, D = query.shape
    Bk, Lk, Dk = key.shape
    Bv, Lkv, Dv = value.shape
    assert B == Bk == Bv and D == Dk and Lk == Lkv
    assert attn_mask.shape == (B, Lq, Lk)

    out_dtype = query.dtype

    # bf16 operands: native MXU rate everywhere and half the HBM traffic for
    # K/V and the O(Lq*Lk) mask stream.  Accumulation/softmax stay f32.
    q = query.astype(compute_dtype)
    k = key.astype(compute_dtype)
    v = value.astype(compute_dtype)
    mask = attn_mask.astype(compute_dtype)

    tq = min(block_q, Lq)
    tk = min(block_k, Lk)
    assert Lq % tq == 0 and Lk % tk == 0, "seq lengths must divide the tiles"

    grid = (B, Lq // tq, Lk // tk)
    scale = 1.0 / math.sqrt(D)

    csize = jnp.dtype(compute_dtype).itemsize
    osize = jnp.dtype(out_dtype).itemsize

    # Double-buffered per-step input/output tiles + resident scratch, plus
    # headroom for compiler internals; capped at 32 MiB so v7x (64 MiB
    # physical) keeps slack.
    tile_bytes = ((tq * D + tk * D + tk * Dv + tq * tk) * csize
                  + tq * Dv * osize)
    scratch_bytes = (tq * D * csize                 # scaled-Q scratch
                     + 2 * tq * 128 * 4             # m, l (lane-padded to 128)
                     + tq * Dv * 4)                 # f32 accumulator
    vmem_limit = min(2 * tile_bytes + scratch_bytes + 16 * 1024 * 1024,
                     32 * 1024 * 1024)

    cost = pl.CostEstimate(
        flops=2 * B * Lq * Lk * D + 2 * B * Lq * Lk * Dv,
        transcendentals=B * Lq * Lk,
        bytes_accessed=(q.size + k.size + v.size + mask.size) * csize
        + B * Lq * Dv * osize,
    )

    kernel = functools.partial(_sdpa_kernel, scale=scale)

    return pl.pallas_call(
        kernel,
        out_shape=jax.ShapeDtypeStruct((B, Lq, Dv), out_dtype),
        grid_spec=pltpu.PrefetchScalarGridSpec(
            num_scalar_prefetch=0,
            grid=grid,
            in_specs=[
                pl.BlockSpec((None, tq, D), lambda b, i, j: (b, i, 0)),
                pl.BlockSpec((None, tk, D), lambda b, i, j: (b, j, 0)),
                pl.BlockSpec((None, tk, Dv), lambda b, i, j: (b, j, 0)),
                pl.BlockSpec((None, tq, tk), lambda b, i, j: (b, i, j)),
            ],
            out_specs=pl.BlockSpec((None, tq, Dv), lambda b, i, j: (b, i, 0)),
            scratch_shapes=[
                pltpu.VMEM((tq, D), compute_dtype),   # scaled Q (kv-invariant)
                pltpu.VMEM((tq, 1), jnp.float32),     # running max  m
                pltpu.VMEM((tq, 1), jnp.float32),     # running sum  l
                pltpu.VMEM((tq, Dv), jnp.float32),    # output accumulator
            ],
        ),
        compiler_params=pltpu.CompilerParams(
            dimension_semantics=("parallel", "parallel", "arbitrary"),
            vmem_limit_bytes=int(vmem_limit),
        ),
        cost_estimate=cost,
    )(q, k, v, mask)


def sdpa_ref(query, key, value, attn_mask):
    d = query.shape[-1]
    s = jnp.einsum("bqd,bkd->bqk", query, key) / math.sqrt(d) + attn_mask
    attn = jax.nn.softmax(s, axis=-1)
    return jnp.einsum("bqk,bkd->bqd", attn, value)


if __name__ == "__main__":
    # Lane-dense, tile-friendly shapes: grid = (2, 2, 2) so the kv loop,
    # the hoisted-Q path and megacore parallelism are all exercised.
    B, Lq, Lk, D, Dv = 2, 512, 512, 128, 128

    k0, k1, k2, k3 = jax.random.split(jax.random.PRNGKey(0), 4)
    query = jax.random.normal(k0, (B, Lq, D), dtype=jnp.float32)
    key = jax.random.normal(k1, (B, Lk, D), dtype=jnp.float32)
    value = jax.random.normal(k2, (B, Lk, Dv), dtype=jnp.float32)
    attn_mask = 0.1 * jax.random.normal(k3, (B, Lq, Lk), dtype=jnp.float32)

    out = jax.block_until_ready(sdpa(query, key, value, attn_mask))

    ref = sdpa_ref(query, key, value, attn_mask)
    assert out.shape == (B, Lq, Dv)
    # bf16 operands -> loosen tolerance vs the f32 reference (f32 accumulation
    # keeps the error well inside this bound).
    assert jnp.allclose(out, ref, atol=2e-2, rtol=2e-2), "mismatch vs reference"

    print("KERNEL_OK")
</pallas_src>

<mosaic_0001>
module attributes {stable_mosaic.version = 11 : i64} {
  func.func @_sdpa_kernel(%arg0: i32, %arg1: i32, %arg2: i32, %arg3: memref<1x256x128xbf16, #tpu.memory_space<vmem>>, %arg4: memref<1x256x128xbf16, #tpu.memory_space<vmem>>, %arg5: memref<1x256x128xbf16, #tpu.memory_space<vmem>>, %arg6: memref<1x256x256xbf16, #tpu.memory_space<vmem>>, %arg7: memref<1x256x128xf32, #tpu.memory_space<vmem>>, %arg8: memref<256x128xbf16, #tpu.memory_space<vmem>>, %arg9: memref<256x1xf32, #tpu.memory_space<vmem>>, %arg10: memref<256x1xf32, #tpu.memory_space<vmem>>, %arg11: memref<256x128xf32, #tpu.memory_space<vmem>>) attributes {dimension_semantics = [#tpu.dimension_semantics<parallel>, #tpu.dimension_semantics<parallel>, #tpu.dimension_semantics<arbitrary>], iteration_bounds = array<i64: 2, 2, 2>, scalar_prefetch = 0 : i64, scratch_operands = 4 : i64, tpu.core_type = #tpu.core_type<tc>, window_params = [{transform_indices = @transform_0, window_bounds = array<i64: 1, 256, 128>}, {transform_indices = @transform_1, window_bounds = array<i64: 1, 256, 128>}, {transform_indices = @transform_2, window_bounds = array<i64: 1, 256, 128>}, {transform_indices = @transform_3, window_bounds = array<i64: 1, 256, 256>}, {transform_indices = @transform_4, window_bounds = array<i64: 1, 256, 128>}]} {
    %c0_i32 = arith.constant 0 : i32
    %0 = arith.cmpi eq, %arg2, %c0_i32 : i32
    %1 = arith.extui %0 : i1 to i32
    %c0_i32_0 = arith.constant 0 : i32
    %2 = arith.cmpi ne, %1, %c0_i32_0 : i32
    scf.if %2 {
      %c0_27 = arith.constant 0 : index
      %c0_28 = arith.constant 0 : index
      %c0_29 = arith.constant 0 : index
      %39 = vector.load %arg3[%c0_27, %c0_28, %c0_29] : memref<1x256x128xbf16, #tpu.memory_space<vmem>>, vector<1x256x128xbf16>
      %40 = vector.shape_cast %39 : vector<1x256x128xbf16> to vector<256x128xbf16>
      %41 = arith.extf %40 : vector<256x128xbf16> to vector<256x128xf32>
      %cst_30 = arith.constant 0.0883883461 : f32
      %42 = vector.broadcast %cst_30 : f32 to vector<256x128xf32>
      %43 = arith.mulf %41, %42 : vector<256x128xf32>
      %44 = arith.truncf %43 : vector<256x128xf32> to vector<256x128xbf16>
      %c0_31 = arith.constant 0 : index
      %c0_32 = arith.constant 0 : index
      %45 = vector.load %arg8[%c0_31, %c0_32] : memref<256x128xbf16, #tpu.memory_space<vmem>>, vector<256x128xbf16>
      tpu.vector_store %arg8[%c0_31, %c0_32], %44 {strides = array<i32>} : memref<256x128xbf16, #tpu.memory_space<vmem>>, vector<256x128xbf16>,
      %cst_33 = arith.constant -2.38197633E+38 : f32
      %46 = vector.broadcast %cst_33 : f32 to vector<256x1xf32>
      %c0_34 = arith.constant 0 : index
      %c0_35 = arith.constant 0 : index
      %47 = vector.load %arg9[%c0_34, %c0_35] : memref<256x1xf32, #tpu.memory_space<vmem>>, vector<256x1xf32>
      tpu.vector_store %arg9[%c0_34, %c0_35], %46 {strides = array<i32>} : memref<256x1xf32, #tpu.memory_space<vmem>>, vector<256x1xf32>,
      %cst_36 = arith.constant 0.000000e+00 : f32
      %48 = vector.broadcast %cst_36 : f32 to vector<256x1xf32>
      %c0_37 = arith.constant 0 : index
      %c0_38 = arith.constant 0 : index
      %49 = vector.load %arg10[%c0_37, %c0_38] : memref<256x1xf32, #tpu.memory_space<vmem>>, vector<256x1xf32>
      tpu.vector_store %arg10[%c0_37, %c0_38], %48 {strides = array<i32>} : memref<256x1xf32, #tpu.memory_space<vmem>>, vector<256x1xf32>,
      %cst_39 = arith.constant 0.000000e+00 : f32
      %50 = vector.broadcast %cst_39 : f32 to vector<256x128xf32>
      %c0_40 = arith.constant 0 : index
      %c0_41 = arith.constant 0 : index
      %51 = vector.load %arg11[%c0_40, %c0_41] : memref<256x128xf32, #tpu.memory_space<vmem>>, vector<256x128xf32>
      tpu.vector_store %arg11[%c0_40, %c0_41], %50 {strides = array<i32>} : memref<256x128xf32, #tpu.memory_space<vmem>>, vector<256x128xf32>,
    } else {
    }
    %c0 = arith.constant 0 : index
    %c0_1 = arith.constant 0 : index
    %3 = vector.load %arg8[%c0, %c0_1] : memref<256x128xbf16, #tpu.memory_space<vmem>>, vector<256x128xbf16>
    %c0_2 = arith.constant 0 : index
    %c0_3 = arith.constant 0 : index
    %c0_4 = arith.constant 0 : index
    %4 = vector.load %arg4[%c0_2, %c0_3, %c0_4] : memref<1x256x128xbf16, #tpu.memory_space<vmem>>, vector<1x256x128xbf16>
    %5 = vector.shape_cast %4 : vector<1x256x128xbf16> to vector<256x128xbf16>
    %cst = arith.constant dense<0.000000e+00> : vector<256x256xf32>
    %6 = tpu.matmul %3, %5, %cst {dimension_numbers = #tpu.dot_dimension_numbers<[1], [1], [0], [0], [0, 0, 1, 0], [], []>} : vector<256x128xbf16>, vector<256x128xbf16>, vector<256x256xf32> -> vector<256x256xf32>
    %c0_5 = arith.constant 0 : index
    %c0_6 = arith.constant 0 : index
    %c0_7 = arith.constant 0 : index
    %7 = vector.load %arg6[%c0_5, %c0_6, %c0_7] : memref<1x256x256xbf16, #tpu.memory_space<vmem>>, vector<1x256x256xbf16>
    %8 = vector.shape_cast %7 : vector<1x256x256xbf16> to vector<256x256xbf16>
    %9 = arith.extf %8 : vector<256x256xbf16> to vector<256x256xf32>
    %10 = arith.addf %6, %9 : vector<256x256xf32>
    %c0_8 = arith.constant 0 : index
    %c0_9 = arith.constant 0 : index
    %11 = vector.load %arg9[%c0_8, %c0_9] : memref<256x1xf32, #tpu.memory_space<vmem>>, vector<256x1xf32>
    %cst_10 = arith.constant dense<0xFF800000> : vector<256xf32>
    %12 = vector.multi_reduction <maximumf>, %10, %cst_10 [1] : vector<256x256xf32> to vector<256xf32>
    %13 = vector.shape_cast %12 : vector<256xf32> to vector<256x1xf32>
    %14 = arith.maximumf %11, %13 : vector<256x1xf32>
    %15 = arith.subf %11, %14 : vector<256x1xf32>
    %16 = math.exp %15 : vector<256x1xf32>
    %17 = vector.broadcast %14 : vector<256x1xf32> to vector<256x256xf32>
    %18 = arith.subf %10, %17 : vector<256x256xf32>
    %19 = math.exp %18 : vector<256x256xf32>
    %c0_11 = arith.constant 0 : index
    %c0_12 = arith.constant 0 : index
    %20 = vector.load %arg10[%c0_11, %c0_12] : memref<256x1xf32, #tpu.memory_space<vmem>>, vector<256x1xf32>
    %21 = arith.mulf %16, %20 : vector<256x1xf32>
    %cst_13 = arith.constant dense<0.000000e+00> : vector<256xf32>
    %22 = vector.multi_reduction <add>, %19, %cst_13 [1] : vector<256x256xf32> to vector<256xf32>
    %23 = vector.shape_cast %22 : vector<256xf32> to vector<256x1xf32>
    %24 = arith.addf %21, %23 : vector<256x1xf32>
    %c0_14 = arith.constant 0 : index
    %c0_15 = arith.constant 0 : index
    %25 = vector.load %arg10[%c0_14, %c0_15] : memref<256x1xf32, #tpu.memory_space<vmem>>, vector<256x1xf32>
    tpu.vector_store %arg10[%c0_14, %c0_15], %24 {strides = array<i32>} : memref<256x1xf32, #tpu.memory_space<vmem>>, vector<256x1xf32>,
    %c0_16 = arith.constant 0 : index
    %c0_17 = arith.constant 0 : index
    %26 = vector.load %arg11[%c0_16, %c0_17] : memref<256x128xf32, #tpu.memory_space<vmem>>, vector<256x128xf32>
    %27 = vector.broadcast %16 : vector<256x1xf32> to vector<256x128xf32>
    %28 = arith.mulf %27, %26 : vector<256x128xf32>
    %29 = arith.truncf %19 : vector<256x256xf32> to vector<256x256xbf16>
    %c0_18 = arith.constant 0 : index
    %c0_19 = arith.constant 0 : index
    %c0_20 = arith.constant 0 : index
    %30 = vector.load %arg5[%c0_18, %c0_19, %c0_20] : memref<1x256x128xbf16, #tpu.memory_space<vmem>>, vector<1x256x128xbf16>
    %31 = vector.shape_cast %30 : vector<1x256x128xbf16> to vector<256x128xbf16>
    %cst_21 = arith.constant dense<0.000000e+00> : vector<256x128xf32>
    %32 = tpu.matmul %29, %31, %cst_21 {dimension_numbers = #tpu.dot_dimension_numbers<[1], [0], [0], [1], [0, 0, 1, 1], [], []>} : vector<256x256xbf16>, vector<256x128xbf16>, vector<256x128xf32> -> vector<256x128xf32>
    %33 = arith.addf %28, %32 : vector<256x128xf32>
    %c0_22 = arith.constant 0 : index
    %c0_23 = arith.constant 0 : index
    %34 = vector.load %arg11[%c0_22, %c0_23] : memref<256x128xf32, #tpu.memory_space<vmem>>, vector<256x128xf32>
    tpu.vector_store %arg11[%c0_22, %c0_23], %33 {strides = array<i32>} : memref<256x128xf32, #tpu.memory_space<vmem>>, vector<256x128xf32>,
    %c0_24 = arith.constant 0 : index
    %c0_25 = arith.constant 0 : index
    %35 = vector.load %arg9[%c0_24, %c0_25] : memref<256x1xf32, #tpu.memory_space<vmem>>, vector<256x1xf32>
    tpu.vector_store %arg9[%c0_24, %c0_25], %14 {strides = array<i32>} : memref<256x1xf32, #tpu.memory_space<vmem>>, vector<256x1xf32>,
    %c1_i32 = arith.constant 1 : i32
    %36 = arith.cmpi eq, %arg2, %c1_i32 : i32
    %37 = arith.extui %36 : i1 to i32
    %c0_i32_26 = arith.constant 0 : i32
    %38 = arith.cmpi ne, %37, %c0_i32_26 : i32
    scf.if %38 {
      %c0_27 = arith.constant 0 : index
      %c0_28 = arith.constant 0 : index
      %39 = vector.load %arg10[%c0_27, %c0_28] : memref<256x1xf32, #tpu.memory_space<vmem>>, vector<256x1xf32>
      %cst_29 = arith.constant 0.000000e+00 : f32
      %40 = vector.broadcast %cst_29 : f32 to vector<256x1xf32>
      %41 = arith.cmpf oeq, %39, %40 : vector<256x1xf32>
      %cst_30 = arith.constant 1.000000e+00 : f32
      %42 = vector.broadcast %cst_30 : f32 to vector<256x1xf32>
      %43 = arith.select %41, %42, %39 : vector<256x1xi1>, vector<256x1xf32>
      %44 = tpu.reciprocal %43 {approx = true} : vector<256x1xf32> -> vector<256x1xf32>
      %c0_31 = arith.constant 0 : index
      %c0_32 = arith.constant 0 : index
      %45 = vector.load %arg11[%c0_31, %c0_32] : memref<256x128xf32, #tpu.memory_space<vmem>>, vector<256x128xf32>
      %46 = vector.broadcast %44 : vector<256x1xf32> to vector<256x128xf32>
      %47 = arith.mulf %45, %46 : vector<256x128xf32>
      %c0_33 = arith.constant 0 : index
      %c0_34 = arith.constant 0 : index
      %c0_35 = arith.constant 0 : index
      %48 = vector.load %arg7[%c0_33, %c0_34, %c0_35] : memref<1x256x128xf32, #tpu.memory_space<vmem>>, vector<1x256x128xf32>
      %49 = vector.shape_cast %48 : vector<1x256x128xf32> to vector<256x128xf32>
      %50 = vector.shape_cast %47 : vector<256x128xf32> to vector<1x256x128xf32>
      tpu.vector_store %arg7[%c0_33, %c0_34, %c0_35], %50 {strides = array<i32>} : memref<1x256x128xf32, #tpu.memory_space<vmem>>, vector<1x256x128xf32>,
    } else {
    }
    return
  }
  func.func @transform_0(%arg0: i32, %arg1: i32, %arg2: i32) -> (i32, i32, i32) {
    %c0_i32 = arith.constant 0 : i32
    %c0_i32_0 = arith.constant 0 : i32
    return %arg0, %arg1, %c0_i32 : i32, i32, i32
  }
  func.func @transform_1(%arg0: i32, %arg1: i32, %arg2: i32) -> (i32, i32, i32) {
    %c0_i32 = arith.constant 0 : i32
    %c0_i32_0 = arith.constant 0 : i32
    return %arg0, %arg2, %c0_i32 : i32, i32, i32
  }
  func.func @transform_2(%arg0: i32, %arg1: i32, %arg2: i32) -> (i32, i32, i32) {
    %c0_i32 = arith.constant 0 : i32
    %c0_i32_0 = arith.constant 0 : i32
    return %arg0, %arg2, %c0_i32 : i32, i32, i32
  }
  func.func @transform_3(%arg0: i32, %arg1: i32, %arg2: i32) -> (i32, i32, i32) {
    %c0_i32 = arith.constant 0 : i32
    return %arg0, %arg1, %arg2 : i32, i32, i32
  }
  func.func @transform_4(%arg0: i32, %arg1: i32, %arg2: i32) -> (i32, i32, i32) {
    %c0_i32 = arith.constant 0 : i32
    %c0_i32_0 = arith.constant 0 : i32
    return %arg0, %arg1, %c0_i32 : i32, i32, i32
  }
}

</mosaic_0001>

<bundles_post_ra>
// kernel: tpu_custom_call.1
= control target key start
LH: loop header
LB: loop body
LE: loop exit
PB: predicated region body
PF: predicated region fallthrough
CT: control target
= control target key end

     0   :  { %s6312_s0 = inlined_call_operand.hbm [shape: bf16[2,512,128], index: 0, kind: input, shape index: {}]   ;;  %s6313_s1 = inlined_call_operand.hbm [shape: bf16[2,512,128], index: 1, kind: input, shape index: {}]   ;;  %s6314_s2 = inlined_call_operand.hbm [shape: bf16[2,512,128], index: 2, kind: input, shape index: {}]   ;;  %s6315_s3 = inlined_call_operand.hbm [shape: bf16[2,512,512], index: 3, kind: input, shape index: {}]   ;;  %s6316_s4 = inlined_call_operand.hbm [shape: f32[2,512,128], index: 4, kind: output, shape index: {}]  }
   0x1   :  { %6438 = sst [smem:[#allocation107_spill]] %s6313_s1 }
   0x2   :  { %6439 = sst [smem:[#allocation108_spill]] %s6314_s2 }
   0x3   :  { %6440 = sst [smem:[#allocation109_spill]] %s6315_s3 }
   0x4   :  { %6441 = sst [smem:[#allocation110_spill]] %s6316_s4 }
   0x5   :  { %9 = vsyncpa [#allocation7], 0 }
   0x6   :  { %11 = vsyncpa [#allocation7 + $0x1], 0 }
   0x7   :  { %12 = vsyncpa [#allocation10], 0 }
   0x8   :  { %14 = vsyncpa [#allocation10 + $0x1], 0 }
   0x9   :  { %15 = vsyncpa [#allocation13], 0 }
   0xa   :  { %17 = vsyncpa [#allocation13 + $0x1], 0 }
   0xb   :  { %18 = vsyncpa [#allocation8], 0 }
   0xc   :  { %20 = vsyncpa [#allocation8 + $0x1], 0  ;;  %s4617_s15 = smov 0   ;;  %s4619_s16 = smov 0  }
   0xd   :  { %s4621_s17 = smov 0   ;;  %s4623_s18 = smov 0  }
   0xe   :  { %s4625_s19 = smov 0   ;;  %s4627_s20 = smov 0  }
   0xf   :  { %s4629_s21 = smov 0   ;;  %s4631_s22 = smov 0  }
  0x10   :  { %s4633_s23 = smov 0   ;;  %s4635_s24 = smov 0  }
  0x11   :  { %s4637_s25 = smov 0   ;;  %s4639_s26 = smov 0  }
  0x12   :  { %s4641_s27 = smov 0   ;;  %s4643_s28 = smov 0  }
  0x13   :  { %s4645_s29 = smov 0   ;;  %s4647_s30 = smov 0  }
  0x14 LB: > { %6442 = sst [smem:[#allocation19_spill]] %s4514_s15  ;;  %s4696_s5 = sadd.s32 4294967295, %s4574_s30   ;;  %s4574_s30 = sphi %s4647_s30, %s26_s30   ;;  %s4570_s29 = sphi %s4645_s29, %s6742_s29   ;;  %s4566_s28 = sphi %s4643_s28, %s6729_s28   ;;  %s4562_s27 = sphi %s4641_s27, %s6741_s27   ;;  %s4558_s26 = sphi %s4639_s26, %s6740_s26   ;;  %s4554_s25 = sphi %s4637_s25, %s6739_s25   ;;  %s4550_s24 = sphi %s4635_s24, %s6738_s24   ;;  %s4546_s23 = sphi %s4633_s23, %s6737_s23   ;;  %s4542_s22 = sphi %s4631_s22, %s6736_s22   ;;  %s4538_s21 = sphi %s4629_s21, %s6725_s21   ;;  %s4534_s20 = sphi %s4627_s20, %s6735_s20   ;;  %s4530_s19 = sphi %s4625_s19, %s6734_s19   ;;  %s4526_s18 = sphi %s4623_s18, %s6724_s18   ;;  %s4522_s17 = sphi %s4621_s17, %s6733_s17   ;;  %s4518_s16 = sphi %s4619_s16, %s6732_s16   ;;  %s4514_s15 = sphi %s4617_s15, %s6731_s15  }
  0x15   : > { %6443 = sst [smem:[#allocation20_spill]] %s4518_s16  ;;  %s38_s6 = sadd.s32 1, %s4562_s27 }
  0x16   : > { %6444 = sst [smem:[#allocation21_spill]] %s4530_s19  ;;  %p4699_p0 = scmp.ge.s32.totalorder %s38_s6, 2 }
  0x17   : > { %6445 = sst [smem:[#allocation22_spill]] %s4538_s21  ;;  %p6323_p1 = scmp.eq.s32.totalorder %s4574_s30, 0 }
  0x18   : > { %6446 = sst [smem:[#allocation23_spill]] %s4542_s22  ;;  %p6324_p2 = scmp.eq.s32.totalorder %s4696_s5, 0 }
  0x19   : > { %6447 = sst [smem:[#allocation24_spill]] %s4550_s24  ;;  %s6744_s6 = smov (%p4699_p0, %s38_s6), 0 }
  0x1a   : > { %6448 = sst [smem:[#allocation25_spill]] %s4554_s25  ;;  %p89_p3 = scmp.ne.s32.totalorder %s4534_s20, %s4530_s19 }
  0x1b   : > { %6449 = sst [smem:[#allocation26_spill]] %s4558_s26  ;;  %s4715_s10 = ssub.s32 %s4562_s27, %s6744_s6 }
  0x1c   : > { %6450 = sst [smem:[#allocation27_spill]] %s4566_s28  ;;  %p95_p4 = scmp.ne.s32.totalorder %s4530_s19, %s4526_s18 }
  0x1d   : > { %6452 = sst [smem:[#allocation28_spill]] %s6744_s6  ;;  %p4720_p5 = por %p89_p3, %p6323_p1 }
  0x1e   : > { %p4726_p6 = por %p95_p4, %p6324_p2  ;;  %p3845_p7 = scmp.lt.s32.totalorder %s4574_s30, 8 }
  0x1f   : > { %s6330_s13 = sshll.u32 %s4570_s29, 6  ;;  %s228_s14 = sand.u32 1, %s4574_s30  }
  0x20   : > { %s6454_s12 = scalar_select %p4726_p6, 1, 0 }
  0x21   : > { %s230_s9 = sand.u32 1, %s4534_s20   ;;  %s3344_s6 = sshll.u32 %s4562_s27, 5 }
  0x22   : > { %6455 = sst [smem:[#allocation29_spill]] %s6454_s12  ;;  %s3343_s8 = sshll.u32 %s230_s9, 7 }
  0x23   : > { %s238_s4 = sadd.s32 %s3344_s6, %s6330_s13  ;;  %s232_s26 = scalar_lea.vmem [#allocation9], %s3343_s8 }
  0x24   : > { %s3346_s18 = sshll.u32 %s238_s4, 6  ;;  %s241_s25 = sshll.u32 %s232_s26, 4  ;;  %s242_s25 = int_to_ptr.vmem [resolvable:$true] %s241_s25 }
  0x25   : > { %s6456_s1 = sld [smem:[#allocation107_spill]]  ;;  %p4744_p8 = pnand %p3845_p7, %p4720_p5 }
  0x26   : > { %s6458_s2 = sld [smem:[#allocation108_spill]]  ;;  %s255_s4 = scalar_lea.vmem [#allocation11], %s3343_s8 }
  0x27   : > { %s264_s26 = sshll.u32 %s255_s4, 4  ;;  %s4755_s19 = scalar_lea.sflag [#allocation10], %s228_s14  ;;  %s4753_s26 = int_to_ptr.vmem [resolvable:$true] %s264_s26 }
  0x28   : > { %p6327_p9 = pneg %p4744_p8  ;;  %s4307_s24 = scalar_lea.vmem %s242_s25, 2048 }
  0x29   : > { %p4308_p10 = scmp.ne.s32.totalorder %s242_s25, %s4307_s24  ;;  %s4576_s9 = smov [#allocation9]  }
  0x2a   : > { %s4312_s15 = sshll.u32 %s4576_s9, 4  ;;  %s4313_s15 = int_to_ptr.vmem [resolvable:$false] %s4312_s15 }
  0x2b   : > { %s240_s3 = scalar_lea.hbm %s6456_s1, %s3346_s18  ;;  %p4310_p11 = pnand %p4308_p10, %p6327_p9 }
  0x2c   : > { %s4751_s6 = scalar_lea.hbm %s6458_s2, %s3346_s18  ;;  %s4314_s16 = scalar_lea.vmem %s4313_s15, 4096 }
  0x2d   : > { %p4311_p12 = pneg %p4310_p11  ;;  %p4315_p13 = scmp.lt.s32.totalorder %s242_s25, %s4313_s15 }
  0x2e   : > { %p4316_p3 = scmp.lt.s32.totalorder %s4314_s16, %s4307_s24 }
  0x30   : > { %p4317_p4 = por %p4316_p3, %p4315_p13 }
  0x32   : > { %p4318_p5 = pnand %p4317_p4, %p4311_p12 }
  0x34   : > { %4321 = shalt.err (!%p4318_p5)
}
  0x35   : > { %s6325_s8 = smov 64   ;;  %s6328_s11 = smov 4  }
  0x36   : > { %3834 = dma.hbm_to_vmem [thread:$0]  (!%p4744_p8), %s240_s3, 2048, %s242_s25, %s4755_s19, %s6325_s8, %s6325_s8, %s6328_s11  }
  0x37   : > { %p3357_p10 = scmp.ge.s32.totalorder %s4574_s30, 1  ;;  %p298_p11 = scmp.lt.s32.totalorder %s4574_s30, 9 }
  0x38   : > { %s3336_s18 = sadd.s32 4294967294, %s4574_s30   ;;  %s41_s4 = sadd.s32 1, %s4566_s28 }
  0x39   : > { %p4770_p12 = pnand %p3357_p10, %p298_p11  ;;  %s54_s24 = sadd.s32 1, %s4546_s23 }
  0x3a   : > { %s6746_s4 = smov (!%p4699_p0, %s41_s4), %s4566_s28  ;;  %p61_p13 = scmp.ne.s32.totalorder %s4546_s23, %s4542_s22 }
  0x3b   : > { %s6459_s14 = scalar_select %p4770_p12, 1, 0 }
  0x3c   : > { %p67_p3 = scmp.ne.s32.totalorder %s4542_s22, %s4538_s21  ;;  %p43_p4 = scmp.ge.s32.totalorder %s6746_s4, 2 }
  0x3d   : > { %6460 = sst [smem:[#allocation30_spill]] %s6459_s14  ;;  %p179_p5 = scmp.eq.s32.totalorder %s4696_s5, 7 }
  0x3e   : > { %p4787_p10 = por %p6323_p1, %p61_p13  ;;  %p4796_p11 = por %p6324_p2, %p67_p3 }
  0x3f   : > { %s6748_s4 = smov (%p43_p4, %s6746_s4), 0  ;;  %s6465_s7 = sadd.s32 1, %s4570_s29 }
  0x40   : > { %s6462_s25 = scalar_select %p4796_p11, 1, 0 }
  0x41   : > { %6464 = sst [smem:[#allocation32_spill]] %s6748_s4  ;;  %s6750_s7 = smov (!%p43_p4, %s6465_s7), %s4570_s29 }
  0x42   : > { %6463 = sst [smem:[#allocation31_spill]] %s6462_s25  ;;  %s50_s9 = ssub.s32 %s4566_s28, %s6748_s4 }
  0x43   : > { %p4807_p0 = por %p179_p5, %p61_p13  ;;  %p47_p1 = scmp.ge.s32.totalorder %s6750_s7, 2 }
  0x44   : > { %p185_p2 = scmp.eq.s32.totalorder %s3336_s18, 7  ;;  %s6339_s16 = sand.u32 1, %s4546_s23  }
  0x45   : > { %s6466_s15 = scalar_select %p4807_p0, 1, 0 }
  0x46   : > { %s3340_s8 = sshll.u32 %s4566_s28, 5  ;;  %s6752_s7 = smov (%p47_p1, %s6750_s7), 0 }
  0x47   : > { %6467 = sst [smem:[#allocation33_spill]] %s6466_s15  ;;  %p4818_p9 = por %p185_p2, %p67_p3 }
  0x48   : > { %6468 = sst [smem:[#allocation34_spill]] %s6752_s7  ;;  %s49_s13 = ssub.s32 %s4570_s29, %s6752_s7 }
  0x49   : > { %s6469_s11 = scalar_select %p4818_p9, 1, 0 }
  0x4a   : > { %s3339_s1 = sshll.u32 %s6339_s16, 7  ;;  %s51_s2 = sor.u32 %s50_s9, %s49_s13 }
  0x4b   : > { %6470 = sst [smem:[#allocation35_spill]] %s6469_s11  ;;  %s79_s4 = sor.u32 %s4715_s10, %s49_s13 }
  0x4c   : > { %p52_p13 = scmp.eq.s32.totalorder %s51_s2, 0  ;;  %p80_p4 = scmp.eq.s32.totalorder %s79_s4, 0 }
  0x4d   : > { %s137_s18 = sor.u32 %s4715_s10, %s51_s2  ;;  %s6471_s21 = sadd.s32 1, %s4534_s20 }
  0x4e   : > { %s4829_s15 = scalar_select %p52_p13, %s4546_s23, %s54_s24  }
  0x4f   : > { %s4834_s25 = scalar_select %p80_p4, %s4534_s20, %s6471_s21  }
  0x50   : > { %p4836_p1 = scmp.eq.s32.totalorder %s137_s18, 0  ;;  %s6473_s7 = sshll.u32 %s4570_s29, 6 }
  0x51   : > { %s215_s16 = sadd.s32 %s6473_s7, %s3340_s8  ;;  %s209_s9 = scalar_lea.vmem [#allocation6], %s3339_s1 }
  0x52   : > { %s3342_s22 = sshll.u32 %s215_s16, 6  ;;  %s218_s14 = sshll.u32 %s209_s9, 4  ;;  %s4847_s14 = int_to_ptr.vmem [resolvable:$true] %s218_s14 }
  0x53   : > { %s4845_s4 = scalar_lea.hbm %s6312_s0, %s3342_s22  ;;  %p4853_p2 = pnand %p3845_p7, %p4787_p10 }
  0x54   : > { %s4335_s21 = scalar_lea.vmem %s4753_s26, 2048  ;;  %p6475_p5 = pneg %p4744_p8 }
  0x55   : > { %p4336_p3 = scmp.ne.s32.totalorder %s4753_s26, %s4335_s21  ;;  %s4579_s1 = smov [#allocation11]  }
  0x56   : > { %s4340_s10 = sshll.u32 %s4579_s1, 4  ;;  %s4341_s10 = int_to_ptr.vmem [resolvable:$false] %s4340_s10 }
  0x57   : > { %p4338_p13 = pnand %p4336_p3, %p6475_p5  ;;  %s4342_s28 = scalar_lea.vmem %s4341_s10, 4096 }
  0x58   : > { %p4343_p9 = scmp.lt.s32.totalorder %s4753_s26, %s4341_s10  ;;  %p4344_p0 = scmp.lt.s32.totalorder %s4342_s28, %s4335_s21 }
  0x59   : > { %p4339_p4 = pneg %p4338_p13 }
  0x5a   : > { %p4345_p6 = por %p4344_p0, %p4343_p9 }
  0x5c   : > { %p4346_p11 = pnand %p4345_p6, %p4339_p4 }
  0x5e   : > { %4349 = shalt.err (!%p4346_p11)
}
  0x5f   : > { %s6476_s22 = smov 4   ;;  %s6477_s8 = smov 64  }
  0x60   : > { %3837 = dma.hbm_to_vmem [thread:$0]  (!%p4744_p8), %s4751_s6, 2048, %s4753_s26, %s4755_s19, %s6477_s8, %s6477_s8, %s6476_s22  }
  0x61   : > { %s6478_s24 = sand.u32 1, %s4546_s23   ;;  %p4352_p9 = pneg %p4853_p2 }
  0x62   : > { %s206_s3 = scalar_lea.sflag [#allocation7], %s6478_s24  ;;  %s4363_s7 = scalar_lea.vmem %s4847_s14, 2048 }
  0x63   : > { %p4364_p6 = scmp.ne.s32.totalorder %s4847_s14, %s4363_s7  ;;  %s4580_s12 = smov [#allocation6]  }
  0x64   : > { %s4368_s16 = sshll.u32 %s4580_s12, 4  ;;  %s4369_s16 = int_to_ptr.vmem [resolvable:$false] %s4368_s16 }
  0x65   : > { %p4366_p10 = pnand %p4364_p6, %p4352_p9  ;;  %s4370_s18 = scalar_lea.vmem %s4369_s16, 4096 }
  0x66   : > { %p4371_p0 = scmp.lt.s32.totalorder %s4847_s14, %s4369_s16  ;;  %p4372_p3 = scmp.lt.s32.totalorder %s4370_s18, %s4363_s7 }
  0x67   : > { %p4367_p11 = pneg %p4366_p10 }
  0x68   : > { %p4373_p5 = por %p4372_p3, %p4371_p0 }
  0x6a   : > { %p4374_p13 = pnand %p4373_p5, %p4367_p11 }
  0x6c   : > { %4377 = shalt.err (!%p4374_p13)
}
  0x6d   : > { %s6479_s6 = sld [smem:[#allocation20_spill]]  ;;  %s140_s9 = sadd.s32 1, %s4522_s17 }
  0x6e   : > { %s6480_s26 = sld [smem:[#allocation19_spill]]  ;;  %p6482_p4 = scmp.eq.s32.totalorder %s4574_s30, 0 }
  0x6f   : > { %s6481_s19 = sld [smem:[#allocation27_spill]]  ;;  %s274_s21 = sand.u32 1, %s4522_s17  }
  0x70   : > { %3831 = dma.hbm_to_vmem [thread:$0]  (!%p4853_p2), %s4845_s4, 2048, %s4847_s14, %s206_s3, %s6477_s8, %s6477_s8, %s6476_s22  }
  0x71   : > { %s4891_s13 = scalar_select %p4836_p1, %s4522_s17, %s140_s9  }
  0x72   : > { %s3353_s1 = sshll.u32 %s4562_s27, 1  ;;  %p6484_p10 = scmp.eq.s32.totalorder %s4696_s5, 0 }
  0x73   : > { %p147_p8 = scmp.ne.s32.totalorder %s4522_s17, %s6479_s6  ;;  %s3351_s14 = sshll.u32 %s274_s21, 8 }
  0x74   : > { %p153_p6 = scmp.ne.s32.totalorder %s6479_s6, %s6480_s26  ;;  %s3355_s28 = sshll.u32 %s4570_s29, 8 }
  0x75   : > { %p4895_p9 = por %p147_p8, %p6482_p4  ;;  %s3451_s4 = sshll.u32 %s6481_s19, 7 }
  0x76   : > { %p4905_p11 = por %p153_p6, %p6484_p10  ;;  %s285_s11 = sadd.s32 %s3451_s4, %s3353_s1 }
  0x77   : > { %s278_s22 = scalar_lea.vmem [#allocation12], %s3351_s14  ;;  %s287_s24 = sadd.s32 %s3355_s28, %s285_s11 }
  0x78   : > { %s290_s8 = sshll.u32 %s278_s22, 4  ;;  %s3356_s3 = sshll.u32 %s287_s24, 6  ;;  %s291_s8 = int_to_ptr.vmem [resolvable:$true] %s290_s8 }
  0x79   : > { %p4915_p1 = pnand %p3845_p7, %p4895_p9  ;;  %s6487_s18 = sld [smem:[#allocation109_spill]] }
  0x7a   : > { %s275_s26 = scalar_lea.sflag [#allocation13], %s274_s21  ;;  %s4391_s19 = scalar_lea.vmem %s291_s8, 4096 }
  0x7b   : > { %p4380_p2 = pneg %p4915_p1  ;;  %p4392_p0 = scmp.ne.s32.totalorder %s291_s8, %s4391_s19 }
  0x7c   : > { %s4581_s9 = smov [#allocation12]  }
  0x7d   : > { %p4394_p3 = pnand %p4392_p0, %p4380_p2  ;;  %s4396_s1 = sshll.u32 %s4581_s9, 4  ;;  %s4397_s1 = int_to_ptr.vmem [resolvable:$false] %s4396_s1 }
  0x7e   : > { %s4398_s2 = scalar_lea.vmem %s4397_s1, 8192  ;;  %p4399_p7 = scmp.lt.s32.totalorder %s291_s8, %s4397_s1 }
  0x7f   : > { %s289_s6 = scalar_lea.hbm %s6487_s18, %s3356_s3  ;;  %p4395_p5 = pneg %p4394_p3 }
  0x80   : > { %p4400_p13 = scmp.lt.s32.totalorder %s4398_s2, %s4391_s19 }
  0x82   : > { %p4401_p8 = por %p4400_p13, %p4399_p7 }
  0x84   : > { %p4402_p4 = pnand %p4401_p8, %p4395_p5 }
  0x86   : > { %4405 = shalt.err (!%p4402_p4)
}
  0x87   : > { %s4582_s14 = smov 256   ;;  %s4583_s4 = smov 128  }
  0x88   : > { %s4584_s11 = smov 8   ;;  %302 = sbr.rel (%p4770_p12) target bundleno = 1450 (0x5aa), region = 36 }
  0x89   : > { %3840 = dma.hbm_to_vmem [thread:$0]  (!%p4915_p1), %s289_s6, 4096, %s291_s8, %s275_s26, %s4582_s14, %s4583_s4, %s4584_s11  }
  0x8d   : > { %s6489_s28 = sld [smem:[#allocation23_spill]] }
  0x8e   : > { %s6490_s22 = sld [smem:[#allocation31_spill]] }
  0x93   : > { %s4929_s24 = sand.u32 1, %s6489_s28  }
  0x94   : > { %s3358_s3 = sshll.u32 %s4929_s24, 7  ;;  %s305_s12 = scalar_lea.sflag [#allocation7], %s4929_s24 }
  0x95   : > { %s4933_s16 = scalar_lea.vmem [#allocation6], %s3358_s3  ;;  %p6491_p9 = scmp.ne.s32.totalorder %s6490_s22, 0 }
  0x97   : > { %4497 = dma.done.wait (%p6491_p9), %s305_s12, 2048  }
  0x98   : > { %4499 = vsyncadd (%p6491_p9), %s305_s12, 4294965248  ;;  %s6492_s8 = sld [smem:[#allocation21_spill]]  ;;  %s313_s18 = sand.u32 1, %s4696_s5  }
  0x99   : > { %s6493_s7 = sld [smem:[#allocation29_spill]]  ;;  %s314_s19 = scalar_lea.sflag [#allocation10], %s313_s18 }
  0x9e   : > { %s315_s6 = sand.u32 1, %s6492_s8  }
  0x9f   : > { %s3359_s26 = sshll.u32 %s315_s6, 7  ;;  %p6494_p12 = scmp.ne.s32.totalorder %s6493_s7, 0 }
  0xa0   : > { %s4941_s9 = scalar_lea.vmem [#allocation9], %s3359_s26 }
  0xa1   : > { %4501 = dma.done.wait (%p6494_p12), %s314_s19, 4096  }
  0xa2   : > { %4503 = vsyncadd (%p6494_p12), %s314_s19, 4294963200  ;;  %s6495_s1 = sld [smem:[#allocation20_spill]]  ;;  %s4948_s4 = scalar_lea.vmem [#allocation11], %s3359_s26 }
  0xa8   : > { %s331_s2 = sand.u32 1, %s6495_s1  }
  0xa9   : > { %s3361_s14 = sshll.u32 %s331_s2, 8  ;;  %s332_s11 = scalar_lea.sflag [#allocation13], %s331_s2 }
  0xaa   : > { %s4950_s21 = scalar_lea.vmem [#allocation12], %s3361_s14 }
  0xab   : > { %4505 = dma.done.wait (%p4905_p11), %s332_s11, 4096  }
  0xac   : > { %4507 = vsyncadd (%p4905_p11), %s332_s11, 4294963200  ;;  %s3362_s5 = sshll.u32 %s4929_s24, 8  ;;  %s6496_s22 = sld [smem:[#allocation24_spill]] }
  0xad   : > { %s4957_s28 = scalar_lea.vmem [#allocation14], %s3362_s5 }
  0xb2   : > { %p3363_p6 = scmp.ne.s32.totalorder %s6496_s22, 0 }
  0xb4   : > { %385 = sbr.rel (%p3363_p6) target bundleno = 242 (0xf2), region = 56 }
  0xb9   : > { %v3485_v0 = vld [vmem:[%s4933_s16] sm:$0xff]   ;;  %v3628_v1 = vld [vmem:[%s4933_s16 + $0x8] sm:$0xff]   ;;  %v3629_v2 = vld [vmem:[%s4933_s16 + $0x10] sm:$0xff]   ;;  %vm642_vm0 = vcmask 7168   ;;  %v4585_v9 = vmov -2.3819763e+38  }
  0xba   : > { %v3486_v3 = vunpack.c.l.bf16 %v3485_v0  ;;  %v3487_v4 = vunpack.c.h.bf16 %v3485_v0  ;;  %v3490_v5 = vunpack.c.l.bf16 %v3628_v1  ;;  %v3491_v6 = vunpack.c.h.bf16 %v3628_v1  ;;  %v3630_v7 = vld [vmem:[%s4933_s16 + $0x18] sm:$0xff]   ;;  %v3631_v8 = vld [vmem:[%s4933_s16 + $0x20] sm:$0xff]   ;;  %643 = vst.msk [vmem:[#allocation3] sm:$0xff] %vm642_vm0, %v4585_v9  ;;  %644 = vst.msk [vmem:[#allocation3 + $0x8] sm:$0xff] %vm642_vm0, %v4585_v9 }
  0xbb   : > { %645 = vst.msk [vmem:[#allocation3 + $0x10] sm:$0xff] %vm642_vm0, %v4585_v9  ;;  %646 = vst.msk [vmem:[#allocation3 + $0x18] sm:$0xff] %vm642_vm0, %v4585_v9  ;;  %v3494_v10 = vunpack.c.l.bf16 %v3629_v2  ;;  %v3495_v11 = vunpack.c.h.bf16 %v3629_v2  ;;  %v3498_v12 = vunpack.c.l.bf16 %v3630_v7  ;;  %v3499_v13 = vunpack.c.h.bf16 %v3630_v7  ;;  %v3632_v14 = vld [vmem:[%s4933_s16 + $0x28] sm:$0xff]   ;;  %v3633_v15 = vld [vmem:[%s4933_s16 + $0x30] sm:$0xff]  }
  0xbc   : > { %647 = vst.msk [vmem:[#allocation3 + $0x20] sm:$0xff] %vm642_vm0, %v4585_v9  ;;  %648 = vst.msk [vmem:[#allocation3 + $0x28] sm:$0xff] %vm642_vm0, %v4585_v9  ;;  %v450_v16 = vmul.f32 0.088388346, %v3486_v3  ;;  %v451_v17 = vmul.f32 0.088388346, %v3487_v4  ;;  %v3502_v19 = vunpack.c.l.bf16 %v3631_v8  ;;  %v3503_v24 = vunpack.c.h.bf16 %v3631_v8 }
  0xbd   : > { %649 = vst.msk [vmem:[#allocation3 + $0x30] sm:$0xff] %vm642_vm0, %v4585_v9  ;;  %650 = vst.msk [vmem:[#allocation3 + $0x38] sm:$0xff] %vm642_vm0, %v4585_v9  ;;  %v452_v18 = vmul.f32 0.088388346, %v3490_v5  ;;  %v3634_v20 = vld [vmem:[%s4933_s16 + $0x38] sm:$0xff]   ;;  %v3506_v32 = vunpack.c.l.bf16 %v3632_v14  ;;  %v3635_v33 = vld [vmem:[%s4933_s16 + $0x40] sm:$0xff]   ;;  %v3507_v35 = vunpack.c.h.bf16 %v3632_v14  ;;  %v3510_v36 = vunpack.c.l.bf16 %v3633_v15 }
  0xbe   : > { %651 = vst.msk [vmem:[#allocation3 + $0x40] sm:$0xff] %vm642_vm0, %v4585_v9  ;;  %652 = vst.msk [vmem:[#allocation3 + $0x48] sm:$0xff] %vm642_vm0, %v4585_v9  ;;  %v453_v21 = vmul.f32 0.088388346, %v3491_v6  ;;  %v454_v22 = vmul.f32 0.088388346, %v3494_v10  ;;  %v3551_v25 = vpack.c.bf16 %v451_v17, %v450_v16  ;;  %v3511_v37 = vunpack.c.h.bf16 %v3633_v15 }
  0xbf   : > { %653 = vst.msk [vmem:[#allocation3 + $0x50] sm:$0xff] %vm642_vm0, %v4585_v9  ;;  %654 = vst.msk [vmem:[#allocation3 + $0x58] sm:$0xff] %vm642_vm0, %v4585_v9  ;;  %v455_v23 = vmul.f32 0.088388346, %v3495_v11  ;;  %v456_v26 = vmul.f32 0.088388346, %v3498_v12  ;;  %v3514_v41 = vunpack.c.l.bf16 %v3634_v20  ;;  %v3515_v42 = vunpack.c.h.bf16 %v3634_v20 }
  0xc0   : > { %655 = vst.msk [vmem:[#allocation3 + $0x60] sm:$0xff] %vm642_vm0, %v4585_v9  ;;  %656 = vst.msk [vmem:[#allocation3 + $0x68] sm:$0xff] %vm642_vm0, %v4585_v9  ;;  %v457_v27 = vmul.f32 0.088388346, %v3499_v13  ;;  %v458_v28 = vmul.f32 0.088388346, %v3502_v19  ;;  %v3556_v29 = vpack.c.bf16 %v453_v21, %v452_v18  ;;  %v3518_v47 = vunpack.c.l.bf16 %v3635_v33 }
  0xc1   : > { %657 = vst.msk [vmem:[#allocation3 + $0x70] sm:$0xff] %vm642_vm0, %v4585_v9  ;;  %658 = vst.msk [vmem:[#allocation3 + $0x78] sm:$0xff] %vm642_vm0, %v4585_v9  ;;  %v3561_v30 = vpack.c.bf16 %v455_v23, %v454_v22  ;;  %v459_v31 = vmul.f32 0.088388346, %v3503_v24  ;;  %v3636_v38 = vld [vmem:[%s4933_s16 + $0x48] sm:$0xff]   ;;  %v3637_v43 = vld [vmem:[%s4933_s16 + $0x50] sm:$0xff]   ;;  %v3519_v50 = vunpack.c.h.bf16 %v3635_v33 }
  0xc2   : > { %659 = vst.msk [vmem:[#allocation3 + $0x80] sm:$0xff] %vm642_vm0, %v4585_v9  ;;  %660 = vst.msk [vmem:[#allocation3 + $0x88] sm:$0xff] %vm642_vm0, %v4585_v9  ;;  %v3566_v34 = vpack.c.bf16 %v457_v27, %v456_v26  ;;  %v460_v40 = vmul.f32 0.088388346, %v3506_v32  ;;  %v461_v44 = vmul.f32 0.088388346, %v3507_v35  ;;  %v3522_v51 = vunpack.c.l.bf16 %v3636_v38 }
  0xc3   : > { %661 = vst.msk [vmem:[#allocation3 + $0x90] sm:$0xff] %vm642_vm0, %v4585_v9  ;;  %662 = vst.msk [vmem:[#allocation3 + $0x98] sm:$0xff] %vm642_vm0, %v4585_v9  ;;  %v3571_v39 = vpack.c.bf16 %v459_v31, %v458_v28  ;;  %v462_v45 = vmul.f32 0.088388346, %v3510_v36  ;;  %v463_v46 = vmul.f32 0.088388346, %v3511_v37  ;;  %v3523_v56 = vunpack.c.h.bf16 %v3636_v38 }
  0xc4   : > { %663 = vst.msk [vmem:[#allocation3 + $0xa0] sm:$0xff] %vm642_vm0, %v4585_v9  ;;  %664 = vst.msk [vmem:[#allocation3 + $0xa8] sm:$0xff] %vm642_vm0, %v4585_v9  ;;  %v464_v48 = vmul.f32 0.088388346, %v3514_v41  ;;  %v465_v49 = vmul.f32 0.088388346, %v3515_v42  ;;  %v3576_v53 = vpack.c.bf16 %v461_v44, %v460_v40  ;;  %v3526_v61 = vunpack.c.l.bf16 %v3637_v43 }
  0xc5   : > { %665 = vst.msk [vmem:[#allocation3 + $0xb0] sm:$0xff] %vm642_vm0, %v4585_v9  ;;  %666 = vst.msk [vmem:[#allocation3 + $0xb8] sm:$0xff] %vm642_vm0, %v4585_v9  ;;  %v3638_v52 = vld [vmem:[%s4933_s16 + $0x58] sm:$0xff]   ;;  %v3581_v54 = vpack.c.bf16 %v463_v46, %v462_v45  ;;  %v466_v55 = vmul.f32 0.088388346, %v3518_v47  ;;  %v3639_v57 = vld [vmem:[%s4933_s16 + $0x60] sm:$0xff]   ;;  %v3527_v63 = vunpack.c.h.bf16 %v3637_v43 }
  0xc6   : > { %667 = vst.msk [vmem:[#allocation3 + $0xc0] sm:$0xff] %vm642_vm0, %v4585_v9  ;;  %668 = vst.msk [vmem:[#allocation3 + $0xc8] sm:$0xff] %vm642_vm0, %v4585_v9  ;;  %v3586_v58 = vpack.c.bf16 %v465_v49, %v464_v48  ;;  %v467_v59 = vmul.f32 0.088388346, %v3519_v50  ;;  %v468_v60 = vmul.f32 0.088388346, %v3522_v51  ;;  %v3530_v0 = vunpack.c.l.bf16 %v3638_v52 }
  0xc7   : > { %669 = vst.msk [vmem:[#allocation3 + $0xd0] sm:$0xff] %vm642_vm0, %v4585_v9  ;;  %670 = vst.msk [vmem:[#allocation3 + $0xd8] sm:$0xff] %vm642_vm0, %v4585_v9  ;;  %v469_v62 = vmul.f32 0.088388346, %v3523_v56  ;;  %v3531_v1 = vunpack.c.h.bf16 %v3638_v52  ;;  %v3640_v2 = vld [vmem:[%s4933_s16 + $0x68] sm:$0xff]   ;;  %v3534_v5 = vunpack.c.l.bf16 %v3639_v57  ;;  %v3535_v6 = vunpack.c.h.bf16 %v3639_v57  ;;  %v3641_v7 = vld [vmem:[%s4933_s16 + $0x70] sm:$0xff]  }
  0xc8   : > { %671 = vst.msk [vmem:[#allocation3 + $0xe0] sm:$0xff] %vm642_vm0, %v4585_v9  ;;  %672 = vst.msk [vmem:[#allocation3 + $0xe8] sm:$0xff] %vm642_vm0, %v4585_v9  ;;  %v3591_v3 = vpack.c.bf16 %v467_v59, %v466_v55  ;;  %v470_v4 = vmul.f32 0.088388346, %v3526_v61  ;;  %v5008_v8 = vld [vmem:[%s4933_s16 + $0x78] sm:$0xff]   ;;  %v3538_v15 = vunpack.c.l.bf16 %v3640_v2  ;;  %v3539_v16 = vunpack.c.h.bf16 %v3640_v2 }
  0xc9   : > { %673 = vst.msk [vmem:[#allocation3 + $0xf0] sm:$0xff] %vm642_vm0, %v4585_v9  ;;  %674 = vst.msk [vmem:[#allocation3 + $0xf8] sm:$0xff] %vm642_vm0, %v4585_v9  ;;  %v3596_v9 = vpack.c.bf16 %v469_v62, %v468_v60  ;;  %v471_v10 = vmul.f32 0.088388346, %v3527_v63  ;;  %v472_v11 = vmul.f32 0.088388346, %v3530_v0  ;;  %v3542_v19 = vunpack.c.l.bf16 %v3641_v7 }
  0xca   : > { %3552 = vst [vmem:[#allocation2] sm:$0xff] %v3551_v25   ;;  %3643 = vst [vmem:[#allocation2 + $0x8] sm:$0xff] %v3556_v29   ;;  %v473_v12 = vmul.f32 0.088388346, %v3531_v1  ;;  %v474_v13 = vmul.f32 0.088388346, %v3534_v5  ;;  %v3543_v20 = vunpack.c.h.bf16 %v3641_v7  ;;  %v3546_v24 = vunpack.c.l.bf16 %v5008_v8 }
  0xcb   : > { %3644 = vst [vmem:[#allocation2 + $0x10] sm:$0xff] %v3561_v30   ;;  %3645 = vst [vmem:[#allocation2 + $0x18] sm:$0xff] %v3566_v34   ;;  %v475_v14 = vmul.f32 0.088388346, %v3535_v6  ;;  %v3601_v17 = vpack.c.bf16 %v471_v10, %v470_v4  ;;  %v5010_v22 = vmul.f32 0.088388346, %v3538_v15  ;;  %v3547_v27 = vunpack.c.h.bf16 %v5008_v8 }
  0xcc   : > { %3646 = vst [vmem:[#allocation2 + $0x20] sm:$0xff] %v3571_v39   ;;  %3647 = vst [vmem:[#allocation2 + $0x28] sm:$0xff] %v3576_v53   ;;  %v3606_v18 = vpack.c.bf16 %v473_v12, %v472_v11  ;;  %v5012_v23 = vmul.f32 0.088388346, %v3539_v16  ;;  %v5015_v25 = vmul.f32 0.088388346, %v3542_v19 }
  0xcd   : > { %3648 = vst [vmem:[#allocation2 + $0x30] sm:$0xff] %v3581_v54   ;;  %3649 = vst [vmem:[#allocation2 + $0x38] sm:$0xff] %v3586_v58   ;;  %v3611_v21 = vpack.c.bf16 %v475_v14, %v474_v13  ;;  %v5017_v26 = vmul.f32 0.088388346, %v3543_v20  ;;  %v5022_v29 = vmul.f32 0.088388346, %v3546_v24 }
  0xce   : > { %3650 = vst [vmem:[#allocation2 + $0x40] sm:$0xff] %v3591_v3   ;;  %3651 = vst [vmem:[#allocation2 + $0x48] sm:$0xff] %v3596_v9   ;;  %v3616_v28 = vpack.c.bf16 %v5012_v23, %v5010_v22  ;;  %v4586_v30 = vmov 0.0   ;;  %v481_v32 = vmul.f32 0.088388346, %v3547_v27 }
  0xcf   : > { %3652 = vst [vmem:[#allocation2 + $0x50] sm:$0xff] %v3601_v17   ;;  %3653 = vst [vmem:[#allocation2 + $0x58] sm:$0xff] %v3606_v18   ;;  %v3621_v31 = vpack.c.bf16 %v5017_v26, %v5015_v25 }
  0xd0   : > { %3654 = vst [vmem:[#allocation2 + $0x60] sm:$0xff] %v3611_v21   ;;  %675 = vst.msk [vmem:[#allocation4] sm:$0xff] %vm642_vm0, %v4586_v30  ;;  %v3626_v33 = vpack.c.bf16 %v481_v32, %v5022_v29 }
  0xd1   : > { %676 = vst.msk [vmem:[#allocation4 + $0x8] sm:$0xff] %vm642_vm0, %v4586_v30  ;;  %677 = vst.msk [vmem:[#allocation4 + $0x10] sm:$0xff] %vm642_vm0, %v4586_v30 }
  0xd2   : > { %678 = vst.msk [vmem:[#allocation4 + $0x18] sm:$0xff] %vm642_vm0, %v4586_v30  ;;  %679 = vst.msk [vmem:[#allocation4 + $0x20] sm:$0xff] %vm642_vm0, %v4586_v30 }
  0xd3   : > { %680 = vst.msk [vmem:[#allocation4 + $0x28] sm:$0xff] %vm642_vm0, %v4586_v30  ;;  %681 = vst.msk [vmem:[#allocation4 + $0x30] sm:$0xff] %vm642_vm0, %v4586_v30 }
  0xd4   : > { %682 = vst.msk [vmem:[#allocation4 + $0x38] sm:$0xff] %vm642_vm0, %v4586_v30  ;;  %683 = vst.msk [vmem:[#allocation4 + $0x40] sm:$0xff] %vm642_vm0, %v4586_v30 }
  0xd5   : > { %684 = vst.msk [vmem:[#allocation4 + $0x48] sm:$0xff] %vm642_vm0, %v4586_v30  ;;  %685 = vst.msk [vmem:[#allocation4 + $0x50] sm:$0xff] %vm642_vm0, %v4586_v30 }
  0xd6   : > { %686 = vst.msk [vmem:[#allocation4 + $0x58] sm:$0xff] %vm642_vm0, %v4586_v30  ;;  %687 = vst.msk [vmem:[#allocation4 + $0x60] sm:$0xff] %vm642_vm0, %v4586_v30 }
  0xd7   : > { %688 = vst.msk [vmem:[#allocation4 + $0x68] sm:$0xff] %vm642_vm0, %v4586_v30  ;;  %689 = vst.msk [vmem:[#allocation4 + $0x70] sm:$0xff] %vm642_vm0, %v4586_v30 }
  0xd8   : > { %690 = vst.msk [vmem:[#allocation4 + $0x78] sm:$0xff] %vm642_vm0, %v4586_v30  ;;  %691 = vst.msk [vmem:[#allocation4 + $0x80] sm:$0xff] %vm642_vm0, %v4586_v30 }
  0xd9   : > { %692 = vst.msk [vmem:[#allocation4 + $0x88] sm:$0xff] %vm642_vm0, %v4586_v30  ;;  %693 = vst.msk [vmem:[#allocation4 + $0x90] sm:$0xff] %vm642_vm0, %v4586_v30 }
  0xda   : > { %694 = vst.msk [vmem:[#allocation4 + $0x98] sm:$0xff] %vm642_vm0, %v4586_v30  ;;  %695 = vst.msk [vmem:[#allocation4 + $0xa0] sm:$0xff] %vm642_vm0, %v4586_v30 }
  0xdb   : > { %696 = vst.msk [vmem:[#allocation4 + $0xa8] sm:$0xff] %vm642_vm0, %v4586_v30  ;;  %697 = vst.msk [vmem:[#allocation4 + $0xb0] sm:$0xff] %vm642_vm0, %v4586_v30 }
  0xdc   : > { %698 = vst.msk [vmem:[#allocation4 + $0xb8] sm:$0xff] %vm642_vm0, %v4586_v30  ;;  %699 = vst.msk [vmem:[#allocation4 + $0xc0] sm:$0xff] %vm642_vm0, %v4586_v30 }
  0xdd   : > { %700 = vst.msk [vmem:[#allocation4 + $0xc8] sm:$0xff] %vm642_vm0, %v4586_v30  ;;  %701 = vst.msk [vmem:[#allocation4 + $0xd0] sm:$0xff] %vm642_vm0, %v4586_v30 }
  0xde   : > { %702 = vst.msk [vmem:[#allocation4 + $0xd8] sm:$0xff] %vm642_vm0, %v4586_v30  ;;  %703 = vst.msk [vmem:[#allocation4 + $0xe0] sm:$0xff] %vm642_vm0, %v4586_v30 }
  0xdf   : > { %704 = vst.msk [vmem:[#allocation4 + $0xe8] sm:$0xff] %vm642_vm0, %v4586_v30  ;;  %705 = vst.msk [vmem:[#allocation4 + $0xf0] sm:$0xff] %vm642_vm0, %v4586_v30 }
  0xe0   : > { %706 = vst.msk [vmem:[#allocation4 + $0xf8] sm:$0xff] %vm642_vm0, %v4586_v30  ;;  %707 = vst [vmem:[#allocation5 + $0xb0] sm:$0xff] %v4586_v30 }
  0xe1   : > { %708 = vst [vmem:[#allocation5] sm:$0xff] %v4586_v30  ;;  %709 = vst [vmem:[#allocation5 + $0xd8] sm:$0xff] %v4586_v30 }
  0xe2   : > { %710 = vst [vmem:[#allocation5 + $0x18] sm:$0xff] %v4586_v30  ;;  %711 = vst [vmem:[#allocation5 + $0x50] sm:$0xff] %v4586_v30 }
  0xe3   : > { %712 = vst [vmem:[#allocation5 + $0x68] sm:$0xff] %v4586_v30  ;;  %713 = vst [vmem:[#allocation5 + $0x30] sm:$0xff] %v4586_v30 }
  0xe4   : > { %714 = vst [vmem:[#allocation5 + $0x48] sm:$0xff] %v4586_v30  ;;  %715 = vst [vmem:[#allocation5 + $0x80] sm:$0xff] %v4586_v30 }
  0xe5   : > { %716 = vst [vmem:[#allocation5 + $0x88] sm:$0xff] %v4586_v30  ;;  %717 = vst [vmem:[#allocation5 + $0xe8] sm:$0xff] %v4586_v30 }
  0xe6   : > { %718 = vst [vmem:[#allocation5 + $0xb8] sm:$0xff] %v4586_v30  ;;  %719 = vst [vmem:[#allocation5 + $0x60] sm:$0xff] %v4586_v30 }
  0xe7   : > { %720 = vst [vmem:[#allocation5 + $0xf0] sm:$0xff] %v4586_v30  ;;  %721 = vst [vmem:[#allocation5 + $0x8] sm:$0xff] %v4586_v30 }
  0xe8   : > { %722 = vst [vmem:[#allocation5 + $0x78] sm:$0xff] %v4586_v30  ;;  %723 = vst [vmem:[#allocation5 + $0x38] sm:$0xff] %v4586_v30 }
  0xe9   : > { %724 = vst [vmem:[#allocation5 + $0x58] sm:$0xff] %v4586_v30  ;;  %725 = vst [vmem:[#allocation5 + $0x40] sm:$0xff] %v4586_v30 }
  0xea   : > { %726 = vst [vmem:[#allocation5 + $0xc8] sm:$0xff] %v4586_v30  ;;  %727 = vst [vmem:[#allocation5 + $0xe0] sm:$0xff] %v4586_v30 }
  0xeb   : > { %728 = vst [vmem:[#allocation5 + $0x90] sm:$0xff] %v4586_v30  ;;  %729 = vst [vmem:[#allocation5 + $0x70] sm:$0xff] %v4586_v30 }
  0xec   : > { %730 = vst [vmem:[#allocation5 + $0xc0] sm:$0xff] %v4586_v30  ;;  %731 = vst [vmem:[#allocation5 + $0xa8] sm:$0xff] %v4586_v30 }
  0xed   : > { %732 = vst [vmem:[#allocation5 + $0xd0] sm:$0xff] %v4586_v30  ;;  %733 = vst [vmem:[#allocation5 + $0x10] sm:$0xff] %v4586_v30 }
  0xee   : > { %734 = vst [vmem:[#allocation5 + $0x28] sm:$0xff] %v4586_v30  ;;  %735 = vst [vmem:[#allocation5 + $0xa0] sm:$0xff] %v4586_v30 }
  0xef   : > { %736 = vst [vmem:[#allocation5 + $0xf8] sm:$0xff] %v4586_v30  ;;  %737 = vst [vmem:[#allocation5 + $0x20] sm:$0xff] %v4586_v30 }
  0xf0   : > { %738 = vst [vmem:[#allocation5 + $0x98] sm:$0xff] %v4586_v30  ;;  %3655 = vst [vmem:[#allocation2 + $0x68] sm:$0xff] %v3616_v28  }
  0xf1   : > { %3656 = vst [vmem:[#allocation2 + $0x70] sm:$0xff] %v3621_v31   ;;  %3657 = vst [vmem:[#allocation2 + $0x78] sm:$0xff] %v3626_v33  }
  0xf2 PF: > { %v3988_v34 = vld [vmem:[%s4941_s9 + $0x78] sm:$0xff]   ;;  %v3990_v36 = vld [vmem:[%s4941_s9 + $0x70] sm:$0xff]   ;;  %v3992_v38 = vld [vmem:[%s4941_s9 + $0x68] sm:$0xff]   ;;  %vm2084_vm1 = vcmask 7168   ;;  %s6713_s10 = sld [smem:[#allocation24_spill]] }
  0xf3   : > { %v3989_v35 = vld [vmem:[%s4941_s9 + $0x38] sm:$0xff]   ;;  %3658 = vmatprep.subr.bf16.mxu0 %v3988_v34  ;;  %v3991_v37 = vld [vmem:[%s4941_s9 + $0x30] sm:$0xff]   ;;  %v3993_v39 = vld [vmem:[%s4941_s9 + $0x28] sm:$0xff]  }
  0xf4   : > { %3659 = vmatpush3.bf16.xpose.msra.mxu0 %v3989_v35  ;;  %v3994_v40 = vld [vmem:[%s4941_s9 + $0x60] sm:$0xff]   ;;  %v3996_v43 = vld [vmem:[%s4941_s9 + $0x58] sm:$0xff]   ;;  %v3998_v45 = vld [vmem:[%s4941_s9 + $0x50] sm:$0xff]  }
  0xf5   : > { %3660 = vmatprep.subr.bf16.mxu0 %v3990_v36  ;;  %v4004_v41 = vld [vmem:[#allocation2] sm:$0xff]   ;;  %v3997_v44 = vld [vmem:[%s4941_s9 + $0x18] sm:$0xff]   ;;  %v3999_v46 = vld [vmem:[%s4941_s9 + $0x10] sm:$0xff]  }
  0xf6   : > { %3674 = vmatprep.mubr.bf16.mxu0 %v4004_v41  ;;  %v3995_v42 = vld [vmem:[%s4941_s9 + $0x20] sm:$0xff]   ;;  %v4000_v47 = vld [vmem:[%s4941_s9 + $0x48] sm:$0xff]   ;;  %v4006_v52 = vld [vmem:[#allocation2 + $0x10] sm:$0xff]  }
  0xf7   : > { %v4001_v48 = vld [vmem:[%s4941_s9 + $0x8] sm:$0xff]   ;;  %v4002_v49 = vld [vmem:[%s4941_s9 + $0x40] sm:$0xff]   ;;  %v4007_v53 = vld [vmem:[#allocation2 + $0x18] sm:$0xff]  }
  0xf8   : > { %v4003_v50 = vld [vmem:[%s4941_s9] sm:$0xff]   ;;  %v4005_v51 = vld [vmem:[#allocation2 + $0x8] sm:$0xff]   ;;  %v4010_v56 = vld [vmem:[#allocation2 + $0x30] sm:$0xff]   ;;  %p3444_p10 = scmp.ne.s32.totalorder %s6713_s10, 1 }
  0xf9   : > { %v4008_v54 = vld [vmem:[#allocation2 + $0x20] sm:$0xff]   ;;  %v4009_v55 = vld [vmem:[#allocation2 + $0x28] sm:$0xff]   ;;  %v4011_v57 = vld [vmem:[#allocation2 + $0x38] sm:$0xff]  }
  0xfa   : > { %v4012_v58 = vld [vmem:[#allocation2 + $0x40] sm:$0xff]   ;;  %v4013_v59 = vld [vmem:[#allocation2 + $0x48] sm:$0xff]   ;;  %v4014_v60 = vld [vmem:[#allocation2 + $0x50] sm:$0xff]  }
  0xfb   : > { %v4015_v61 = vld [vmem:[#allocation2 + $0x58] sm:$0xff]   ;;  %v4016_v62 = vld [vmem:[#allocation2 + $0x60] sm:$0xff]   ;;  %v4017_v63 = vld [vmem:[#allocation2 + $0x68] sm:$0xff]  }
  0xfc   : > { %3661 = vmatpush3.bf16.xpose.msra.mxu0 %v3991_v37  ;;  %v4018_v0 = vld [vmem:[#allocation2 + $0x70] sm:$0xff]   ;;  %v4019_v1 = vld [vmem:[#allocation2 + $0x78] sm:$0xff]   ;;  %v803_v2 = vld [vmem:[%s4950_s21] sm:$0xff] }
  0xfd   : > { %3662 = vmatprep.subr.bf16.mxu0 %v3992_v38  ;;  %v835_v3 = vunpack.c.l.bf16 %v803_v2  ;;  %v836_v4 = vunpack.c.h.bf16 %v803_v2  ;;  %v804_v6 = vld [vmem:[%s4950_s21 + $0x8] sm:$0xff]  ;;  %v805_v13 = vld [vmem:[%s4950_s21 + $0x10] sm:$0xff]  ;;  %v806_v21 = vld [vmem:[%s4950_s21 + $0x18] sm:$0xff] }
  0xfe   : > { %v837_v10 = vunpack.c.l.bf16 %v804_v6  ;;  %v838_v11 = vunpack.c.h.bf16 %v804_v6  ;;  %v839_v18 = vunpack.c.l.bf16 %v805_v13  ;;  %v840_v19 = vunpack.c.h.bf16 %v805_v13  ;;  %v807_v29 = vld [vmem:[%s4950_s21 + $0x20] sm:$0xff]  ;;  %v808_v37 = vld [vmem:[%s4950_s21 + $0x28] sm:$0xff] }
  0xff   : > { %v841_v26 = vunpack.c.l.bf16 %v806_v21  ;;  %v842_v27 = vunpack.c.h.bf16 %v806_v21  ;;  %v843_v34 = vunpack.c.l.bf16 %v807_v29  ;;  %v844_v35 = vunpack.c.h.bf16 %v807_v29  ;;  %v812_v6 = vld [vmem:[%s4950_s21 + $0x48] sm:$0xff] }
 0x100   : > { %v853_v13 = vunpack.c.l.bf16 %v812_v6 }
 0x104   : > { %3663 = vmatpush3.bf16.xpose.msra.mxu0 %v3993_v39 }
 0x105   : > { %3664 = vmatprep.subr.bf16.mxu0 %v3994_v40  ;;  %v4587_v40 = vmov 0  }
 0x106   : > { %3986 = vset.pattern.permute.xlu0 %v4587_v40  ;;  %3987 = vset.pattern.permute.xlu1 %v4587_v40 }
 0x10c   : > { %3665 = vmatpush3.bf16.xpose.msra.mxu0 %v3995_v42 }
 0x10d   : > { %3666 = vmatprep.subr.bf16.mxu0 %v3996_v43  ;;  %v845_v43 = vunpack.c.l.bf16 %v808_v37 }
 0x114   : > { %3667 = vmatpush3.bf16.xpose.msra.mxu0 %v3997_v44  ;;  %v846_v44 = vunpack.c.h.bf16 %v808_v37 }
 0x115   : > { %3668 = vmatprep.subr.bf16.mxu0 %v3998_v45 }
 0x11c   : > { %3669 = vmatpush3.bf16.xpose.msra.mxu0 %v3999_v46  ;;  %v809_v46 = vld [vmem:[%s4950_s21 + $0x30] sm:$0xff] }
 0x11d   : > { %3670 = vmatprep.subr.bf16.mxu0 %v4000_v47 }
 0x124   : > { %3671 = vmatpush3.bf16.xpose.msra.mxu0 %v4001_v48 }
 0x125   : > { %3672 = vmatprep.subr.bf16.mxu0 %v4002_v49 }
 0x12c   : > { %3673 = vmatpush3.bf16.xpose.msra.mxu0 %v4003_v50 }
 0x133   : > { %3675 = vmatmul.mubr.bf16.vlgmr.msra.gmra.mxu0 %v4004_v41 }
 0x134   : > { %3676 = vmatprep.mubr.bf16.mxu0 %v4005_v51 }
 0x13b   : > { %3677 = vmatmul.mubr.bf16.gmra.mxu0 %v4005_v51  ;;  %v847_v51 = vunpack.c.l.bf16 %v809_v46 }
 0x13c   : > { %3678 = vmatprep.mubr.bf16.mxu0 %v4006_v52 }
 0x143   : > { %3679 = vmatmul.mubr.bf16.gmra.mxu0 %v4006_v52  ;;  %v848_v52 = vunpack.c.h.bf16 %v809_v46 }
 0x144   : > { %3680 = vmatprep.mubr.bf16.mxu0 %v4007_v53 }
 0x14b   : > { %3681 = vmatmul.mubr.bf16.gmra.mxu0 %v4007_v53 }
 0x14c   : > { %3682 = vmatprep.mubr.bf16.mxu0 %v4008_v54 }
 0x153   : > { %3683 = vmatmul.mubr.bf16.gmra.mxu0 %v4008_v54  ;;  %v810_v54 = vld [vmem:[%s4950_s21 + $0x38] sm:$0xff] }
 0x154   : > { %3684 = vmatprep.mubr.bf16.mxu0 %v4009_v55 }
 0x15b   : > { %3685 = vmatmul.mubr.bf16.gmra.mxu0 %v4009_v55 }
 0x15c   : > { %3686 = vmatprep.mubr.bf16.mxu0 %v4010_v56 }
 0x163   : > { %3687 = vmatmul.mubr.bf16.gmra.mxu0 %v4010_v56 }
 0x164   : > { %3688 = vmatprep.mubr.bf16.mxu0 %v4011_v57 }
 0x16b   : > { %3689 = vmatmul.mubr.bf16.gmra.mxu0 %v4011_v57 }
 0x16c   : > { %3690 = vmatprep.mubr.bf16.mxu0 %v4012_v58 }
 0x173   : > { %3691 = vmatmul.mubr.bf16.gmra.mxu0 %v4012_v58 }
 0x174   : > { %3692 = vmatprep.mubr.bf16.mxu0 %v4013_v59 }
 0x17b   : > { %3693 = vmatmul.mubr.bf16.gmra.mxu0 %v4013_v59  ;;  %v849_v59 = vunpack.c.l.bf16 %v810_v54 }
 0x17c   : > { %3694 = vmatprep.mubr.bf16.mxu0 %v4014_v60 }
 0x183   : > { %3695 = vmatmul.mubr.bf16.gmra.mxu0 %v4014_v60  ;;  %v850_v60 = vunpack.c.h.bf16 %v810_v54 }
 0x184   : > { %3696 = vmatprep.mubr.bf16.mxu0 %v4015_v61 }
 0x18b   : > { %3697 = vmatmul.mubr.bf16.gmra.mxu0 %v4015_v61 }
 0x18c   : > { %3698 = vmatprep.mubr.bf16.mxu0 %v4016_v62 }
 0x193   : > { %3699 = vmatmul.mubr.bf16.gmra.mxu0 %v4016_v62  ;;  %v811_v62 = vld [vmem:[%s4950_s21 + $0x40] sm:$0xff] }
 0x194   : > { %3700 = vmatprep.mubr.bf16.mxu0 %v4017_v63 }
 0x19b   : > { %3701 = vmatmul.mubr.bf16.gmra.mxu0 %v4017_v63 }
 0x19c   : > { %3702 = vmatprep.mubr.bf16.mxu0 %v4018_v0 }
 0x1a3   : > { %3703 = vmatmul.mubr.bf16.gmra.mxu0 %v4018_v0 }
 0x1a4   : > { %3704 = vmatprep.mubr.bf16.mxu0 %v4019_v1 }
 0x1ab   : > { %3705 = vmatmul.mubr.bf16.gmra.mxu0 %v4019_v1 }
 0x1f3   : > { %v1125_v5 = vpop.f32.mrf.mxu0 }
 0x1f4   : > { %v5146_v8 = vadd.f32 %v1125_v5, %v835_v3  ;;  %v851_v3 = vunpack.c.l.bf16 %v811_v62 }
 0x1f5   : > { %v1127_v7 = vpop.f32.mrf.mxu0 }
 0x1f6   : > { %v5148_v9 = vadd.f32 %v1127_v7, %v836_v4  ;;  %v852_v4 = vunpack.c.h.bf16 %v811_v62 }
 0x1f7   : > { %v1129_v12 = vpop.f32.mrf.mxu0 }
 0x1f8   : > { %v1316_v14 = vmax.f32 %v5146_v8, %v5148_v9  ;;  %v5153_v16 = vadd.f32 %v1129_v12, %v837_v10 }
 0x1f9   : > { %v1131_v15 = vpop.f32.mrf.mxu0 }
 0x1fa   : > { %v5155_v17 = vadd.f32 %v1131_v15, %v838_v11  ;;  %1317 = vmax.xlane.f32.xlu0 %v1316_v14  ;;  %v854_v14 = vunpack.c.h.bf16 %v812_v6 }
 0x1fb   : > { %v1135_v20 = vpop.f32.mrf.mxu0 }
 0x1fc   : > { %v1319_v22 = vmax.f32 %v5153_v16, %v5155_v17  ;;  %v5160_v24 = vadd.f32 %v1135_v20, %v839_v18  ;;  %v813_v18 = vld [vmem:[%s4950_s21 + $0x50] sm:$0xff] }
 0x1fd   : > { %v1137_v23 = vpop.f32.mrf.mxu0 }
 0x1fe   : > { %v5162_v25 = vadd.f32 %v1137_v23, %v840_v19  ;;  %1320 = vmax.xlane.f32.xlu0 %v1319_v22  ;;  %v855_v23 = vunpack.c.l.bf16 %v813_v18 }
 0x1ff   : > { %v1139_v28 = vpop.f32.mrf.mxu0 }
 0x200   : > { %v1322_v30 = vmax.f32 %v5160_v24, %v5162_v25  ;;  %v5167_v32 = vadd.f32 %v1139_v28, %v841_v26  ;;  %v856_v26 = vunpack.c.h.bf16 %v813_v18  ;;  %v814_v28 = vld [vmem:[%s4950_s21 + $0x58] sm:$0xff] }
 0x201   : > { %v1141_v31 = vpop.f32.mrf.mxu0  ;;  %v858_v37 = vunpack.c.h.bf16 %v814_v28 }
 0x202   : > { %v5169_v33 = vadd.f32 %v1141_v31, %v842_v27  ;;  %1323 = vmax.xlane.f32.xlu1 %v1322_v30  ;;  %v815_v31 = vld [vmem:[%s4950_s21 + $0x60] sm:$0xff] }
 0x203   : > { %v1145_v36 = vpop.f32.mrf.mxu0  ;;  %v859_v40 = vunpack.c.l.bf16 %v815_v31 }
 0x204   : > { %v1325_v38 = vmax.f32 %v5167_v32, %v5169_v33  ;;  %v5174_v41 = vadd.f32 %v1145_v36, %v843_v34  ;;  %v857_v36 = vunpack.c.l.bf16 %v814_v28 }
 0x205   : > { %v1147_v39 = vpop.f32.mrf.mxu0 }
 0x206   : > { %v5176_v42 = vadd.f32 %v1147_v39, %v844_v35  ;;  %1326 = vmax.xlane.f32.xlu1 %v1325_v38 }
 0x207   : > { %v1149_v45 = vpop.f32.mrf.mxu0 }
 0x208   : > { %v1328_v47 = vmax.f32 %v5174_v41, %v5176_v42  ;;  %v5181_v49 = vadd.f32 %v1149_v45, %v845_v43 }
 0x209   : > { %v1151_v48 = vpop.f32.mrf.mxu0 }
 0x20a   : > { %v5183_v50 = vadd.f32 %v1151_v48, %v846_v44  ;;  %1329 = vmax.xlane.f32.xlu0 %v1328_v47  ;;  %v816_v44 = vld [vmem:[%s4950_s21 + $0x68] sm:$0xff]  ;;  %v860_v47 = vunpack.c.h.bf16 %v815_v31 }
 0x20b   : > { %v1155_v53 = vpop.f32.mrf.mxu0 }
 0x20c   : > { %v1331_v55 = vmax.f32 %v5181_v49, %v5183_v50  ;;  %v5188_v57 = vadd.f32 %v1155_v53, %v847_v51  ;;  %v861_v53 = vunpack.c.l.bf16 %v816_v44 }
 0x20d   : > { %v1157_v56 = vpop.f32.mrf.mxu0 }
 0x20e   : > { %v5190_v58 = vadd.f32 %v1157_v56, %v848_v52  ;;  %1332 = vmax.xlane.f32.xlu1 %v1331_v55  ;;  %v817_v55 = vld [vmem:[%s4950_s21 + $0x70] sm:$0xff] }
 0x20f   : > { %v1159_v61 = vpop.f32.mrf.mxu0  ;;  %v863_v62 = vunpack.c.l.bf16 %v817_v55 }
 0x210   : > { %v1334_v63 = vmax.f32 %v5188_v57, %v5190_v58  ;;  %v5195_v1 = vadd.f32 %v1159_v61, %v849_v59  ;;  %v862_v59 = vunpack.c.h.bf16 %v816_v44 }
 0x211   : > { %v1161_v0 = vpop.f32.mrf.mxu0 }
 0x212   : > { %v5197_v2 = vadd.f32 %v1161_v0, %v850_v60  ;;  %1335 = vmax.xlane.f32.xlu0 %v1334_v63 }
 0x213   : > { %v1165_v5 = vpop.f32.mrf.mxu0 }
 0x214   : > { %v1337_v7 = vmax.f32 %v5195_v1, %v5197_v2  ;;  %v5202_v11 = vadd.f32 %v1165_v5, %v851_v3  ;;  %v818_v3 = vld [vmem:[%s4950_s21 + $0x78] sm:$0xff]  ;;  %v864_v5 = vunpack.c.h.bf16 %v817_v55 }
 0x215   : > { %v1167_v10 = vpop.f32.mrf.mxu0 }
 0x216   : > { %v5204_v12 = vadd.f32 %v1167_v10, %v852_v4  ;;  %1338 = vmax.xlane.f32.xlu1 %v1337_v7  ;;  %v865_v10 = vunpack.c.l.bf16 %v818_v3 }
 0x217   : > { %v1169_v15 = vpop.f32.mrf.mxu0 }
 0x218   : > { %v1340_v19 = vmax.f32 %v5202_v11, %v5204_v12  ;;  %v5209_v21 = vadd.f32 %v1169_v15, %v853_v13  ;;  %v819_v15 = vld [vmem:[%s4950_s21 + $0x80] sm:$0xff] }
 0x219   : > { %v1171_v20 = vpop.f32.mrf.mxu0  ;;  %v868_v31 = vunpack.c.h.bf16 %v819_v15 }
 0x21a   : > { %v5211_v22 = vadd.f32 %v1171_v20, %v854_v14  ;;  %1341 = vmax.xlane.f32.xlu0 %v1340_v19  ;;  %v866_v19 = vunpack.c.h.bf16 %v818_v3 }
 0x21b   : > { %v1175_v27 = vpop.f32.mrf.mxu0 }
 0x21c   : > { %v1343_v29 = vmax.f32 %v5209_v21, %v5211_v22  ;;  %v5217_v34 = vadd.f32 %v1175_v27, %v855_v23 }
 0x21d   : > { %v1177_v30 = vpop.f32.mrf.mxu0 }
 0x21e   : > { %v5219_v35 = vadd.f32 %v1177_v30, %v856_v26  ;;  %1344 = vmax.xlane.f32.xlu1 %v1343_v29  ;;  %v867_v26 = vunpack.c.l.bf16 %v819_v15  ;;  %v820_v29 = vld [vmem:[%s4950_s21 + $0x88] sm:$0xff] }
 0x21f   : > { %v1179_v38 = vpop.f32.mrf.mxu0 }
 0x220   : > { %v1346_v39 = vmax.f32 %v5217_v34, %v5219_v35  ;;  %v5224_v45 = vadd.f32 %v1179_v38, %v857_v36  ;;  %v869_v38 = vunpack.c.l.bf16 %v820_v29 }
 0x221   : > { %v1181_v43 = vpop.f32.mrf.mxu0 }
 0x222   : > { %v5226_v46 = vadd.f32 %v1181_v43, %v858_v37  ;;  %1347 = vmax.xlane.f32.xlu0 %v1346_v39  ;;  %v821_v43 = vld [vmem:[%s4950_s21 + $0x90] sm:$0xff] }
 0x223   : > { %v1185_v48 = vpop.f32.mrf.mxu0 }
 0x224   : > { %v5228_v51 = vadd.f32 %v1185_v48, %v859_v40  ;;  %v1349_v52 = vmax.f32 %v5224_v45, %v5226_v46 }
 0x225   : > { %v1187_v54 = vpop.f32.mrf.mxu0 }
 0x226   : > { %6497 = vst [vmem:[#allocation36_spill] sm:$0xff] %v5228_v51  ;;  %v5233_v56 = vadd.f32 %v1187_v54, %v860_v47  ;;  %1350 = vmax.xlane.f32.xlu1 %v1349_v52  ;;  %v870_v47 = vunpack.c.h.bf16 %v820_v29 }
 0x227   : > { %v1189_v60 = vpop.f32.mrf.mxu0 }
 0x228   : > { %6498 = vst [vmem:[#allocation37_spill] sm:$0xff] %v5233_v56  ;;  %v5235_v61 = vadd.f32 %v1189_v60, %v861_v53  ;;  %v1352_v63 = vmax.f32 %v5228_v51, %v5233_v56  ;;  %v871_v53 = vunpack.c.l.bf16 %v821_v43  ;;  %v5514_v51 = vld [vmem:[#allocation3 + $0x78] sm:$0xff] }
 0x229   : > { %v1191_v0 = vpop.f32.mrf.mxu0  ;;  %6540 = vst [vmem:[#allocation79_spill] sm:$0xff] %v5514_v51 }
 0x22a   : > { %6499 = vst [vmem:[#allocation38_spill] sm:$0xff] %v5235_v61  ;;  %v5240_v4 = vadd.f32 %v1191_v0, %v862_v59  ;;  %1353 = vmax.xlane.f32.xlu0 %v1352_v63  ;;  %v822_v59 = vld [vmem:[%s4950_s21 + $0x98] sm:$0xff] }
 0x22b   : > { %v1195_v6 = vpop.f32.mrf.mxu0  ;;  %v873_v3 = vunpack.c.l.bf16 %v822_v59 }
 0x22c   : > { %6500 = vst [vmem:[#allocation39_spill] sm:$0xff] %v5240_v4  ;;  %v5242_v7 = vadd.f32 %v1195_v6, %v863_v62  ;;  %v1355_v13 = vmax.f32 %v5235_v61, %v5240_v4  ;;  %v872_v62 = vunpack.c.h.bf16 %v821_v43 }
 0x22d   : > { %v1197_v14 = vpop.f32.mrf.mxu0 }
 0x22e   : > { %6501 = vst [vmem:[#allocation40_spill] sm:$0xff] %v5242_v7  ;;  %v5247_v18 = vadd.f32 %v1197_v14, %v864_v5  ;;  %1356 = vmax.xlane.f32.xlu1 %v1355_v13  ;;  %v874_v14 = vunpack.c.h.bf16 %v822_v59 }
 0x22f   : > { %v1199_v20 = vpop.f32.mrf.mxu0 }
 0x230   : > { %6502 = vst [vmem:[#allocation41_spill] sm:$0xff] %v5247_v18  ;;  %v5249_v23 = vadd.f32 %v1199_v20, %v865_v10  ;;  %v1358_v27 = vmax.f32 %v5242_v7, %v5247_v18  ;;  %v823_v10 = vld [vmem:[%s4950_s21 + $0xa0] sm:$0xff]  ;;  %v834_v18 = vld [vmem:[%s4950_s21 + $0xf8] sm:$0xff] }
 0x231   : > { %v1201_v28 = vpop.f32.mrf.mxu0  ;;  %v875_v20 = vunpack.c.l.bf16 %v823_v10  ;;  %v897_v61 = vunpack.c.l.bf16 %v834_v18  ;;  %v898_v56 = vunpack.c.h.bf16 %v834_v18  ;;  %v5548_v18 = vld [vmem:[#allocation3 + $0x90] sm:$0xff] }
 0x232   : > { %6503 = vst [vmem:[#allocation42_spill] sm:$0xff] %v5249_v23  ;;  %v5254_v30 = vadd.f32 %v1201_v28, %v866_v19  ;;  %1359 = vmax.xlane.f32.xlu0 %v1358_v27  ;;  %v824_v28 = vld [vmem:[%s4950_s21 + $0xa8] sm:$0xff]  ;;  %6546 = vst [vmem:[#allocation85_spill] sm:$0xff] %v5548_v18 }
 0x233   : > { %v1205_v36 = vpop.f32.mrf.mxu0 }
 0x234   : > { %6504 = vst [vmem:[#allocation43_spill] sm:$0xff] %v5254_v30  ;;  %v5256_v37 = vadd.f32 %v1205_v36, %v867_v26  ;;  %v1361_v39 = vmax.f32 %v5249_v23, %v5254_v30  ;;  %v5495_v30 = vld [vmem:[#allocation3 + $0x68] sm:$0xff] }
 0x235   : > { %v1207_v40 = vpop.f32.mrf.mxu0  ;;  %6538 = vst [vmem:[#allocation77_spill] sm:$0xff] %v5495_v30 }
 0x236   : > { %6505 = vst [vmem:[#allocation44_spill] sm:$0xff] %v5256_v37  ;;  %v5261_v44 = vadd.f32 %v1207_v40, %v868_v31  ;;  %1362 = vmax.xlane.f32.xlu1 %v1361_v39  ;;  %v876_v31 = vunpack.c.h.bf16 %v823_v10  ;;  %v877_v39 = vunpack.c.l.bf16 %v824_v28 }
 0x237   : > { %v1209_v48 = vpop.f32.mrf.mxu0 }
 0x238   : > { %6506 = vst [vmem:[#allocation45_spill] sm:$0xff] %v5261_v44  ;;  %v5263_v52 = vadd.f32 %v1209_v48, %v869_v38  ;;  %v1364_v54 = vmax.f32 %v5256_v37, %v5261_v44  ;;  %v5504_v37 = vld [vmem:[#allocation3 + $0x70] sm:$0xff] }
 0x239   : > { %v1211_v55 = vpop.f32.mrf.mxu0  ;;  %6539 = vst [vmem:[#allocation78_spill] sm:$0xff] %v5504_v37 }
 0x23a   : > { %6507 = vst [vmem:[#allocation46_spill] sm:$0xff] %v5263_v52  ;;  %v5268_v60 = vadd.f32 %v1211_v55, %v870_v47  ;;  %1365 = vmax.xlane.f32.xlu0 %v1364_v54  ;;  %v825_v47 = vld [vmem:[%s4950_s21 + $0xb0] sm:$0xff] }
 0x23b   : > { %v1215_v63 = vpop.f32.mrf.mxu0  ;;  %v879_v59 = vunpack.c.l.bf16 %v825_v47 }
 0x23c   : > { %6508 = vst [vmem:[#allocation47_spill] sm:$0xff] %v5268_v60  ;;  %v5270_v0 = vadd.f32 %v1215_v63, %v871_v53  ;;  %v1367_v5 = vmax.f32 %v5263_v52, %v5268_v60  ;;  %v878_v53 = vunpack.c.h.bf16 %v824_v28  ;;  %v5485_v52 = vld [vmem:[#allocation3 + $0x60] sm:$0xff] }
 0x23d   : > { %v1217_v6 = vpop.f32.mrf.mxu0  ;;  %6537 = vst [vmem:[#allocation76_spill] sm:$0xff] %v5485_v52 }
 0x23e   : > { %6509 = vst [vmem:[#allocation48_spill] sm:$0xff] %v5270_v0  ;;  %v5275_v13 = vadd.f32 %v1217_v6, %v872_v62  ;;  %1368 = vmax.xlane.f32.xlu1 %v1367_v5  ;;  %v880_v6 = vunpack.c.h.bf16 %v825_v47 }
 0x23f   : > { %v1219_v15 = vpop.f32.mrf.mxu0 }
 0x240   : > { %6510 = vst [vmem:[#allocation49_spill] sm:$0xff] %v5275_v13  ;;  %v5277_v19 = vadd.f32 %v1219_v15, %v873_v3  ;;  %v1370_v26 = vmax.f32 %v5270_v0, %v5275_v13  ;;  %v826_v3 = vld [vmem:[%s4950_s21 + $0xb8] sm:$0xff]  ;;  %v5465_v0 = vld [vmem:[#allocation3 + $0x50] sm:$0xff] }
 0x241   : > { %v1221_v27 = vpop.f32.mrf.mxu0  ;;  %v881_v15 = vunpack.c.l.bf16 %v826_v3  ;;  %6533 = vst [vmem:[#allocation72_spill] sm:$0xff] %v5465_v0 }
 0x242   : > { %6511 = vst [vmem:[#allocation50_spill] sm:$0xff] %v5277_v19  ;;  %v5282_v29 = vadd.f32 %v1221_v27, %v874_v14  ;;  %1371 = vmax.xlane.f32.xlu0 %v1370_v26  ;;  %v827_v27 = vld [vmem:[%s4950_s21 + $0xc0] sm:$0xff] }
 0x243   : > { %v1225_v36 = vpop.f32.mrf.mxu0 }
 0x244   : > { %6512 = vst [vmem:[#allocation51_spill] sm:$0xff] %v5282_v29  ;;  %v5284_v38 = vadd.f32 %v1225_v36, %v875_v20  ;;  %v1373_v40 = vmax.f32 %v5277_v19, %v5282_v29  ;;  %v5435_v19 = vld [vmem:[#allocation3 + $0x38] sm:$0xff] }
 0x245   : > { %v1227_v43 = vpop.f32.mrf.mxu0 }
 0x246   : > { %6513 = vst [vmem:[#allocation52_spill] sm:$0xff] %v5284_v38  ;;  %v5289_v48 = vadd.f32 %v1227_v43, %v876_v31  ;;  %1374 = vmax.xlane.f32.xlu1 %v1373_v40  ;;  %v882_v31 = vunpack.c.h.bf16 %v826_v3  ;;  %v883_v40 = vunpack.c.l.bf16 %v827_v27 }
 0x247   : > { %v1229_v54 = vpop.f32.mrf.mxu0 }
 0x248   : > { %6514 = vst [vmem:[#allocation53_spill] sm:$0xff] %v5289_v48  ;;  %v5291_v55 = vadd.f32 %v1229_v54, %v877_v39  ;;  %v1376_v62 = vmax.f32 %v5284_v38, %v5289_v48 }
 0x249   : > { %v1231_v63 = vpop.f32.mrf.mxu0 }
 0x24a   : > { %6515 = vst [vmem:[#allocation54_spill] sm:$0xff] %v5291_v55  ;;  %v5296_v5 = vadd.f32 %v1231_v63, %v878_v53  ;;  %1377 = vmax.xlane.f32.xlu1 %v1376_v62  ;;  %v828_v53 = vld [vmem:[%s4950_s21 + $0xc8] sm:$0xff] }
 0x24b   : > { %v1235_v10 = vpop.f32.mrf.mxu0  ;;  %v885_v3 = vunpack.c.l.bf16 %v828_v53 }
 0x24c   : > { %6516 = vst [vmem:[#allocation55_spill] sm:$0xff] %v5296_v5  ;;  %v5298_v14 = vadd.f32 %v1235_v10, %v879_v59  ;;  %v1379_v20 = vmax.f32 %v5291_v55, %v5296_v5  ;;  %v884_v59 = vunpack.c.h.bf16 %v827_v27 }
 0x24d   : > { %v1237_v26 = vpop.f32.mrf.mxu0 }
 0x24e   : > { %6517 = vst [vmem:[#allocation56_spill] sm:$0xff] %v5298_v14  ;;  %v5303_v28 = vadd.f32 %v1237_v26, %v880_v6  ;;  %1380 = vmax.xlane.f32.xlu0 %v1379_v20  ;;  %v886_v26 = vunpack.c.h.bf16 %v828_v53 }
 0x24f   : > { %v1239_v36 = vpop.f32.mrf.mxu0 }
 0x250   : > { %6518 = vst [vmem:[#allocation57_spill] sm:$0xff] %v5303_v28  ;;  %v5305_v39 = vadd.f32 %v1239_v36, %v881_v15  ;;  %v1382_v43 = vmax.f32 %v5298_v14, %v5303_v28  ;;  %v829_v15 = vld [vmem:[%s4950_s21 + $0xd0] sm:$0xff] }
 0x251   : > { %v1241_v47 = vpop.f32.mrf.mxu0  ;;  %v887_v27 = vunpack.c.l.bf16 %v829_v15  ;;  %v888_v28 = vunpack.c.h.bf16 %v829_v15 }
 0x252   : > { %6519 = vst [vmem:[#allocation58_spill] sm:$0xff] %v5305_v39  ;;  %v5310_v54 = vadd.f32 %v1241_v47, %v882_v31  ;;  %1383 = vmax.xlane.f32.xlu1 %v1382_v43  ;;  %v830_v47 = vld [vmem:[%s4950_s21 + $0xd8] sm:$0xff] }
 0x253   : > { %v1245_v62 = vpop.f32.mrf.mxu0  ;;  %v889_v53 = vunpack.c.l.bf16 %v830_v47  ;;  %v890_v48 = vunpack.c.h.bf16 %v830_v47 }
 0x254   : > { %6520 = vst [vmem:[#allocation59_spill] sm:$0xff] %v5310_v54  ;;  %v5312_v63 = vadd.f32 %v1245_v62, %v883_v40  ;;  %v1385_v6 = vmax.f32 %v5305_v39, %v5310_v54  ;;  %v5475_v39 = vld [vmem:[#allocation3 + $0x58] sm:$0xff] }
 0x255   : > { %v1247_v10 = vpop.f32.mrf.mxu0  ;;  %6535 = vst [vmem:[#allocation74_spill] sm:$0xff] %v5475_v39 }
 0x256   : > { %6521 = vst [vmem:[#allocation60_spill] sm:$0xff] %v5312_v63  ;;  %v5317_v20 = vadd.f32 %v1247_v10, %v884_v59  ;;  %1386 = vmax.xlane.f32.xlu0 %v1385_v6  ;;  %v831_v10 = vld [vmem:[%s4950_s21 + $0xe0] sm:$0xff] }
 0x257   : > { %v1249_v36 = vpop.f32.mrf.mxu0 }
 0x258   : > { %6522 = vst [vmem:[#allocation61_spill] sm:$0xff] %v5317_v20  ;;  %v5319_v31 = vadd.f32 %v1249_v36, %v885_v3  ;;  %v1388_v43 = vmax.f32 %v5312_v63, %v5317_v20 }
 0x259   : > { %v1251_v40 = vpop.f32.mrf.mxu0 }
 0x25a   : > { %6523 = vst [vmem:[#allocation62_spill] sm:$0xff] %v5319_v31  ;;  %v5324_v62 = vadd.f32 %v1251_v40, %v886_v26  ;;  %1389 = vmax.xlane.f32.xlu0 %v1388_v43  ;;  %v891_v26 = vunpack.c.l.bf16 %v831_v10  ;;  %v892_v40 = vunpack.c.h.bf16 %v831_v10 }
 0x25b   : > { %v1255_v14 = vpop.f32.mrf.mxu0 }
 0x25c   : > { %6524 = vst [vmem:[#allocation63_spill] sm:$0xff] %v5324_v62  ;;  %v5326_v59 = vadd.f32 %v1255_v14, %v887_v27  ;;  %v1391_v6 = vmax.f32 %v5319_v31, %v5324_v62  ;;  %v832_v14 = vld [vmem:[%s4950_s21 + $0xe8] sm:$0xff] }
 0x25d   : > { %v1257_v3 = vpop.f32.mrf.mxu0  ;;  %v5455_v31 = vld [vmem:[#allocation3 + $0x48] sm:$0xff] }
 0x25e   : > { %6525 = vst [vmem:[#allocation64_spill] sm:$0xff] %v5326_v59  ;;  %v5331_v36 = vadd.f32 %v1257_v3, %v888_v28  ;;  %1392 = vmax.xlane.f32.xlu1 %v1391_v6  ;;  %v893_v28 = vunpack.c.l.bf16 %v832_v14  ;;  %v894_v6 = vunpack.c.h.bf16 %v832_v14  ;;  %v4022_v14 = vld [vmem:[%s4948_s4 + $0x70] sm:$0xff]  }
 0x25f   : > { %v1259_v20 = vpop.f32.mrf.mxu0 }
 0x260   : > { %6526 = vst [vmem:[#allocation65_spill] sm:$0xff] %v5331_v36  ;;  %v5333_v63 = vadd.f32 %v1259_v20, %v889_v53  ;;  %v1394_v15 = vmax.f32 %v5326_v59, %v5331_v36  ;;  %v4031_v36 = vld [vmem:[%s4948_s4 + $0x10] sm:$0xff]  }
 0x261   : > { %v1261_v43 = vpop.f32.mrf.mxu0 }
 0x262   : > { %6527 = vst [vmem:[#allocation66_spill] sm:$0xff] %v5333_v63  ;;  %v5338_v27 = vadd.f32 %v1261_v43, %v890_v48  ;;  %1395 = vmax.xlane.f32.xlu1 %v1394_v15  ;;  %v4020_v43 = vld [vmem:[%s4948_s4 + $0x78] sm:$0xff]  }
 0x263   : > { %v1265_v38 = vpop.f32.mrf.mxu0  ;;  %3706 = vmatprep.subr.bf16.mxu1 %v4020_v43  ;;  %v4026_v43 = vld [vmem:[%s4948_s4 + $0x60] sm:$0xff]  }
 0x264   : > { %6528 = vst [vmem:[#allocation67_spill] sm:$0xff] %v5338_v27  ;;  %v5340_v29 = vadd.f32 %v1265_v38, %v891_v26  ;;  %v1397_v20 = vmax.f32 %v5333_v63, %v5338_v27  ;;  %v4035_v27 = vld [vmem:[%s4948_s4] sm:$0xff]  }
 0x265   : > { %v1267_v47 = vpop.f32.mrf.mxu0 }
 0x266   : > { %6529 = vst [vmem:[#allocation68_spill] sm:$0xff] %v5340_v29  ;;  %v5344_v53 = vadd.f32 %v1267_v47, %v892_v40  ;;  %1398 = vmax.xlane.f32.xlu0 %v1397_v20  ;;  %v4021_v40 = vld [vmem:[%s4948_s4 + $0x38] sm:$0xff]   ;;  %v5358_v20 = vld [vmem:[#allocation3] sm:$0xff]  ;;  %v4024_v47 = vld [vmem:[%s4948_s4 + $0x68] sm:$0xff]  }
 0x267   : > { %v1269_v48 = vpop.f32.mrf.mxu0  ;;  %3707 = vmatpush3.bf16.msra.mxu1 %v4021_v40 }
 0x268   : > { %6530 = vst [vmem:[#allocation69_spill] sm:$0xff] %v5344_v53  ;;  %v5346_v3 = vadd.f32 %v1269_v48, %v893_v28  ;;  %v1400_v38 = vmax.f32 %v5340_v29, %v5344_v53  ;;  %v4023_v28 = vld [vmem:[%s4948_s4 + $0x30] sm:$0xff]   ;;  %3708 = vmatprep.subr.bf16.mxu1 %v4022_v14  ;;  %v4025_v48 = vld [vmem:[%s4948_s4 + $0x28] sm:$0xff]   ;;  %v4027_v14 = vld [vmem:[%s4948_s4 + $0x20] sm:$0xff]  }
 0x269   : > { %v1271_v10 = vpop.f32.mrf.mxu0  ;;  %v4029_v53 = vld [vmem:[%s4948_s4 + $0x18] sm:$0xff]  }
 0x26a   : > { %6531 = vst [vmem:[#allocation70_spill] sm:$0xff] %v5346_v3  ;;  %v5350_v26 = vadd.f32 %v1271_v10, %v894_v6  ;;  %1401 = vmax.xlane.f32.xlu0 %v1400_v38  ;;  %v5365_v10 = vld [vmem:[#allocation3 + $0x8] sm:$0xff] }
 0x26b   : > { %3709 = vmatpush3.bf16.msra.mxu1 %v4023_v28 }
 0x26c   : > { %6532 = vst [vmem:[#allocation71_spill] sm:$0xff] %v5350_v26  ;;  %v1403_v15 = vmax.f32 %v5346_v3, %v5350_v26  ;;  %3710 = vmatprep.subr.bf16.mxu1 %v4024_v47  ;;  %v5377_v47 = vld [vmem:[#allocation3 + $0x10] sm:$0xff]  ;;  %v4033_v26 = vld [vmem:[%s4948_s4 + $0x8] sm:$0xff]  }
 0x26e   : > { %1404 = vmax.xlane.f32.xlu1 %v1403_v15 }
 0x26f   : > { %3711 = vmatpush3.bf16.msra.mxu1 %v4025_v48  ;;  %v4028_v48 = vld [vmem:[%s4948_s4 + $0x58] sm:$0xff]  }
 0x270   : > { %3712 = vmatprep.subr.bf16.mxu1 %v4026_v43  ;;  %v5389_v43 = vld [vmem:[#allocation3 + $0x18] sm:$0xff] }
 0x273   : > { %3713 = vmatpush3.bf16.msra.mxu1 %v4027_v14  ;;  %v4032_v14 = vld [vmem:[%s4948_s4 + $0x48] sm:$0xff]  }
 0x274   : > { %3714 = vmatprep.subr.bf16.mxu1 %v4028_v48  ;;  %v5401_v48 = vld [vmem:[#allocation3 + $0x20] sm:$0xff] }
 0x277   : > { %3715 = vmatpush3.bf16.msra.mxu1 %v4029_v53  ;;  %v4034_v53 = vld [vmem:[%s4948_s4 + $0x40] sm:$0xff]  }
 0x283   : > { %v1318_v6 = vpop.xlane.xlu0 %1317 }
 0x284   : > { %v5363_v38 = vmax.f32 %v5358_v20, %v1318_v6  ;;  %v4030_v6 = vld [vmem:[%s4948_s4 + $0x50] sm:$0xff]  }
 0x285   : > { %3716 = vmatprep.subr.bf16.mxu1 %v4030_v6  ;;  %v5413_v6 = vld [vmem:[#allocation3 + $0x28] sm:$0xff] }
 0x286   : > { %2726 = vst.msk [vmem:[#allocation3] sm:$0xff] %vm2084_vm1, %v5363_v38  ;;  %1542 = vperm.xlu0 %3986, %v5363_v38   ;;  %3717 = vmatpush3.bf16.msra.mxu1 %v4031_v36 }
 0x287   : > { %v1321_v40 = vpop.xlane.xlu0 %1320  ;;  %3718 = vmatprep.subr.bf16.mxu1 %v4032_v14 }
 0x288   : > { %v5375_v28 = vmax.f32 %v5365_v10, %v1321_v40 }
 0x28a   : > { %2727 = vst.msk [vmem:[#allocation3 + $0x8] sm:$0xff] %vm2084_vm1, %v5375_v28  ;;  %1547 = vperm.xlu1 %3987, %v5375_v28   ;;  %3719 = vmatpush3.bf16.msra.mxu1 %v4033_v26  ;;  %v5445_v26 = vld [vmem:[#allocation3 + $0x40] sm:$0xff] }
 0x28b   : > { %v1324_v15 = vpop.xlane.xlu1 %1323  ;;  %3720 = vmatprep.subr.bf16.mxu1 %v4034_v53 }
 0x28c   : > { %v5387_v40 = vmax.f32 %v5377_v47, %v1324_v15 }
 0x28e   : > { %2728 = vst.msk [vmem:[#allocation3 + $0x10] sm:$0xff] %vm2084_vm1, %v5387_v40  ;;  %1552 = vperm.xlu1 %3987, %v5387_v40   ;;  %3721 = vmatpush3.bf16.msra.mxu1 %v4035_v27 }
 0x28f   : > { %v1327_v29 = vpop.xlane.xlu1 %1326 }
 0x290   : > { %v5399_v15 = vmax.f32 %v5389_v43, %v1327_v29 }
 0x292   : > { %2729 = vst.msk [vmem:[#allocation3 + $0x18] sm:$0xff] %vm2084_vm1, %v5399_v15  ;;  %1557 = vperm.xlu1 %3987, %v5399_v15  }
 0x293   : > { %v1330_v59 = vpop.xlane.xlu0 %1329 }
 0x294   : > { %v5411_v29 = vmax.f32 %v5401_v48, %v1330_v59  ;;  %v5425_v59 = vld [vmem:[#allocation3 + $0x30] sm:$0xff] }
 0x296   : > { %2730 = vst.msk [vmem:[#allocation3 + $0x20] sm:$0xff] %vm2084_vm1, %v5411_v29  ;;  %1562 = vperm.xlu0 %3986, %v5411_v29  }
 0x297   : > { %v1333_v3 = vpop.xlane.xlu1 %1332 }
 0x298   : > { %v5423_v63 = vmax.f32 %v5413_v6, %v1333_v3 }
 0x29a   : > { %2731 = vst.msk [vmem:[#allocation3 + $0x28] sm:$0xff] %vm2084_vm1, %v5423_v63  ;;  %1567 = vperm.xlu0 %3986, %v5423_v63  }
 0x29b   : > { %v1336_v14 = vpop.xlane.xlu0 %1335 }
 0x29c   : > { %v5433_v36 = vmax.f32 %v5425_v59, %v1336_v14 }
 0x29e   : > { %2732 = vst.msk [vmem:[#allocation3 + $0x30] sm:$0xff] %vm2084_vm1, %v5433_v36  ;;  %1572 = vperm.xlu1 %3987, %v5433_v36  }
 0x29f   : > { %v1339_v27 = vpop.xlane.xlu1 %1338 }
 0x2a0   : > { %v5443_v53 = vmax.f32 %v5435_v19, %v1339_v27 }
 0x2a2   : > { %2733 = vst.msk [vmem:[#allocation3 + $0x38] sm:$0xff] %vm2084_vm1, %v5443_v53  ;;  %1577 = vperm.xlu1 %3987, %v5443_v53  }
 0x2a3   : > { %v1342_v3 = vpop.xlane.xlu0 %1341 }
 0x2a4   : > { %v5453_v62 = vmax.f32 %v5445_v26, %v1342_v3 }
 0x2a6   : > { %2734 = vst.msk [vmem:[#allocation3 + $0x40] sm:$0xff] %vm2084_vm1, %v5453_v62  ;;  %1582 = vperm.xlu0 %3986, %v5453_v62  }
 0x2a7   : > { %v1345_v14 = vpop.xlane.xlu1 %1344 }
 0x2a8   : > { %v5463_v13 = vmax.f32 %v5455_v31, %v1345_v14  ;;  %v1275_v14 = vpop.f32.mrf.mxu0 }
 0x2aa   : > { %2735 = vst.msk [vmem:[#allocation3 + $0x48] sm:$0xff] %vm2084_vm1, %v5463_v13  ;;  %1587 = vperm.xlu0 %3986, %v5463_v13   ;;  %v1277_v23 = vpop.f32.mrf.mxu0 }
 0x2ab   : > { %v1348_v27 = vpop.xlane.xlu0 %1347 }
 0x2ac   : > { %v5473_v54 = vmax.f32 %v5465_v0, %v1348_v27  ;;  %v1279_v7 = vpop.f32.mrf.mxu0 }
 0x2ae   : > { %6534 = vst [vmem:[#allocation73_spill] sm:$0xff] %v5473_v54  ;;  %2736 = vst.msk [vmem:[#allocation3 + $0x50] sm:$0xff] %vm2084_vm1, %v5473_v54  ;;  %1592 = vperm.xlu1 %3987, %v5473_v54   ;;  %v5538_v54 = vld [vmem:[#allocation3 + $0x88] sm:$0xff] }
 0x2af   : > { %v1351_v3 = vpop.xlane.xlu1 %1350  ;;  %6545 = vst [vmem:[#allocation84_spill] sm:$0xff] %v5538_v54 }
 0x2b0   : > { %v5483_v60 = vmax.f32 %v5475_v39, %v1351_v3  ;;  %v5527_v39 = vld [vmem:[#allocation3 + $0x80] sm:$0xff] }
 0x2b1   : > { %6543 = vst [vmem:[#allocation82_spill] sm:$0xff] %v5527_v39 }
 0x2b2   : > { %6536 = vst [vmem:[#allocation75_spill] sm:$0xff] %v5483_v60  ;;  %2737 = vst.msk [vmem:[#allocation3 + $0x58] sm:$0xff] %vm2084_vm1, %v5483_v60  ;;  %1597 = vperm.xlu1 %3987, %v5483_v60   ;;  %v5523_v60 = vadd.f32 %v1279_v7, %v897_v61 }
 0x2b3   : > { %v1354_v5 = vpop.xlane.xlu0 %1353 }
 0x2b4   : > { %v5493_v55 = vmax.f32 %v5485_v52, %v1354_v5  ;;  %6541 = vst [vmem:[#allocation80_spill] sm:$0xff] %v5523_v60 }
 0x2b6   : > { %2738 = vst.msk [vmem:[#allocation3 + $0x60] sm:$0xff] %vm2084_vm1, %v5493_v55 }
 0x2b7   : > { %v1357_v27 = vpop.xlane.xlu1 %1356 }
 0x2b8   : > { %v5502_v44 = vmax.f32 %v5495_v30, %v1357_v27  ;;  %v1281_v27 = vpop.f32.mrf.mxu0 }
 0x2ba   : > { %2739 = vst.msk [vmem:[#allocation3 + $0x68] sm:$0xff] %vm2084_vm1, %v5502_v44 }
 0x2bb   : > { %v1360_v4 = vpop.xlane.xlu0 %1359 }
 0x2bc   : > { %v5512_v3 = vmax.f32 %v5504_v37, %v1360_v4  ;;  %v5525_v4 = vadd.f32 %v1281_v27, %v898_v56  ;;  %v833_v27 = vld [vmem:[%s4950_s21 + $0xf0] sm:$0xff] }
 0x2bd   : > { %v896_v56 = vunpack.c.h.bf16 %v833_v27 }
 0x2be   : > { %2740 = vst.msk [vmem:[#allocation3 + $0x70] sm:$0xff] %vm2084_vm1, %v5512_v3  ;;  %6542 = vst [vmem:[#allocation81_spill] sm:$0xff] %v5525_v4 }
 0x2bf   : > { %v1363_v5 = vpop.xlane.xlu1 %1362 }
 0x2c0   : > { %v5521_v30 = vmax.f32 %v5514_v51, %v1363_v5  ;;  %v1409_v5 = vmax.f32 %v5523_v60, %v5525_v4  ;;  %v895_v60 = vunpack.c.l.bf16 %v833_v27  ;;  %v5557_v51 = vld [vmem:[#allocation3 + $0x98] sm:$0xff]  ;;  %v5570_v27 = vld [vmem:[#allocation3 + $0xa0] sm:$0xff] }
 0x2c1   : > { %6547 = vst [vmem:[#allocation86_spill] sm:$0xff] %v5557_v51  ;;  %6551 = vst [vmem:[#allocation90_spill] sm:$0xff] %v5570_v27 }
 0x2c2   : > { %2741 = vst.msk [vmem:[#allocation3 + $0x78] sm:$0xff] %vm2084_vm1, %v5521_v30  ;;  %v5563_v0 = vadd.f32 %v1275_v14, %v895_v60  ;;  %v5599_v14 = vld [vmem:[#allocation3 + $0xb8] sm:$0xff] }
 0x2c3   : > { %v1366_v52 = vpop.xlane.xlu0 %1365  ;;  %6557 = vst [vmem:[#allocation96_spill] sm:$0xff] %v5599_v14 }
 0x2c4   : > { %v5534_v37 = vmax.f32 %v5527_v39, %v1366_v52  ;;  %6548 = vst [vmem:[#allocation87_spill] sm:$0xff] %v5563_v0  ;;  %v5565_v52 = vadd.f32 %v1277_v23, %v896_v56  ;;  %v5581_v23 = vld [vmem:[#allocation3 + $0xa8] sm:$0xff] }
 0x2c5   : > { %6553 = vst [vmem:[#allocation92_spill] sm:$0xff] %v5581_v23 }
 0x2c6   : > { %6544 = vst [vmem:[#allocation83_spill] sm:$0xff] %v5534_v37  ;;  %2742 = vst.msk [vmem:[#allocation3 + $0x80] sm:$0xff] %vm2084_vm1, %v5534_v37 }
 0x2c7   : > { %v1369_v61 = vpop.xlane.xlu1 %1368  ;;  %6549 = vst [vmem:[#allocation88_spill] sm:$0xff] %v5565_v52 }
 0x2c8   : > { %v5545_v7 = vmax.f32 %v5538_v54, %v1369_v61 }
 0x2c9   : > { %1410 = vmax.xlane.f32.xlu0 %v1409_v5 }
 0x2ca   : > { %2743 = vst.msk [vmem:[#allocation3 + $0x88] sm:$0xff] %vm2084_vm1, %v5545_v7 }
 0x2cb   : > { %v1372_v4 = vpop.xlane.xlu0 %1371 }
 0x2cc   : > { %v5555_v39 = vmax.f32 %v5548_v18, %v1372_v4  ;;  %v1406_v18 = vmax.f32 %v5563_v0, %v5565_v52  ;;  %v5590_v4 = vld [vmem:[#allocation3 + $0xb0] sm:$0xff] }
 0x2cd   : > { %6555 = vst [vmem:[#allocation94_spill] sm:$0xff] %v5590_v4 }
 0x2ce   : > { %2744 = vst.msk [vmem:[#allocation3 + $0x90] sm:$0xff] %vm2084_vm1, %v5555_v39 }
 0x2cf   : > { %v1375_v5 = vpop.xlane.xlu1 %1374 }
 0x2d0   : > { %v5568_v54 = vmax.f32 %v5557_v51, %v1375_v5  ;;  %v5630_v51 = vld [vmem:[#allocation3 + $0xd0] sm:$0xff] }
 0x2d1   : > { %6562 = vst [vmem:[#allocation101_spill] sm:$0xff] %v5630_v51 }
 0x2d2   : > { %6550 = vst [vmem:[#allocation89_spill] sm:$0xff] %v5568_v54  ;;  %2745 = vst.msk [vmem:[#allocation3 + $0x98] sm:$0xff] %vm2084_vm1, %v5568_v54 }
 0x2d3   : > { %v1378_v61 = vpop.xlane.xlu1 %1377 }
 0x2d4   : > { %v5579_v60 = vmax.f32 %v5570_v27, %v1378_v61  ;;  %v5619_v27 = vld [vmem:[#allocation3 + $0xc8] sm:$0xff] }
 0x2d5   : > { %6560 = vst [vmem:[#allocation99_spill] sm:$0xff] %v5619_v27 }
 0x2d6   : > { %6552 = vst [vmem:[#allocation91_spill] sm:$0xff] %v5579_v60  ;;  %1407 = vmax.xlane.f32.xlu1 %v1406_v18  ;;  %2746 = vst.msk [vmem:[#allocation3 + $0xa0] sm:$0xff] %vm2084_vm1, %v5579_v60 }
 0x2d7   : > { %v1381_v56 = vpop.xlane.xlu0 %1380 }
 0x2d8   : > { %v5588_v5 = vmax.f32 %v5581_v23, %v1381_v56  ;;  %v5609_v23 = vld [vmem:[#allocation3 + $0xc0] sm:$0xff] }
 0x2d9   : > { %6559 = vst [vmem:[#allocation98_spill] sm:$0xff] %v5609_v23 }
 0x2da   : > { %6554 = vst [vmem:[#allocation93_spill] sm:$0xff] %v5588_v5  ;;  %2747 = vst.msk [vmem:[#allocation3 + $0xa8] sm:$0xff] %vm2084_vm1, %v5588_v5 }
 0x2db   : > { %v1384_v61 = vpop.xlane.xlu1 %1383 }
 0x2dc   : > { %v5597_v18 = vmax.f32 %v5590_v4, %v1384_v61 }
 0x2de   : > { %6556 = vst [vmem:[#allocation95_spill] sm:$0xff] %v5597_v18  ;;  %2748 = vst.msk [vmem:[#allocation3 + $0xb0] sm:$0xff] %vm2084_vm1, %v5597_v18 }
 0x2df   : > { %1602 = vperm.xlu0 %3986, %v5493_v55   ;;  %v1387_v56 = vpop.xlane.xlu0 %1386 }
 0x2e0   : > { %v5607_v52 = vmax.f32 %v5599_v14, %v1387_v56 }
 0x2e2   : > { %6558 = vst [vmem:[#allocation97_spill] sm:$0xff] %v5607_v52  ;;  %2749 = vst.msk [vmem:[#allocation3 + $0xb8] sm:$0xff] %vm2084_vm1, %v5607_v52 }
 0x2e3   : > { %1607 = vperm.xlu0 %3986, %v5502_v44   ;;  %v1390_v0 = vpop.xlane.xlu0 %1389 }
 0x2e4   : > { %v5617_v4 = vmax.f32 %v5609_v23, %v1390_v0 }
 0x2e6   : > { %2750 = vst.msk [vmem:[#allocation3 + $0xc0] sm:$0xff] %vm2084_vm1, %v5617_v4 }
 0x2e7   : > { %1612 = vperm.xlu0 %3986, %v5512_v3   ;;  %1622 = vperm.xlu1 %3987, %v5534_v37   ;;  %v1393_v61 = vpop.xlane.xlu1 %1392  ;;  %v5641_v37 = vld [vmem:[#allocation3 + $0xd8] sm:$0xff] }
 0x2e8   : > { %v5628_v14 = vmax.f32 %v5619_v27, %v1393_v61  ;;  %6563 = vst [vmem:[#allocation102_spill] sm:$0xff] %v5641_v37 }
 0x2ea   : > { %6561 = vst [vmem:[#allocation100_spill] sm:$0xff] %v5628_v14  ;;  %2751 = vst.msk [vmem:[#allocation3 + $0xc8] sm:$0xff] %vm2084_vm1, %v5628_v14 }
 0x2eb   : > { %1617 = vperm.xlu0 %3986, %v5521_v30   ;;  %1647 = vperm.xlu1 %3987, %v5588_v5   ;;  %v1396_v56 = vpop.xlane.xlu1 %1395  ;;  %v5652_v5 = vld [vmem:[#allocation3 + $0xe0] sm:$0xff] }
 0x2ec   : > { %v5639_v23 = vmax.f32 %v5630_v51, %v1396_v56  ;;  %6565 = vst [vmem:[#allocation104_spill] sm:$0xff] %v5652_v5 }
 0x2ee   : > { %2752 = vst.msk [vmem:[#allocation3 + $0xd0] sm:$0xff] %vm2084_vm1, %v5639_v23 }
 0x2ef   : > { %1627 = vperm.xlu0 %3986, %v5545_v7   ;;  %1657 = vperm.xlu1 %3987, %v5607_v52   ;;  %v1399_v0 = vpop.xlane.xlu0 %1398  ;;  %v5663_v52 = vld [vmem:[#allocation3 + $0xe8] sm:$0xff] }
 0x2f0   : > { %v5650_v27 = vmax.f32 %v5641_v37, %v1399_v0  ;;  %6566 = vst [vmem:[#allocation105_spill] sm:$0xff] %v5663_v52 }
 0x2f2   : > { %6564 = vst [vmem:[#allocation103_spill] sm:$0xff] %v5650_v27  ;;  %2753 = vst.msk [vmem:[#allocation3 + $0xd8] sm:$0xff] %vm2084_vm1, %v5650_v27 }
 0x2f3   : > { %1632 = vperm.xlu0 %3986, %v5555_v39   ;;  %1667 = vperm.xlu1 %3987, %v5628_v14   ;;  %v1402_v61 = vpop.xlane.xlu0 %1401 }
 0x2f4   : > { %v5661_v51 = vmax.f32 %v5652_v5, %v1402_v61 }
 0x2f6   : > { %2754 = vst.msk [vmem:[#allocation3 + $0xe0] sm:$0xff] %vm2084_vm1, %v5661_v51 }
 0x2f7   : > { %1637 = vperm.xlu0 %3986, %v5568_v54   ;;  %1677 = vperm.xlu1 %3987, %v5650_v27   ;;  %v1405_v56 = vpop.xlane.xlu1 %1404 }
 0x2f8   : > { %v5672_v37 = vmax.f32 %v5663_v52, %v1405_v56 }
 0x2fa   : > { %6567 = vst [vmem:[#allocation106_spill] sm:$0xff] %v5672_v37  ;;  %2755 = vst.msk [vmem:[#allocation3 + $0xe8] sm:$0xff] %vm2084_vm1, %v5672_v37 }
 0x2fb   : > { %1642 = vperm.xlu0 %3986, %v5579_v60   ;;  %1687 = vperm.xlu1 %3987, %v5672_v37  }
 0x2ff   : > { %1652 = vperm.xlu0 %3986, %v5597_v18  }
 0x301   : > { %v1543_v0 = vpop.permute.xlu0 %1542 }
 0x302   : > { %v1700_v5 = vsub.f32 %v5146_v8, %v1543_v0  ;;  %v1701_v27 = vsub.f32 %v5148_v9, %v1543_v0 }
 0x303   : > { %1662 = vperm.xlu0 %3986, %v5617_v4  }
 0x304   : > { %v1764_v56 = vmul.f32 1.442695, %v1700_v5  ;;  %v1766_v14 = vmul.f32 1.442695, %v1701_v27 }
 0x305   : > { %v1548_v54 = vpop.permute.xlu1 %1547 }
 0x306   : > { %4036 = vpow2.f32 %v1764_v56  ;;  %v1702_v61 = vsub.f32 %v5153_v16, %v1548_v54  ;;  %v1703_v52 = vsub.f32 %v5155_v17, %v1548_v54 }
 0x307   : > { %4038 = vpow2.f32 %v1766_v14  ;;  %1672 = vperm.xlu0 %3986, %v5639_v23  }
 0x308   : > { %v1768_v37 = vmul.f32 1.442695, %v1702_v61  ;;  %v1770_v18 = vmul.f32 1.442695, %v1703_v52 }
 0x309   : > { %v1553_v60 = vpop.permute.xlu1 %1552 }
 0x30a   : > { %4040 = vpow2.f32 %v1768_v37  ;;  %v1704_v8 = vsub.f32 %v5160_v24, %v1553_v60  ;;  %v1705_v9 = vsub.f32 %v5162_v25, %v1553_v60 }
 0x30b   : > { %4042 = vpow2.f32 %v1770_v18  ;;  %1682 = vperm.xlu0 %3986, %v5661_v51  }
 0x30c   : > { %v1772_v27 = vmul.f32 1.442695, %v1704_v8  ;;  %v1774_v5 = vmul.f32 1.442695, %v1705_v9 }
 0x30d   : > { %v1558_v0 = vpop.permute.xlu1 %1557 }
 0x30e   : > { %4044 = vpow2.f32 %v1772_v27  ;;  %v1706_v16 = vsub.f32 %v5167_v32, %v1558_v0  ;;  %v1707_v17 = vsub.f32 %v5169_v33, %v1558_v0 }
 0x30f   : > { %4046 = vpow2.f32 %v1774_v5 }
 0x310   : > { %v1776_v54 = vmul.f32 1.442695, %v1706_v16  ;;  %v1778_v52 = vmul.f32 1.442695, %v1707_v17 }
 0x311   : > { %v1563_v14 = vpop.permute.xlu0 %1562 }
 0x312   : > { %4048 = vpow2.f32 %v1776_v54  ;;  %v1708_v24 = vsub.f32 %v5174_v41, %v1563_v14  ;;  %v1709_v25 = vsub.f32 %v5176_v42, %v1563_v14 }
 0x313   : > { %v4037_v37 = vpop.eup %4036  ;;  %4050 = vpow2.f32 %v1778_v52 }
 0x314   : > { %v4039_v60 = vpop.eup %4038  ;;  %v1780_v18 = vmul.f32 1.442695, %v1708_v24  ;;  %v1782_v61 = vmul.f32 1.442695, %v1709_v25 }
 0x315   : > { %v1568_v56 = vpop.permute.xlu0 %1567  ;;  %v5694_v8 = vadd.f32 %v4039_v60, %v4037_v37 }
 0x316   : > { %4052 = vpow2.f32 %v1780_v18  ;;  %v1710_v32 = vsub.f32 %v5181_v49, %v1568_v56  ;;  %v1711_v33 = vsub.f32 %v5183_v50, %v1568_v56 }
 0x317   : > { %v4041_v9 = vpop.eup %4040  ;;  %4054 = vpow2.f32 %v1782_v61 }
 0x318   : > { %v4043_v27 = vpop.eup %4042  ;;  %v1784_v5 = vmul.f32 1.442695, %v1710_v32  ;;  %v1786_v41 = vmul.f32 1.442695, %v1711_v33  ;;  %v2341_v0 = vpack.c.bf16 %v4041_v9, %v4037_v37 }
 0x319   : > { %v1573_v42 = vpop.permute.xlu1 %1572  ;;  %v2342_v16 = vpack.c.bf16 %v4043_v27, %v4039_v60  ;;  %v5698_v17 = vadd.f32 %v4043_v27, %v4041_v9 }
 0x31a   : > { %4056 = vpow2.f32 %v1784_v5  ;;  %v1712_v54 = vsub.f32 %v5188_v57, %v1573_v42  ;;  %v1713_v52 = vsub.f32 %v5190_v58, %v1573_v42 }
 0x31b   : > { %v4045_v14 = vpop.eup %4044  ;;  %4058 = vpow2.f32 %v1786_v41  ;;  %2533 = vmatprep.mubr.bf16.mxu1 %v2342_v16 }
 0x31c   : > { %v4047_v49 = vpop.eup %4046  ;;  %v1788_v50 = vmul.f32 1.442695, %v1712_v54  ;;  %v1790_v24 = vmul.f32 1.442695, %v1713_v52  ;;  %2534 = vmatmul.mubr.bf16.vlgmr.msra.gmra.mxu1 %v2341_v0 }
 0x31d   : > { %v1578_v25 = vpop.permute.xlu1 %1577  ;;  %v5702_v18 = vadd.f32 %v4047_v49, %v4045_v14 }
 0x31e   : > { %4060 = vpow2.f32 %v1788_v50  ;;  %v1714_v37 = vsub.f32 %v5195_v1, %v1578_v25  ;;  %v1715_v60 = vsub.f32 %v5197_v2, %v1578_v25 }
 0x31f   : > { %v4049_v61 = vpop.eup %4048  ;;  %4062 = vpow2.f32 %v1790_v24 }
 0x320   : > { %v4051_v57 = vpop.eup %4050  ;;  %v1792_v56 = vmul.f32 1.442695, %v1714_v37  ;;  %v1794_v58 = vmul.f32 1.442695, %v1715_v60  ;;  %v2343_v32 = vpack.c.bf16 %v4049_v61, %v4045_v14 }
 0x321   : > { %v1583_v33 = vpop.permute.xlu0 %1582  ;;  %v2344_v9 = vpack.c.bf16 %v4051_v57, %v4047_v49  ;;  %v5706_v27 = vadd.f32 %v4051_v57, %v4049_v61 }
 0x322   : > { %4064 = vpow2.f32 %v1792_v56  ;;  %v1716_v5 = vsub.f32 %v5202_v11, %v1583_v33  ;;  %v1717_v41 = vsub.f32 %v5204_v12, %v1583_v33 }
 0x323   : > { %v4053_v0 = vpop.eup %4052  ;;  %4066 = vpow2.f32 %v1794_v58  ;;  %2541 = vmatprep.mubr.bf16.mxu1 %v2344_v9 }
 0x324   : > { %v4055_v1 = vpop.eup %4054  ;;  %v1796_v2 = vmul.f32 1.442695, %v1716_v5  ;;  %v1798_v42 = vmul.f32 1.442695, %v1717_v41  ;;  %2542 = vmatmul.mubr.bf16.gmra.mxu1 %v2343_v32 }
 0x325   : > { %v1588_v16 = vpop.permute.xlu0 %1587  ;;  %v5710_v54 = vadd.f32 %v4055_v1, %v4053_v0 }
 0x326   : > { %4068 = vpow2.f32 %v1796_v2  ;;  %v1718_v52 = vsub.f32 %v5209_v21, %v1588_v16  ;;  %v1719_v14 = vsub.f32 %v5211_v22, %v1588_v16 }
 0x327   : > { %v4057_v49 = vpop.eup %4056  ;;  %4070 = vpow2.f32 %v1798_v42 }
 0x328   : > { %v4059_v11 = vpop.eup %4058  ;;  %v1800_v50 = vmul.f32 1.442695, %v1718_v52  ;;  %v1802_v12 = vmul.f32 1.442695, %v1719_v14  ;;  %v2345_v24 = vpack.c.bf16 %v4057_v49, %v4053_v0 }
 0x329   : > { %v1593_v25 = vpop.permute.xlu1 %1592  ;;  %v2346_v37 = vpack.c.bf16 %v4059_v11, %v4055_v1  ;;  %v5714_v60 = vadd.f32 %v4059_v11, %v4057_v49 }
 0x32a   : > { %4072 = vpow2.f32 %v1800_v50  ;;  %v1720_v61 = vsub.f32 %v5217_v34, %v1593_v25  ;;  %v1721_v57 = vsub.f32 %v5219_v35, %v1593_v25 }
 0x32b   : > { %v4061_v56 = vpop.eup %4060  ;;  %4074 = vpow2.f32 %v1802_v12  ;;  %2549 = vmatprep.mubr.bf16.mxu1 %v2346_v37 }
 0x32c   : > { %v4063_v21 = vpop.eup %4062  ;;  %v1804_v22 = vmul.f32 1.442695, %v1720_v61  ;;  %v1806_v58 = vmul.f32 1.442695, %v1721_v57  ;;  %2550 = vmatmul.mubr.bf16.gmra.mxu1 %v2345_v24 }
 0x32d   : > { %v1598_v32 = vpop.permute.xlu1 %1597  ;;  %v5718_v33 = vadd.f32 %v4063_v21, %v4061_v56 }
 0x32e   : > { %4076 = vpow2.f32 %v1804_v22  ;;  %v1722_v9 = vsub.f32 %v5224_v45, %v1598_v32  ;;  %v1723_v5 = vsub.f32 %v5226_v46, %v1598_v32  ;;  %v6568_v22 = vsub.f32 %v5358_v20, %v5363_v38 }
 0x32f   : > { %v4065_v41 = vpop.eup %4064  ;;  %4078 = vpow2.f32 %v1806_v58  ;;  %v6569_v32 = vsub.f32 %v5365_v10, %v5375_v28  ;;  %v6573_v20 = vsub.f32 %v5413_v6, %v5423_v63  ;;  %v6574_v10 = vsub.f32 %v5425_v59, %v5433_v36  ;;  %v6579_v6 = vld [vmem:[#allocation73_spill] sm:$0xff] }
 0x330   : > { %v4067_v34 = vpop.eup %4066  ;;  %v1808_v0 = vmul.f32 1.442695, %v1722_v9  ;;  %v1810_v35 = vmul.f32 1.442695, %v1723_v5  ;;  %v2347_v1 = vpack.c.bf16 %v4065_v41, %v4061_v56  ;;  %v1476_v58 = vmul.f32 1.442695, %v6568_v22 }
 0x331   : > { %v2348_v2 = vpack.c.bf16 %v4067_v34, %v4063_v21  ;;  %v5722_v42 = vadd.f32 %v4067_v34, %v4065_v41  ;;  %v1478_v9 = vmul.f32 1.442695, %v6569_v32  ;;  %v6570_v5 = vsub.f32 %v5377_v47, %v5387_v40  ;;  %v6593_v22 = vld [vmem:[#allocation83_spill] sm:$0xff] }
 0x332   : > { %4080 = vpow2.f32 %v1808_v0  ;;  %v6571_v34 = vsub.f32 %v5389_v43, %v5399_v15  ;;  %v1486_v38 = vmul.f32 1.442695, %v6573_v20  ;;  %v1488_v28 = vmul.f32 1.442695, %v6574_v10  ;;  %v6599_v20 = vld [vmem:[#allocation86_spill] sm:$0xff] }
 0x333   : > { %v4069_v16 = vpop.eup %4068  ;;  %4082 = vpow2.f32 %v1810_v35  ;;  %2557 = vmatprep.mubr.bf16.mxu1 %v2348_v2  ;;  %v1480_v41 = vmul.f32 1.442695, %v6570_v5  ;;  %v6572_v35 = vsub.f32 %v5401_v48, %v5411_v29  ;;  %v6575_v47 = vsub.f32 %v5435_v19, %v5443_v53  ;;  %v6578_v29 = vld [vmem:[#allocation72_spill] sm:$0xff]  ;;  %v5765_v2 = vld [vmem:[#allocation3 + $0xf8] sm:$0xff]  ;;  %v6581_v19 = vld [vmem:[#allocation74_spill] sm:$0xff] }
 0x334   : > { %v4071_v52 = vpop.eup %4070  ;;  %2558 = vmatmul.mubr.bf16.gmra.mxu1 %v2347_v1  ;;  %v1482_v0 = vmul.f32 1.442695, %v6571_v34  ;;  %4084 = vpow2.f32 %v1476_v58  ;;  %v6576_v43 = vsub.f32 %v5445_v26, %v5453_v62  ;;  %v6577_v63 = vsub.f32 %v5455_v31, %v5463_v13  ;;  %v6582_v53 = vld [vmem:[#allocation75_spill] sm:$0xff]  ;;  %v6584_v62 = vld [vmem:[#allocation76_spill] sm:$0xff]  ;;  %v6586_v13 = vld [vmem:[#allocation77_spill] sm:$0xff] }
 0x335   : > { %v5724_v14 = vadd.f32 %v4071_v52, %v4069_v16  ;;  %v1484_v1 = vmul.f32 1.442695, %v6572_v35  ;;  %4086 = vpow2.f32 %v1478_v9  ;;  %v1490_v40 = vmul.f32 1.442695, %v6575_v47  ;;  %v6595_v9 = vld [vmem:[#allocation84_spill] sm:$0xff]  ;;  %v6597_v34 = vld [vmem:[#allocation85_spill] sm:$0xff] }
 0x336   : > { %4088 = vpow2.f32 %v1480_v41  ;;  %v1492_v15 = vmul.f32 1.442695, %v6576_v43  ;;  %v1494_v48 = vmul.f32 1.442695, %v6577_v63  ;;  %v6580_v36 = vsub.f32 %v6578_v29, %v6579_v6  ;;  %v6607_v6 = vld [vmem:[#allocation37_spill] sm:$0xff] }
 0x337   : > { %v4073_v45 = vpop.eup %4072  ;;  %4090 = vpow2.f32 %v1482_v0  ;;  %v6585_v26 = vsub.f32 %v6584_v62, %v5493_v55  ;;  %v6587_v31 = vsub.f32 %v6586_v13, %v5502_v44  ;;  %v6592_v44 = vld [vmem:[#allocation82_spill] sm:$0xff]  ;;  %v6598_v0 = vsub.f32 %v6597_v34, %v5555_v39  ;;  %v6606_v39 = vld [vmem:[#allocation36_spill] sm:$0xff]  ;;  %v6622_v34 = vld [vmem:[#allocation97_spill] sm:$0xff] }
 0x338   : > { %v4075_v49 = vpop.eup %4074  ;;  %v2349_v46 = vpack.c.bf16 %v4073_v45, %v4069_v16  ;;  %4092 = vpow2.f32 %v1484_v1  ;;  %v1496_v59 = vmul.f32 1.442695, %v6580_v36  ;;  %v6583_v16 = vsub.f32 %v6581_v19, %v6582_v53  ;;  %v6609_v19 = vld [vmem:[#allocation92_spill] sm:$0xff]  ;;  %v6610_v53 = vld [vmem:[#allocation93_spill] sm:$0xff] }
 0x339   : > { %v2350_v11 = vpack.c.bf16 %v4075_v49, %v4071_v52  ;;  %v5726_v50 = vadd.f32 %v4075_v49, %v4073_v45  ;;  %4094 = vpow2.f32 %v1486_v38  ;;  %v1500_v45 = vmul.f32 1.442695, %v6585_v26  ;;  %v6600_v38 = vld [vmem:[#allocation89_spill] sm:$0xff] }
 0x33a   : > { %4096 = vpow2.f32 %v1488_v28  ;;  %v1498_v52 = vmul.f32 1.442695, %v6583_v16  ;;  %v6594_v58 = vsub.f32 %v6592_v44, %v6593_v22  ;;  %v1512_v35 = vmul.f32 1.442695, %v6598_v0  ;;  %v6618_v44 = vld [vmem:[#allocation39_spill] sm:$0xff] }
 0x33b   : > { %v4077_v12 = vpop.eup %4076  ;;  %2565 = vmatprep.mubr.bf16.mxu1 %v2350_v11  ;;  %4098 = vpow2.f32 %v1490_v40  ;;  %v6601_v10 = vsub.f32 %v6599_v20, %v6600_v38  ;;  %v6604_v40 = vld [vmem:[#allocation91_spill] sm:$0xff]  ;;  %v6611_v16 = vsub.f32 %v6609_v19, %v6610_v53 }
 0x33c   : > { %v4079_v24 = vpop.eup %4078  ;;  %2566 = vmatmul.mubr.bf16.gmra.mxu1 %v2349_v46  ;;  %4100 = vpow2.f32 %v1492_v15  ;;  %v1502_v46 = vmul.f32 1.442695, %v6587_v31  ;;  %v1508_v32 = vmul.f32 1.442695, %v6594_v58  ;;  %v6613_v31 = vld [vmem:[#allocation94_spill] sm:$0xff] }
 0x33d   : > { %v5728_v25 = vadd.f32 %v4079_v24, %v4077_v12  ;;  %4102 = vpow2.f32 %v1494_v48  ;;  %v1514_v28 = vmul.f32 1.442695, %v6601_v10 }
 0x33e   : > { %4104 = vpow2.f32 %v1496_v59 }
 0x33f   : > { %v4081_v37 = vpop.eup %4080  ;;  %4106 = vpow2.f32 %v1498_v52  ;;  %v1518_v52 = vmul.f32 1.442695, %v6611_v16 }
 0x340   : > { %v4083_v61 = vpop.eup %4082  ;;  %v2351_v57 = vpack.c.bf16 %v4081_v37, %v4077_v12  ;;  %v6588_v12 = vld [vmem:[#allocation78_spill] sm:$0xff]  ;;  %4108 = vpow2.f32 %v1500_v45 }
 0x341   : > { %v2352_v56 = vpack.c.bf16 %v4083_v61, %v4079_v24  ;;  %v5730_v21 = vadd.f32 %v4083_v61, %v4081_v37  ;;  %v6589_v24 = vsub.f32 %v6588_v12, %v5512_v3  ;;  %v6590_v61 = vld [vmem:[#allocation79_spill] sm:$0xff]  ;;  %v5793_v3 = vpop.eup %4084  ;;  %4110 = vpow2.f32 %v1502_v46 }
 0x342   : > { %v5798_v41 = vpop.eup %4086  ;;  %v6614_v46 = vld [vmem:[#allocation95_spill] sm:$0xff] }
 0x343   : > { %2573 = vmatprep.mubr.bf16.mxu1 %v2352_v56  ;;  %v1504_v37 = vmul.f32 1.442695, %v6589_v24  ;;  %v5803_v1 = vpop.eup %4088  ;;  %v6615_v12 = vsub.f32 %v6613_v31, %v6614_v46 }
 0x344   : > { %2574 = vmatmul.mubr.bf16.gmra.mxu1 %v2351_v57  ;;  %v6591_v57 = vsub.f32 %v6590_v61, %v5521_v30  ;;  %v6596_v30 = vsub.f32 %v6595_v9, %v5545_v7  ;;  %v5809_v47 = vpop.eup %4090  ;;  %v6603_v7 = vld [vmem:[#allocation90_spill] sm:$0xff] }
 0x345   : > { %4112 = vpow2.f32 %v1504_v37  ;;  %6602 = vst [vmem:[#allocation72_spill] sm:$0xff] %v5809_v47  ;;  %v6605_v43 = vsub.f32 %v6603_v7, %v6604_v40  ;;  %v5814_v48 = vpop.eup %4092  ;;  %v1520_v24 = vmul.f32 1.442695, %v6615_v12  ;;  %v6626_v7 = vld [vmem:[#allocation100_spill] sm:$0xff] }
 0x346   : > { %v1506_v55 = vmul.f32 1.442695, %v6591_v57  ;;  %v1510_v5 = vmul.f32 1.442695, %v6596_v30  ;;  %v5818_v59 = vpop.eup %4094  ;;  %v6617_v57 = vld [vmem:[#allocation38_spill] sm:$0xff] }
 0x347   : > { %v1516_v15 = vmul.f32 1.442695, %v6605_v43  ;;  %6608 = vst [vmem:[#allocation73_spill] sm:$0xff] %v5818_v59  ;;  %v5823_v62 = vpop.eup %4096 }
 0x348   : > { %4114 = vpow2.f32 %v1506_v55  ;;  %v5828_v13 = vpop.eup %4098 }
 0x349   : > { %4116 = vpow2.f32 %v1508_v32  ;;  %6612 = vst [vmem:[#allocation74_spill] sm:$0xff] %v5828_v13  ;;  %v5833_v61 = vpop.eup %4100 }
 0x34a   : > { %4118 = vpow2.f32 %v1510_v5  ;;  %6616 = vst [vmem:[#allocation75_spill] sm:$0xff] %v5833_v61  ;;  %v5837_v32 = vpop.eup %4102  ;;  %v6621_v5 = vld [vmem:[#allocation96_spill] sm:$0xff] }
 0x34b   : > { %4120 = vpow2.f32 %v1512_v35  ;;  %6619 = vst [vmem:[#allocation76_spill] sm:$0xff] %v5837_v32  ;;  %v5842_v30 = vpop.eup %4104  ;;  %v6623_v0 = vsub.f32 %v6621_v5, %v6622_v34  ;;  %v6637_v34 = vld [vmem:[#allocation43_spill] sm:$0xff] }
 0x34c   : > { %4122 = vpow2.f32 %v1514_v28  ;;  %6620 = vst [vmem:[#allocation77_spill] sm:$0xff] %v5842_v30  ;;  %v5848_v10 = vpop.eup %4106  ;;  %v6625_v28 = vld [vmem:[#allocation99_spill] sm:$0xff] }
 0x34d   : > { %4124 = vpow2.f32 %v1516_v15  ;;  %v1522_v35 = vmul.f32 1.442695, %v6623_v0  ;;  %6624 = vst [vmem:[#allocation78_spill] sm:$0xff] %v5848_v10  ;;  %v6627_v40 = vsub.f32 %v6625_v28, %v6626_v7  ;;  %v6640_v7 = vld [vmem:[#allocation55_spill] sm:$0xff] }
 0x34f   : > { %v1526_v43 = vmul.f32 1.442695, %v6627_v40 }
 0x352   : > { %v1411_v49 = vpop.xlane.xlu0 %1410 }
 0x353   : > { %v5777_v11 = vmax.f32 %v5765_v2, %v1411_v49  ;;  %v5826_v49 = vld [vmem:[#allocation3 + $0xf0] sm:$0xff] }
 0x355   : > { %2757 = vst.msk [vmem:[#allocation3 + $0xf8] sm:$0xff] %vm2084_vm1, %v5777_v11  ;;  %1697 = vperm.xlu1 %3987, %v5777_v11  }
 0x359   : > { %2151 = vperm.xlu1 %3987, %v5793_v3  }
 0x35a   : > { %v1603_v63 = vpop.permute.xlu0 %1602 }
 0x35b   : > { %v1724_v29 = vsub.f32 %v6606_v39, %v1603_v63  ;;  %v1725_v36 = vsub.f32 %v6607_v6, %v1603_v63  ;;  %v5858_v39 = vpop.eup %4108 }
 0x35c   : > { %6628 = vst [vmem:[#allocation79_spill] sm:$0xff] %v5858_v39  ;;  %v5862_v16 = vpop.eup %4110 }
 0x35d   : > { %v1812_v26 = vmul.f32 1.442695, %v1724_v29  ;;  %v1814_v45 = vmul.f32 1.442695, %v1725_v36  ;;  %2161 = vperm.xlu1 %3987, %v5803_v1   ;;  %v6629_v29 = vld [vmem:[#allocation40_spill] sm:$0xff]  ;;  %v6630_v36 = vld [vmem:[#allocation41_spill] sm:$0xff]  ;;  %v5866_v46 = vpop.eup %4112 }
 0x35e   : > { %v1608_v37 = vpop.permute.xlu0 %1607  ;;  %6631 = vst [vmem:[#allocation82_spill] sm:$0xff] %v5862_v16 }
 0x35f   : > { %4126 = vpow2.f32 %v1812_v26  ;;  %v1726_v55 = vsub.f32 %v6617_v57, %v1608_v37  ;;  %v1727_v22 = vsub.f32 %v6618_v44, %v1608_v37  ;;  %v1408_v58 = vpop.xlane.xlu1 %1407  ;;  %v5869_v37 = vpop.eup %4114 }
 0x360   : > { %4128 = vpow2.f32 %v1814_v45  ;;  %v5840_v9 = vmax.f32 %v5826_v49, %v1408_v58  ;;  %v6633_v45 = vld [vmem:[#allocation45_spill] sm:$0xff]  ;;  %6634 = vst [vmem:[#allocation83_spill] sm:$0xff] %v5869_v37  ;;  %v6636_v58 = vld [vmem:[#allocation42_spill] sm:$0xff] }
 0x361   : > { %4130 = vpow2.f32 %v1518_v52  ;;  %v1816_v20 = vmul.f32 1.442695, %v1726_v55  ;;  %v1818_v38 = vmul.f32 1.442695, %v1727_v22  ;;  %2166 = vperm.xlu1 %3987, %v5809_v47   ;;  %v6632_v52 = vld [vmem:[#allocation44_spill] sm:$0xff]  ;;  %v5872_v22 = vpop.eup %4116 }
 0x362   : > { %4132 = vpow2.f32 %v1520_v24  ;;  %2756 = vst.msk [vmem:[#allocation3 + $0xf0] sm:$0xff] %vm2084_vm1, %v5840_v9  ;;  %1692 = vperm.xlu0 %3986, %v5840_v9   ;;  %v1613_v63 = vpop.permute.xlu0 %1612  ;;  %6635 = vst [vmem:[#allocation84_spill] sm:$0xff] %v5872_v22 }
 0x363   : > { %4134 = vpow2.f32 %v1816_v20  ;;  %v1728_v6 = vsub.f32 %v6629_v29, %v1613_v63  ;;  %v1729_v19 = vsub.f32 %v6630_v36, %v1613_v63  ;;  %v1623_v53 = vpop.permute.xlu1 %1622  ;;  %v5876_v20 = vpop.eup %4118 }
 0x364   : > { %4136 = vpow2.f32 %v1818_v38  ;;  %v1732_v26 = vsub.f32 %v6632_v52, %v1623_v53  ;;  %v1733_v31 = vsub.f32 %v6633_v45, %v1623_v53  ;;  %6638 = vst [vmem:[#allocation85_spill] sm:$0xff] %v5876_v20  ;;  %v6639_v38 = vld [vmem:[#allocation54_spill] sm:$0xff] }
 0x365   : > { %4138 = vpow2.f32 %v1522_v35  ;;  %v1820_v12 = vmul.f32 1.442695, %v1728_v6  ;;  %v1822_v24 = vmul.f32 1.442695, %v1729_v19  ;;  %2176 = vperm.xlu1 %3987, %v5818_v59  }
 0x366   : > { %4140 = vpow2.f32 %v1526_v43  ;;  %v1828_v57 = vmul.f32 1.442695, %v1732_v26  ;;  %v1830_v55 = vmul.f32 1.442695, %v1733_v31  ;;  %2156 = vperm.xlu0 %3986, %v5798_v41   ;;  %v1618_v44 = vpop.permute.xlu0 %1617  ;;  %v5880_v43 = vpop.eup %4120  ;;  %v6643_v26 = vld [vmem:[#allocation46_spill] sm:$0xff]  ;;  %v6644_v31 = vld [vmem:[#allocation47_spill] sm:$0xff] }
 0x367   : > { %4142 = vpow2.f32 %v1820_v12  ;;  %v1730_v5 = vsub.f32 %v6636_v58, %v1618_v44  ;;  %v1731_v0 = vsub.f32 %v6637_v34, %v1618_v44  ;;  %v1648_v35 = vpop.permute.xlu1 %1647  ;;  %v5883_v6 = vpop.eup %4122  ;;  %v6645_v44 = vld [vmem:[#allocation58_spill] sm:$0xff] }
 0x368   : > { %4144 = vpow2.f32 %v1822_v24  ;;  %v1742_v28 = vsub.f32 %v6639_v38, %v1648_v35  ;;  %v1743_v40 = vsub.f32 %v6640_v7, %v1648_v35  ;;  %6641 = vst [vmem:[#allocation86_spill] sm:$0xff] %v5883_v6  ;;  %v5886_v52 = vpop.eup %4124 }
 0x369   : > { %4146 = vpow2.f32 %v1828_v57  ;;  %v1824_v63 = vmul.f32 1.442695, %v1730_v5  ;;  %v1826_v29 = vmul.f32 1.442695, %v1731_v0  ;;  %2186 = vperm.xlu1 %3987, %v5828_v13   ;;  %6642 = vst [vmem:[#allocation89_spill] sm:$0xff] %v5886_v52  ;;  %v6646_v5 = vld [vmem:[#allocation59_spill] sm:$0xff] }
 0x36a   : > { %4148 = vpow2.f32 %v1830_v55  ;;  %v1848_v36 = vmul.f32 1.442695, %v1742_v28  ;;  %v1850_v19 = vmul.f32 1.442695, %v1743_v40  ;;  %2171 = vperm.xlu0 %3986, %v5814_v48   ;;  %v1628_v53 = vpop.permute.xlu0 %1627 }
 0x36b   : > { %4150 = vpow2.f32 %v1824_v63  ;;  %v1734_v45 = vsub.f32 %v6643_v26, %v1628_v53  ;;  %v1735_v12 = vsub.f32 %v6644_v31, %v1628_v53  ;;  %v1658_v24 = vpop.permute.xlu1 %1657  ;;  %v6649_v53 = vld [vmem:[#allocation48_spill] sm:$0xff] }
 0x36c   : > { %v4127_v57 = vpop.eup %4126  ;;  %4152 = vpow2.f32 %v1826_v29  ;;  %v1746_v58 = vsub.f32 %v6645_v44, %v1658_v24  ;;  %v1747_v34 = vsub.f32 %v6646_v5, %v1658_v24  ;;  %v6651_v24 = vld [vmem:[#allocation62_spill] sm:$0xff] }
 0x36d   : > { %v4129_v55 = vpop.eup %4128  ;;  %4154 = vpow2.f32 %v1848_v36  ;;  %v1832_v0 = vmul.f32 1.442695, %v1734_v45  ;;  %v1834_v35 = vmul.f32 1.442695, %v1735_v12  ;;  %2196 = vperm.xlu1 %3987, %v5837_v32   ;;  %v6650_v36 = vld [vmem:[#allocation49_spill] sm:$0xff] }
 0x36e   : > { %v5893_v38 = vpop.eup %4130  ;;  %4156 = vpow2.f32 %v1850_v19  ;;  %v1856_v28 = vmul.f32 1.442695, %v1746_v58  ;;  %v1858_v7 = vmul.f32 1.442695, %v1747_v34  ;;  %2181 = vperm.xlu0 %3986, %v5823_v62   ;;  %v1633_v40 = vpop.permute.xlu0 %1632  ;;  %v5896_v63 = vadd.f32 %v4129_v55, %v4127_v57  ;;  %v6652_v19 = vld [vmem:[#allocation63_spill] sm:$0xff] }
 0x36f   : > { %6647 = vst [vmem:[#allocation90_spill] sm:$0xff] %v5893_v38  ;;  %v5898_v29 = vpop.eup %4132  ;;  %4158 = vpow2.f32 %v1832_v0  ;;  %v1736_v26 = vsub.f32 %v6649_v53, %v1633_v40  ;;  %v1737_v45 = vsub.f32 %v6650_v36, %v1633_v40  ;;  %v1668_v31 = vpop.permute.xlu1 %1667 }
 0x370   : > { %6648 = vst [vmem:[#allocation91_spill] sm:$0xff] %v5898_v29  ;;  %v4135_v12 = vpop.eup %4134  ;;  %4160 = vpow2.f32 %v1834_v35  ;;  %v1750_v44 = vsub.f32 %v6651_v24, %v1668_v31  ;;  %v1751_v58 = vsub.f32 %v6652_v19, %v1668_v31  ;;  %v6655_v31 = vld [vmem:[#allocation50_spill] sm:$0xff] }
 0x371   : > { %v4137_v5 = vpop.eup %4136  ;;  %4162 = vpow2.f32 %v1856_v28  ;;  %v1836_v34 = vmul.f32 1.442695, %v1736_v26  ;;  %v1838_v15 = vmul.f32 1.442695, %v1737_v45  ;;  %2206 = vperm.xlu1 %3987, %v5848_v10   ;;  %v2353_v56 = vpack.c.bf16 %v4135_v12, %v4127_v57  ;;  %v6656_v28 = vld [vmem:[#allocation51_spill] sm:$0xff]  ;;  %v6657_v10 = vld [vmem:[#allocation66_spill] sm:$0xff] }
 0x372   : > { %v5905_v32 = vpop.eup %4138  ;;  %4164 = vpow2.f32 %v1858_v7  ;;  %v1864_v0 = vmul.f32 1.442695, %v1750_v44  ;;  %v1866_v53 = vmul.f32 1.442695, %v1751_v58  ;;  %2191 = vperm.xlu0 %3986, %v5833_v61   ;;  %v1638_v40 = vpop.permute.xlu0 %1637  ;;  %v2354_v35 = vpack.c.bf16 %v4137_v5, %v4129_v55  ;;  %v6658_v44 = vld [vmem:[#allocation67_spill] sm:$0xff] }
 0x373   : > { %6653 = vst [vmem:[#allocation36_spill] sm:$0xff] %v5905_v32  ;;  %v5908_v36 = vpop.eup %4140  ;;  %4166 = vpow2.f32 %v1836_v34  ;;  %v1738_v24 = vsub.f32 %v6655_v31, %v1638_v40  ;;  %v1739_v26 = vsub.f32 %v6656_v28, %v1638_v40  ;;  %v1678_v45 = vpop.permute.xlu1 %1677  ;;  %v5912_v19 = vadd.f32 %v4137_v5, %v4135_v12 }
 0x374   : > { %6654 = vst [vmem:[#allocation37_spill] sm:$0xff] %v5908_v36  ;;  %v4143_v57 = vpop.eup %4142  ;;  %4168 = vpow2.f32 %v1838_v15  ;;  %v1754_v7 = vsub.f32 %v6657_v10, %v1678_v45  ;;  %v1755_v58 = vsub.f32 %v6658_v44, %v1678_v45  ;;  %2581 = vmatprep.mubr.bf16.mxu1 %v2354_v35  ;;  %v6659_v35 = vld [vmem:[#allocation52_spill] sm:$0xff]  ;;  %v6662_v44 = vld [vmem:[#allocation71_spill] sm:$0xff] }
 0x375   : > { %v4145_v13 = vpop.eup %4144  ;;  %4170 = vpow2.f32 %v1864_v0  ;;  %v1840_v55 = vmul.f32 1.442695, %v1738_v24  ;;  %v1842_v59 = vmul.f32 1.442695, %v1739_v26  ;;  %2582 = vmatmul.mubr.bf16.gmra.mxu1 %v2353_v56  ;;  %2216 = vperm.xlu1 %3987, %v5862_v16   ;;  %v6660_v0 = vld [vmem:[#allocation53_spill] sm:$0xff]  ;;  %v6661_v26 = vld [vmem:[#allocation70_spill] sm:$0xff] }
 0x376   : > { %v5917_v34 = vpop.eup %4146  ;;  %4172 = vpow2.f32 %v1866_v53  ;;  %v1872_v40 = vmul.f32 1.442695, %v1754_v7  ;;  %v1874_v12 = vmul.f32 1.442695, %v1755_v58  ;;  %2201 = vperm.xlu0 %3986, %v5842_v30   ;;  %v1643_v15 = vpop.permute.xlu0 %1642  ;;  %v5920_v5 = vadd.f32 %v4145_v13, %v4143_v57 }
 0x377   : > { %v4149_v10 = vpop.eup %4148  ;;  %4174 = vpow2.f32 %v1840_v55  ;;  %v1740_v31 = vsub.f32 %v6659_v35, %v1643_v15  ;;  %v1741_v24 = vsub.f32 %v6660_v0, %v1643_v15  ;;  %v1688_v28 = vpop.permute.xlu1 %1687 }
 0x378   : > { %v4151_v56 = vpop.eup %4150  ;;  %4176 = vpow2.f32 %v1842_v59  ;;  %v1758_v45 = vsub.f32 %v6661_v26, %v1688_v28  ;;  %v1759_v53 = vsub.f32 %v6662_v44, %v1688_v28  ;;  %v5927_v7 = vadd.f32 %v4149_v10, %v5917_v34  ;;  %v6663_v44 = vld [vmem:[#allocation56_spill] sm:$0xff] }
 0x379   : > { %v4153_v58 = vpop.eup %4152  ;;  %4178 = vpow2.f32 %v1872_v40  ;;  %v1844_v16 = vmul.f32 1.442695, %v1740_v31  ;;  %v1846_v30 = vmul.f32 1.442695, %v1741_v24  ;;  %2226 = vperm.xlu1 %3987, %v5869_v37   ;;  %v2355_v55 = vpack.c.bf16 %v4151_v56, %v4143_v57  ;;  %v6664_v40 = vld [vmem:[#allocation57_spill] sm:$0xff] }
 0x37a   : > { %v5930_v35 = vpop.eup %4154  ;;  %4180 = vpow2.f32 %v1874_v12  ;;  %v1880_v15 = vmul.f32 1.442695, %v1758_v45  ;;  %v1882_v0 = vmul.f32 1.442695, %v1759_v53  ;;  %2211 = vperm.xlu0 %3986, %v5858_v39   ;;  %v1653_v59 = vpop.permute.xlu0 %1652  ;;  %v2356_v26 = vpack.c.bf16 %v4153_v58, %v4145_v13  ;;  %v6665_v45 = vld [vmem:[#allocation98_spill] sm:$0xff] }
 0x37b   : > { %v5933_v28 = vpop.eup %4156  ;;  %4182 = vpow2.f32 %v1844_v16  ;;  %v1744_v61 = vsub.f32 %v6663_v44, %v1653_v59  ;;  %v1745_v31 = vsub.f32 %v6664_v40, %v1653_v59  ;;  %v5937_v24 = vadd.f32 %v4153_v58, %v4151_v56  ;;  %v6667_v58 = vld [vmem:[#allocation102_spill] sm:$0xff] }
 0x37c   : > { %v4159_v37 = vpop.eup %4158  ;;  %4184 = vpow2.f32 %v1846_v30  ;;  %2589 = vmatprep.mubr.bf16.mxu1 %v2356_v26  ;;  %v5941_v57 = vadd.f32 %v5933_v28, %v5930_v35  ;;  %v6666_v13 = vsub.f32 %v6665_v45, %v5617_v4  ;;  %v6668_v30 = vld [vmem:[#allocation103_spill] sm:$0xff] }
 0x37d   : > { %v4161_v12 = vpop.eup %4160  ;;  %4186 = vpow2.f32 %v1880_v15  ;;  %v1852_v16 = vmul.f32 1.442695, %v1744_v61  ;;  %v1854_v39 = vmul.f32 1.442695, %v1745_v31  ;;  %2590 = vmatmul.mubr.bf16.gmra.mxu1 %v2355_v55  ;;  %2236 = vperm.xlu1 %3987, %v5876_v20   ;;  %v6669_v59 = vsub.f32 %v6667_v58, %v6668_v30  ;;  %v6670_v61 = vld [vmem:[#allocation60_spill] sm:$0xff]  ;;  %v6671_v15 = vld [vmem:[#allocation61_spill] sm:$0xff] }
 0x37e   : > { %v1524_v53 = vmul.f32 1.442695, %v6666_v13  ;;  %v5947_v56 = vpop.eup %4162  ;;  %4188 = vpow2.f32 %v1882_v0  ;;  %2221 = vperm.xlu0 %3986, %v5866_v46   ;;  %v1663_v44 = vpop.permute.xlu0 %1662  ;;  %v2358_v40 = vpack.c.bf16 %v4161_v12, %v4149_v10  ;;  %v5953_v47 = vadd.f32 %v4161_v12, %v4159_v37  ;;  %v6672_v58 = vld [vmem:[#allocation101_spill] sm:$0xff] }
 0x37f   : > { %v1530_v26 = vmul.f32 1.442695, %v6669_v59  ;;  %v5955_v4 = vpop.eup %4164  ;;  %4190 = vpow2.f32 %v1852_v16  ;;  %v1748_v55 = vsub.f32 %v6670_v61, %v1663_v44  ;;  %v1749_v31 = vsub.f32 %v6671_v15, %v1663_v44  ;;  %v6674_v44 = vld [vmem:[#allocation105_spill] sm:$0xff] }
 0x380   : > { %v4167_v45 = vpop.eup %4166  ;;  %4192 = vpow2.f32 %v1854_v39  ;;  %2597 = vmatprep.mubr.bf16.mxu1 %v2358_v40  ;;  %v5961_v13 = vadd.f32 %v5955_v4, %v5947_v56  ;;  %v6673_v10 = vsub.f32 %v6672_v58, %v5639_v23  ;;  %v6675_v39 = vld [vmem:[#allocation106_spill] sm:$0xff]  ;;  %v6677_v23 = vld [vmem:[#allocation64_spill] sm:$0xff] }
 0x381   : > { %v4169_v0 = vpop.eup %4168  ;;  %4194 = vpow2.f32 %v1524_v53  ;;  %v1860_v30 = vmul.f32 1.442695, %v1748_v55  ;;  %v1862_v59 = vmul.f32 1.442695, %v1749_v31  ;;  %2246 = vperm.xlu1 %3987, %v5883_v6   ;;  %v6676_v40 = vsub.f32 %v6674_v44, %v6675_v39  ;;  %v6678_v31 = vld [vmem:[#allocation65_spill] sm:$0xff] }
 0x382   : > { %v1528_v12 = vmul.f32 1.442695, %v6673_v10  ;;  %v5967_v16 = vpop.eup %4170  ;;  %4196 = vpow2.f32 %v1530_v26  ;;  %2231 = vperm.xlu0 %3986, %v5872_v22   ;;  %v1673_v15 = vpop.permute.xlu0 %1672  ;;  %v5973_v20 = vadd.f32 %v4169_v0, %v4167_v45  ;;  %v2357_v10 = vpack.c.bf16 %v4159_v37, %v5917_v34 }
 0x383   : > { %v1534_v61 = vmul.f32 1.442695, %v6676_v40  ;;  %v5975_v53 = vpop.eup %4172  ;;  %4198 = vpow2.f32 %v1860_v30  ;;  %v1752_v55 = vsub.f32 %v6677_v23, %v1673_v15  ;;  %v1753_v58 = vsub.f32 %v6678_v31, %v1673_v15  ;;  %v6679_v23 = vld [vmem:[#allocation104_spill] sm:$0xff] }
 0x384   : > { %v4175_v6 = vpop.eup %4174  ;;  %4200 = vpow2.f32 %v1862_v59  ;;  %v5982_v26 = vadd.f32 %v5975_v53, %v5967_v16  ;;  %v6680_v15 = vsub.f32 %v6679_v23, %v5661_v51 }
 0x385   : > { %v4177_v44 = vpop.eup %4176  ;;  %4202 = vpow2.f32 %v1528_v12  ;;  %v1868_v39 = vmul.f32 1.442695, %v1752_v55  ;;  %v1870_v40 = vmul.f32 1.442695, %v1753_v58  ;;  %2598 = vmatmul.mubr.bf16.gmra.mxu1 %v2357_v10  ;;  %2256 = vperm.xlu1 %3987, %v5893_v38   ;;  %v6681_v12 = vld [vmem:[#allocation68_spill] sm:$0xff]  ;;  %v6682_v58 = vld [vmem:[#allocation69_spill] sm:$0xff] }
 0x386   : > { %v5985_v30 = vpop.eup %4178  ;;  %4204 = vpow2.f32 %v1534_v61  ;;  %v1532_v37 = vmul.f32 1.442695, %v6680_v15  ;;  %2241 = vperm.xlu0 %3986, %v5880_v43   ;;  %v1683_v34 = vpop.permute.xlu0 %1682  ;;  %v2360_v59 = vpack.c.bf16 %v4177_v44, %v4169_v0  ;;  %v5991_v31 = vadd.f32 %v4177_v44, %v4175_v6 }
 0x387   : > { %v4181_v22 = vpop.eup %4180  ;;  %4206 = vpow2.f32 %v1868_v39  ;;  %v1756_v55 = vsub.f32 %v6681_v12, %v1683_v34  ;;  %v1757_v10 = vsub.f32 %v6682_v58, %v1683_v34  ;;  %v2359_v34 = vpack.c.bf16 %v4175_v6, %v4167_v45 }
 0x388   : > { %v4183_v38 = vpop.eup %4182  ;;  %4208 = vpow2.f32 %v1870_v40  ;;  %2605 = vmatprep.mubr.bf16.mxu1 %v2360_v59  ;;  %v5996_v61 = vadd.f32 %v4181_v22, %v5985_v30 }
 0x389   : > { %v4185_v51 = vpop.eup %4184  ;;  %v1876_v23 = vmul.f32 1.442695, %v1756_v55  ;;  %v1878_v15 = vmul.f32 1.442695, %v1757_v10  ;;  %2266 = vperm.xlu1 %3987, %v5905_v32   ;;  %4210 = vpow2.f32 %v1532_v37 }
 0x38a   : > { %v4187_v0 = vpop.eup %4186  ;;  %2251 = vperm.xlu0 %3986, %v5886_v52   ;;  %v6000_v44 = vadd.f32 %v4185_v51, %v4183_v38  ;;  %v2362_v40 = vpack.c.bf16 %v5933_v28, %v4185_v51 }
 0x38b   : > { %v4189_v39 = vpop.eup %4188  ;;  %4212 = vpow2.f32 %v1876_v23 }
 0x38c   : > { %v4191_v12 = vpop.eup %4190  ;;  %4214 = vpow2.f32 %v1878_v15  ;;  %v6003_v59 = vadd.f32 %v4189_v39, %v4187_v0  ;;  %v2361_v15 = vpack.c.bf16 %v5930_v35, %v4183_v38 }
 0x38d   : > { %v4193_v58 = vpop.eup %4192  ;;  %2606 = vmatmul.mubr.bf16.gmra.mxu1 %v2359_v34  ;;  %2276 = vperm.xlu1 %3987, %v5908_v36   ;;  %v2363_v38 = vpack.c.bf16 %v5947_v56, %v4191_v12 }
 0x38e   : > { %v6006_v55 = vpop.eup %4194  ;;  %2613 = vmatprep.mubr.bf16.mxu1 %v2362_v40  ;;  %2261 = vperm.xlu0 %3986, %v5898_v29   ;;  %v6009_v37 = vadd.f32 %v4193_v58, %v4191_v12  ;;  %v2364_v40 = vpack.c.bf16 %v5955_v4, %v4193_v58 }
 0x38f   : > { %6683 = vst [vmem:[#allocation92_spill] sm:$0xff] %v6006_v55  ;;  %v6011_v10 = vpop.eup %4196 }
 0x390   : > { %6684 = vst [vmem:[#allocation93_spill] sm:$0xff] %v6011_v10  ;;  %v4199_v6 = vpop.eup %4198 }
 0x391   : > { %v4201_v45 = vpop.eup %4200  ;;  %2286 = vperm.xlu1 %3987, %v6011_v10   ;;  %v2365_v4 = vpack.c.bf16 %v5967_v16, %v4199_v6 }
 0x392   : > { %v6014_v28 = vpop.eup %4202  ;;  %2271 = vperm.xlu0 %3986, %v6006_v55   ;;  %v6017_v51 = vadd.f32 %v4201_v45, %v4199_v6  ;;  %v2366_v35 = vpack.c.bf16 %v5975_v53, %v4201_v45 }
 0x393   : > { %v6019_v23 = vpop.eup %4204 }
 0x394   : > { %6685 = vst [vmem:[#allocation94_spill] sm:$0xff] %v6019_v23  ;;  %v4207_v34 = vpop.eup %4206 }
 0x395   : > { %v4209_v36 = vpop.eup %4208  ;;  %2614 = vmatmul.mubr.bf16.gmra.mxu1 %v2361_v15  ;;  %2296 = vperm.xlu1 %3987, %v6019_v23   ;;  %v2367_v15 = vpack.c.bf16 %v5985_v30, %v4207_v34 }
 0x396   : > { %2621 = vmatprep.mubr.bf16.mxu1 %v2364_v40  ;;  %2281 = vperm.xlu0 %3986, %v6014_v28   ;;  %v6025_v10 = vadd.f32 %v4209_v36, %v4207_v34  ;;  %v6027_v32 = vpop.eup %4210  ;;  %v2368_v58 = vpack.c.bf16 %v4181_v22, %v4209_v36  ;;  %v6688_v22 = vld [vmem:[#allocation87_spill] sm:$0xff] }
 0x398   : > { %v4213_v55 = vpop.eup %4212 }
 0x399   : > { %v4215_v29 = vpop.eup %4214  ;;  %v2369_v23 = vpack.c.bf16 %v4187_v0, %v4213_v55 }
 0x39a   : > { %2291 = vperm.xlu0 %3986, %v6027_v32   ;;  %v6030_v52 = vadd.f32 %v4215_v29, %v4213_v55  ;;  %v2370_v40 = vpack.c.bf16 %v4189_v39, %v4215_v29  ;;  %v6689_v29 = vld [vmem:[#allocation88_spill] sm:$0xff]  ;;  %v2119_v39 = vld [vmem:[#allocation5 + $0xd8] sm:$0xff] }
 0x39d   : > { %2622 = vmatmul.mubr.bf16.gmra.mxu1 %v2363_v38 }
 0x39e   : > { %2629 = vmatprep.mubr.bf16.mxu1 %v2366_v35 }
 0x3a5   : > { %2630 = vmatmul.mubr.bf16.gmra.mxu1 %v2365_v4 }
 0x3a6   : > { %2637 = vmatprep.mubr.bf16.mxu1 %v2368_v58 }
 0x3ad   : > { %2638 = vmatmul.mubr.bf16.gmra.mxu1 %v2367_v15  ;;  %v2121_v15 = vld [vmem:[#allocation5 + $0x50] sm:$0xff] }
 0x3ae   : > { %2645 = vmatprep.mubr.bf16.mxu1 %v2370_v40 }
 0x3b5   : > { %2646 = vmatmul.mubr.bf16.gmra.mxu1 %v2369_v23 }
 0x3b9   : > { %1957 = vadd.xlane.f32.xlu0 %v5694_v8  ;;  %1960 = vadd.xlane.f32.xlu1 %v5698_v17  ;;  %v6686_v17 = vld [vmem:[#allocation80_spill] sm:$0xff] }
 0x3bd   : > { %1963 = vadd.xlane.f32.xlu0 %v5702_v18  ;;  %1969 = vadd.xlane.f32.xlu1 %v5710_v54 }
 0x3c1   : > { %1966 = vadd.xlane.f32.xlu0 %v5706_v27  ;;  %1975 = vadd.xlane.f32.xlu1 %v5718_v33  ;;  %v6687_v27 = vld [vmem:[#allocation81_spill] sm:$0xff]  ;;  %v2117_v33 = vld [vmem:[#allocation5 + $0xb0] sm:$0xff] }
 0x3c5   : > { %1972 = vadd.xlane.f32.xlu0 %v5714_v60  ;;  %1981 = vadd.xlane.f32.xlu1 %v5724_v14 }
 0x3c9   : > { %1978 = vadd.xlane.f32.xlu0 %v5722_v42  ;;  %1987 = vadd.xlane.f32.xlu1 %v5728_v25 }
 0x3cd   : > { %1984 = vadd.xlane.f32.xlu0 %v5726_v50  ;;  %1993 = vadd.xlane.f32.xlu1 %v5896_v63 }
 0x3d0   : > { %v1698_v8 = vpop.permute.xlu1 %1697 }
 0x3d1   : > { %1990 = vadd.xlane.f32.xlu0 %v5730_v21  ;;  %1999 = vadd.xlane.f32.xlu1 %v5920_v5  ;;  %v1762_v18 = vsub.f32 %v6686_v17, %v1698_v8  ;;  %v1763_v54 = vsub.f32 %v6687_v27, %v1698_v8 }
 0x3d3   : > { %v1888_v60 = vmul.f32 1.442695, %v1762_v18  ;;  %v1890_v50 = vmul.f32 1.442695, %v1763_v54 }
 0x3d4   : > { %v2152_v42 = vpop.permute.xlu1 %2151 }
 0x3d5   : > { %1996 = vadd.xlane.f32.xlu0 %v5912_v19  ;;  %2005 = vadd.xlane.f32.xlu1 %v5927_v7  ;;  %v2309_v19 = vmul.f32 %v2152_v42, %v2117_v33  ;;  %v2118_v7 = vld [vmem:[#allocation5] sm:$0xff]  ;;  %4216 = vpow2.f32 %v1888_v60  ;;  %v2122_v60 = vld [vmem:[#allocation5 + $0x68] sm:$0xff] }
 0x3d6   : > { %4218 = vpow2.f32 %v1890_v50 }
 0x3d8   : > { %v2162_v53 = vpop.permute.xlu1 %2161 }
 0x3d9   : > { %2002 = vadd.xlane.f32.xlu0 %v5937_v24  ;;  %2011 = vadd.xlane.f32.xlu1 %v5973_v20  ;;  %v2311_v45 = vmul.f32 %v2162_v53, %v2119_v39 }
 0x3dc   : > { %v3722_v14 = vpop.f32.mrf.mxu1  ;;  %v2167_v23 = vpop.permute.xlu1 %2166 }
 0x3dd   : > { %2008 = vadd.xlane.f32.xlu0 %v5953_v47  ;;  %2017 = vadd.xlane.f32.xlu1 %v6000_v44  ;;  %v1693_v25 = vpop.permute.xlu0 %1692 }
 0x3de   : > { %v3723_v21 = vpop.f32.mrf.mxu1  ;;  %v1760_v63 = vsub.f32 %v6688_v22, %v1693_v25  ;;  %v1761_v36 = vsub.f32 %v6689_v29, %v1693_v25 }
 0x3df   : > { %v3724_v5 = vadd.f32 %v3723_v21, %v3722_v14 }
 0x3e0   : > { %v1884_v20 = vmul.f32 1.442695, %v1760_v63  ;;  %v1886_v24 = vmul.f32 1.442695, %v1761_v36  ;;  %v3725_v56 = vpop.f32.mrf.mxu1  ;;  %v2177_v33 = vpop.permute.xlu1 %2176  ;;  %v2123_v36 = vld [vmem:[#allocation5 + $0x30] sm:$0xff] }
 0x3e1   : > { %v2662_v16 = vadd.f32 %v3724_v5, %v2309_v19  ;;  %2014 = vadd.xlane.f32.xlu0 %v5991_v31  ;;  %2023 = vadd.xlane.f32.xlu1 %v6009_v37  ;;  %v2157_v47 = vpop.permute.xlu0 %2156  ;;  %v2120_v37 = vld [vmem:[#allocation5 + $0x18] sm:$0xff]  ;;  %v2314_v63 = vmul.f32 %v2177_v33, %v2122_v60 }
 0x3e2   : > { %4220 = vpow2.f32 %v1884_v20  ;;  %v3726_v30 = vpop.f32.mrf.mxu1  ;;  %v2310_v0 = vmul.f32 %v2157_v47, %v2118_v7  ;;  %v2312_v4 = vmul.f32 %v2167_v23, %v2120_v37  ;;  %v2126_v23 = vld [vmem:[#allocation5 + $0x88] sm:$0xff] }
 0x3e3   : > { %2694 = vst [vmem:[#allocation5 + $0xb0] sm:$0xff] %v2662_v16  ;;  %4222 = vpow2.f32 %v1886_v24  ;;  %v3727_v44 = vadd.f32 %v3726_v30, %v3725_v56 }
 0x3e4   : > { %v3728_v12 = vpop.f32.mrf.mxu1  ;;  %v2187_v56 = vpop.permute.xlu1 %2186 }
 0x3e5   : > { %v2663_v55 = vadd.f32 %v3727_v44, %v2310_v0  ;;  %2020 = vadd.xlane.f32.xlu0 %v5941_v57  ;;  %2029 = vadd.xlane.f32.xlu1 %v6017_v51  ;;  %v2172_v57 = vpop.permute.xlu0 %2171  ;;  %v4217_v51 = vpop.eup %4216  ;;  %v2125_v44 = vld [vmem:[#allocation5 + $0x80] sm:$0xff] }
 0x3e6   : > { %v3729_v6 = vpop.f32.mrf.mxu1  ;;  %v4219_v17 = vpop.eup %4218  ;;  %v2313_v54 = vmul.f32 %v2172_v57, %v2121_v15 }
 0x3e7   : > { %2695 = vst [vmem:[#allocation5] sm:$0xff] %v2663_v55  ;;  %v3730_v31 = vadd.f32 %v3729_v6, %v3728_v12 }
 0x3e8   : > { %v3731_v34 = vpop.f32.mrf.mxu1 }
 0x3e9   : > { %v2664_v38 = vadd.f32 %v3730_v31, %v2311_v45  ;;  %2026 = vadd.xlane.f32.xlu0 %v5961_v13  ;;  %2035 = vadd.xlane.f32.xlu1 %v6025_v10  ;;  %v2182_v19 = vpop.permute.xlu0 %2181 }
 0x3ea   : > { %v3732_v35 = vpop.f32.mrf.mxu1  ;;  %v2315_v20 = vmul.f32 %v2182_v19, %v2123_v36 }
 0x3eb   : > { %2696 = vst [vmem:[#allocation5 + $0xd8] sm:$0xff] %v2664_v38  ;;  %v3733_v58 = vadd.f32 %v3732_v35, %v3731_v34  ;;  %v2197_v34 = vpop.permute.xlu1 %2196 }
 0x3ec   : > { %v3734_v40 = vpop.f32.mrf.mxu1  ;;  %v2318_v15 = vmul.f32 %v2197_v34, %v2126_v23  ;;  %v1893_v34 = vld [vmem:[#allocation4 + $0x8] sm:$0xff] }
 0x3ed   : > { %v2665_v8 = vadd.f32 %v3733_v58, %v2312_v4  ;;  %2032 = vadd.xlane.f32.xlu0 %v5982_v26  ;;  %2041 = vadd.xlane.f32.xlu1 %v6030_v52  ;;  %v6690_v26 = vsub.f32 %v5765_v2, %v5777_v11  ;;  %v2049_v2 = vadd.f32 %v4219_v17, %v4217_v51  ;;  %v2124_v11 = vld [vmem:[#allocation5 + $0x48] sm:$0xff]  ;;  %v2192_v39 = vpop.permute.xlu0 %2191 }
 0x3ee   : > { %v3735_v18 = vpop.f32.mrf.mxu1  ;;  %v2316_v30 = vmul.f32 %v2187_v56, %v2124_v11  ;;  %v2317_v31 = vmul.f32 %v2192_v39, %v2125_v44 }
 0x3ef   : > { %v4221_v27 = vpop.eup %4220  ;;  %2697 = vst [vmem:[#allocation5 + $0x18] sm:$0xff] %v2665_v8  ;;  %v3736_v13 = vadd.f32 %v3735_v18, %v3734_v40  ;;  %v1538_v52 = vmul.f32 1.442695, %v6690_v26  ;;  %v2127_v40 = vld [vmem:[#allocation5 + $0xe8] sm:$0xff] }
 0x3f0   : > { %v4223_v10 = vpop.eup %4222  ;;  %v3737_v42 = vpop.f32.mrf.mxu1  ;;  %v2371_v14 = vpack.c.bf16 %v4217_v51, %v4221_v27 }
 0x3f1   : > { %v2666_v50 = vadd.f32 %v3736_v13, %v2313_v54  ;;  %2038 = vadd.xlane.f32.xlu0 %v5996_v61  ;;  %v2372_v25 = vpack.c.bf16 %v4219_v17, %v4223_v10  ;;  %v2046_v21 = vadd.f32 %v4223_v10, %v4221_v27  ;;  %4224 = vpow2.f32 %v1538_v52  ;;  %v2202_v51 = vpop.permute.xlu0 %2201  ;;  %v2128_v27 = vld [vmem:[#allocation5 + $0xb8] sm:$0xff]  ;;  %v2207_v54 = vpop.permute.xlu1 %2206 }
 0x3f2   : > { %v3738_v22 = vpop.f32.mrf.mxu1  ;;  %v2319_v17 = vmul.f32 %v2202_v51, %v2127_v40  ;;  %v2320_v33 = vmul.f32 %v2207_v54, %v2128_v27  ;;  %v1925_v51 = vmul.f32 %v5798_v41, %v1893_v34  ;;  %v1894_v27 = vld [vmem:[#allocation4 + $0x10] sm:$0xff] }
 0x3f3   : > { %2698 = vst [vmem:[#allocation5 + $0x50] sm:$0xff] %v2666_v50  ;;  %v3739_v29 = vadd.f32 %v3738_v22, %v3737_v42  ;;  %2653 = vmatprep.mubr.bf16.mxu1 %v2372_v25  ;;  %2047 = vadd.xlane.f32.xlu1 %v2046_v21 }
 0x3f4   : > { %v3740_v5 = vpop.f32.mrf.mxu1  ;;  %2654 = vmatmul.mubr.bf16.gmra.mxu1 %v2371_v14 }
 0x3f5   : > { %v2667_v7 = vadd.f32 %v3739_v29, %v2314_v63  ;;  %2044 = vadd.xlane.f32.xlu0 %v6003_v59  ;;  %v6691_v59 = vsub.f32 %v5826_v49, %v5840_v9  ;;  %v2217_v25 = vpop.permute.xlu1 %2216  ;;  %v2212_v21 = vpop.permute.xlu0 %2211 }
 0x3f6   : > { %v3741_v61 = vpop.f32.mrf.mxu1 }
 0x3f7   : > { %2699 = vst [vmem:[#allocation5 + $0x68] sm:$0xff] %v2667_v7  ;;  %v3742_v24 = vadd.f32 %v3741_v61, %v3740_v5  ;;  %v1536_v55 = vmul.f32 1.442695, %v6691_v59 }
 0x3f8   : > { %v3743_v16 = vpop.f32.mrf.mxu1 }
 0x3f9   : > { %v2668_v47 = vadd.f32 %v3742_v24, %v2315_v20  ;;  %2050 = vadd.xlane.f32.xlu0 %v2049_v2  ;;  %4226 = vpow2.f32 %v1536_v55  ;;  %v2227_v26 = vpop.permute.xlu1 %2226  ;;  %v2222_v52 = vpop.permute.xlu0 %2221  ;;  %v2129_v2 = vld [vmem:[#allocation5 + $0x60] sm:$0xff] }
 0x3fa   : > { %v3744_v53 = vpop.f32.mrf.mxu1 }
 0x3fb   : > { %2700 = vst [vmem:[#allocation5 + $0x30] sm:$0xff] %v2668_v47  ;;  %v3745_v0 = vadd.f32 %v3744_v53, %v3743_v16  ;;  %v2321_v16 = vmul.f32 %v2212_v21, %v2129_v2  ;;  %v1898_v2 = vld [vmem:[#allocation4 + $0x30] sm:$0xff] }
 0x3fc   : > { %v3746_v12 = vpop.f32.mrf.mxu1 }
 0x3fd   : > { %v2669_v6 = vadd.f32 %v3745_v0, %v2316_v30  ;;  %v6082_v22 = vpop.permute.xlu1 %2236  ;;  %v6084_v63 = vpop.permute.xlu0 %2231  ;;  %v2130_v0 = vld [vmem:[#allocation5 + $0xf0] sm:$0xff] }
 0x3fe   : > { %v3747_v45 = vpop.f32.mrf.mxu1  ;;  %v6076_v58 = vpop.eup %4224  ;;  %v2322_v59 = vmul.f32 %v2217_v25, %v2130_v0 }
 0x3ff   : > { %2701 = vst [vmem:[#allocation5 + $0x48] sm:$0xff] %v2669_v6  ;;  %v3748_v37 = vadd.f32 %v3747_v45, %v3746_v12  ;;  %v2131_v6 = vld [vmem:[#allocation5 + $0x8] sm:$0xff] }
 0x400   : > { %v3749_v38 = vpop.f32.mrf.mxu1 }
 0x401   : > { %v2670_v35 = vadd.f32 %v3748_v37, %v2317_v31  ;;  %v6086_v29 = vpop.permute.xlu1 %2246  ;;  %v6088_v36 = vpop.permute.xlu0 %2241 }
 0x402   : > { %v3750_v4 = vpop.f32.mrf.mxu1 }
 0x403   : > { %2702 = vst [vmem:[#allocation5 + $0x80] sm:$0xff] %v2670_v35  ;;  %v3751_v57 = vadd.f32 %v3750_v4, %v3749_v38  ;;  %v1892_v38 = vld [vmem:[#allocation4] sm:$0xff]  ;;  %v2323_v4 = vmul.f32 %v2222_v52, %v2131_v6 }
 0x404   : > { %v3752_v49 = vpop.f32.mrf.mxu1  ;;  %2306 = vperm.xlu1 %3987, %v6076_v58  }
 0x405   : > { %v2671_v9 = vadd.f32 %v3751_v57, %v2318_v15  ;;  %v6090_v19 = vpop.permute.xlu1 %2256  ;;  %v6092_v5 = vpop.permute.xlu0 %2251  ;;  %v2132_v57 = vld [vmem:[#allocation5 + $0x78] sm:$0xff] }
 0x406   : > { %v3753_v8 = vpop.f32.mrf.mxu1  ;;  %v6079_v50 = vpop.eup %4226 }
 0x407   : > { %2703 = vst [vmem:[#allocation5 + $0x88] sm:$0xff] %v2671_v9  ;;  %v3754_v18 = vadd.f32 %v3753_v8, %v3752_v49  ;;  %v1924_v49 = vmul.f32 %v5793_v3, %v1892_v38  ;;  %v1926_v3 = vmul.f32 %v5803_v1, %v1894_v27  ;;  %v1930_v1 = vmul.f32 %v5823_v62, %v1898_v2  ;;  %v1899_v27 = vld [vmem:[#allocation4 + $0x38] sm:$0xff] }
 0x408   : > { %v3755_v13 = vpop.f32.mrf.mxu1 }
 0x409   : > { %v2672_v10 = vadd.f32 %v3754_v18, %v2319_v17  ;;  %v6094_v7 = vpop.permute.xlu1 %2266  ;;  %v6096_v61 = vpop.permute.xlu0 %2261  ;;  %v1896_v18 = vld [vmem:[#allocation4 + $0x20] sm:$0xff] }
 0x40a   : > { %v3756_v60 = vpop.f32.mrf.mxu1  ;;  %v1928_v41 = vmul.f32 %v5814_v48, %v1896_v18  ;;  %v1902_v18 = vld [vmem:[#allocation4 + $0x50] sm:$0xff] }
 0x40b   : > { %2704 = vst [vmem:[#allocation5 + $0xe8] sm:$0xff] %v2672_v10  ;;  %v3757_v42 = vadd.f32 %v3756_v60, %v3755_v13  ;;  %v2324_v60 = vmul.f32 %v2227_v26, %v2132_v57  ;;  %v6693_v57 = vld [vmem:[#allocation75_spill] sm:$0xff] }
 0x40d   : > { %v2673_v14 = vadd.f32 %v3757_v42, %v2320_v33  ;;  %v6098_v20 = vpop.permute.xlu1 %2276  ;;  %v6100_v24 = vpop.permute.xlu0 %2271  ;;  %v2133_v42 = vld [vmem:[#allocation5 + $0x38] sm:$0xff] }
 0x40f   : > { %2705 = vst [vmem:[#allocation5 + $0xb8] sm:$0xff] %v2673_v14  ;;  %2301 = vperm.xlu0 %3986, %v6079_v50  }
 0x411   : > { %v6102_v47 = vpop.permute.xlu1 %2286  ;;  %v6104_v53 = vpop.permute.xlu0 %2281 }
 0x415   : > { %v6106_v31 = vpop.permute.xlu1 %2296  ;;  %v6108_v37 = vpop.permute.xlu0 %2291 }
 0x435   : > { %v3758_v11 = vpop.f32.mrf.mxu1 }
 0x437   : > { %v3759_v56 = vpop.f32.mrf.mxu1 }
 0x438   : > { %v3760_v30 = vadd.f32 %v3759_v56, %v3758_v11  ;;  %v1895_v11 = vld [vmem:[#allocation4 + $0x18] sm:$0xff] }
 0x439   : > { %v3761_v44 = vpop.f32.mrf.mxu1 }
 0x43a   : > { %v2674_v39 = vadd.f32 %v3760_v30, %v2321_v16  ;;  %v2325_v30 = vmul.f32 %v6084_v63, %v2133_v42 }
 0x43b   : > { %v3762_v12 = vpop.f32.mrf.mxu1 }
 0x43c   : > { %2706 = vst [vmem:[#allocation5 + $0x60] sm:$0xff] %v2674_v39  ;;  %v3763_v55 = vadd.f32 %v3762_v12, %v3761_v44  ;;  %v2134_v44 = vld [vmem:[#allocation5 + $0x58] sm:$0xff]  ;;  %v6692_v39 = vld [vmem:[#allocation72_spill] sm:$0xff] }
 0x43d   : > { %v3764_v45 = vpop.f32.mrf.mxu1  ;;  %v1927_v12 = vmul.f32 %v6692_v39, %v1895_v11  ;;  %v1904_v11 = vld [vmem:[#allocation4 + $0x60] sm:$0xff] }
 0x43e   : > { %v2675_v23 = vadd.f32 %v3763_v55, %v2322_v59 }
 0x43f   : > { %v3765_v35 = vpop.f32.mrf.mxu1 }
 0x440   : > { %2707 = vst [vmem:[#allocation5 + $0xf0] sm:$0xff] %v2675_v23  ;;  %v3766_v15 = vadd.f32 %v3765_v35, %v3764_v45  ;;  %v1900_v45 = vld [vmem:[#allocation4 + $0x40] sm:$0xff]  ;;  %v1897_v23 = vld [vmem:[#allocation4 + $0x28] sm:$0xff]  ;;  %v2326_v35 = vmul.f32 %v6082_v22, %v2134_v44 }
 0x441   : > { %v3767_v40 = vpop.f32.mrf.mxu1  ;;  %v2137_v44 = vld [vmem:[#allocation5 + $0xe0] sm:$0xff] }
 0x442   : > { %v2676_v9 = vadd.f32 %v3766_v15, %v2323_v4  ;;  %v1961_v8 = vpop.xlane.xlu1 %1960  ;;  %v1958_v17 = vpop.xlane.xlu0 %1957  ;;  %v2135_v15 = vld [vmem:[#allocation5 + $0x40] sm:$0xff] }
 0x443   : > { %v2053_v54 = vadd.f32 %v1961_v8, %v1925_v51  ;;  %v3768_v13 = vpop.f32.mrf.mxu1  ;;  %v2052_v10 = vadd.f32 %v1958_v17, %v1924_v49  ;;  %v6694_v51 = vld [vmem:[#allocation73_spill] sm:$0xff] }
 0x444   : > { %2708 = vst [vmem:[#allocation5 + $0x8] sm:$0xff] %v2676_v9  ;;  %v3769_v33 = vadd.f32 %v3768_v13, %v3767_v40  ;;  %v1932_v40 = vmul.f32 %v6693_v57, %v1900_v45  ;;  %v1929_v49 = vmul.f32 %v6694_v51, %v1897_v23  ;;  %v1906_v23 = vld [vmem:[#allocation4 + $0x70] sm:$0xff] }
 0x445   : > { %2086 = vst.msk [vmem:[#allocation4 + $0x8] sm:$0xff] %vm2084_vm1, %v2053_v54  ;;  %2085 = vst.msk [vmem:[#allocation4] sm:$0xff] %vm2084_vm1, %v2052_v10  ;;  %v3770_v14 = vpop.f32.mrf.mxu1  ;;  %v2327_v10 = vmul.f32 %v6088_v36, %v2135_v15  ;;  %v2138_v15 = vld [vmem:[#allocation5 + $0x90] sm:$0xff]  ;;  %v1938_v57 = vmul.f32 %v5866_v46, %v1906_v23 }
 0x446   : > { %v2677_v25 = vadd.f32 %v3769_v33, %v2324_v60  ;;  %v1970_v21 = vpop.xlane.xlu1 %1969  ;;  %v1964_v52 = vpop.xlane.xlu0 %1963  ;;  %v2136_v33 = vld [vmem:[#allocation5 + $0xc8] sm:$0xff] }
 0x447   : > { %v2056_v56 = vadd.f32 %v1970_v21, %v1928_v41  ;;  %v3771_v16 = vpop.f32.mrf.mxu1  ;;  %v2054_v26 = vadd.f32 %v1964_v52, %v1926_v3  ;;  %v6696_v3 = vld [vmem:[#allocation74_spill] sm:$0xff] }
 0x448   : > { %2709 = vst [vmem:[#allocation5 + $0x78] sm:$0xff] %v2677_v25  ;;  %v3772_v0 = vadd.f32 %v3771_v16, %v3770_v14  ;;  %v6695_v14 = vld [vmem:[#allocation77_spill] sm:$0xff]  ;;  %v1931_v25 = vmul.f32 %v6696_v3, %v1899_v27 }
 0x449   : > { %2089 = vst.msk [vmem:[#allocation4 + $0x20] sm:$0xff] %vm2084_vm1, %v2056_v56  ;;  %2087 = vst.msk [vmem:[#allocation4 + $0x10] sm:$0xff] %vm2084_vm1, %v2054_v26  ;;  %v3773_v48 = vpop.f32.mrf.mxu1  ;;  %v1934_v41 = vmul.f32 %v6695_v14, %v1902_v18  ;;  %v1901_v56 = vld [vmem:[#allocation4 + $0x48] sm:$0xff] }
 0x44a   : > { %v2678_v59 = vadd.f32 %v3772_v0, %v2325_v30  ;;  %v1976_v55 = vpop.xlane.xlu1 %1975  ;;  %v1967_v6 = vpop.xlane.xlu0 %1966  ;;  %v2328_v30 = vmul.f32 %v6086_v29, %v2136_v33  ;;  %v1905_v18 = vld [vmem:[#allocation4 + $0x68] sm:$0xff] }
 0x44b   : > { %v2058_v34 = vadd.f32 %v1976_v55, %v1930_v1  ;;  %v3774_v38 = vpop.f32.mrf.mxu1  ;;  %v2055_v63 = vadd.f32 %v1967_v6, %v1927_v12  ;;  %v6697_v1 = vld [vmem:[#allocation79_spill] sm:$0xff]  ;;  %v6698_v12 = vld [vmem:[#allocation76_spill] sm:$0xff] }
 0x44c   : > { %2710 = vst [vmem:[#allocation5 + $0x38] sm:$0xff] %v2678_v59  ;;  %v3775_v4 = vadd.f32 %v3774_v38, %v3773_v48  ;;  %v1936_v39 = vmul.f32 %v6697_v1, %v1904_v11  ;;  %v1933_v59 = vmul.f32 %v6698_v12, %v1901_v56  ;;  %v1912_v12 = vld [vmem:[#allocation4 + $0xa0] sm:$0xff] }
 0x44d   : > { %2091 = vst.msk [vmem:[#allocation4 + $0x30] sm:$0xff] %vm2084_vm1, %v2058_v34  ;;  %2088 = vst.msk [vmem:[#allocation4 + $0x18] sm:$0xff] %vm2084_vm1, %v2055_v63  ;;  %v3776_v62 = vpop.f32.mrf.mxu1  ;;  %v1903_v34 = vld [vmem:[#allocation4 + $0x58] sm:$0xff] }
 0x44e   : > { %v2679_v9 = vadd.f32 %v3775_v4, %v2326_v35  ;;  %v1982_v8 = vpop.xlane.xlu1 %1981  ;;  %v1973_v17 = vpop.xlane.xlu0 %1972  ;;  %v2329_v35 = vmul.f32 %v6092_v5, %v2137_v44 }
 0x44f   : > { %v2060_v54 = vadd.f32 %v1982_v8, %v1932_v40  ;;  %v3777_v13 = vpop.f32.mrf.mxu1  ;;  %v2057_v22 = vadd.f32 %v1973_v17, %v1929_v49  ;;  %v6699_v40 = vld [vmem:[#allocation78_spill] sm:$0xff]  ;;  %v1908_v17 = vld [vmem:[#allocation4 + $0x80] sm:$0xff] }
 0x450   : > { %2711 = vst [vmem:[#allocation5 + $0x58] sm:$0xff] %v2679_v9  ;;  %v3778_v60 = vadd.f32 %v3777_v13, %v3776_v62  ;;  %v1935_v51 = vmul.f32 %v6699_v40, %v1903_v34  ;;  %v2330_v13 = vmul.f32 %v6090_v19, %v2138_v15  ;;  %v2141_v34 = vld [vmem:[#allocation5 + $0xa8] sm:$0xff]  ;;  %v1911_v40 = vld [vmem:[#allocation4 + $0x98] sm:$0xff] }
 0x451   : > { %2093 = vst.msk [vmem:[#allocation4 + $0x40] sm:$0xff] %vm2084_vm1, %v2060_v54  ;;  %2090 = vst.msk [vmem:[#allocation4 + $0x28] sm:$0xff] %vm2084_vm1, %v2057_v22  ;;  %v3779_v42 = vpop.f32.mrf.mxu1 }
 0x452   : > { %v2680_v21 = vadd.f32 %v3778_v60, %v2327_v10  ;;  %v1988_v52 = vpop.xlane.xlu1 %1987  ;;  %v1979_v2 = vpop.xlane.xlu0 %1978  ;;  %v2139_v10 = vld [vmem:[#allocation5 + $0x70] sm:$0xff]  ;;  %v6700_v60 = vld [vmem:[#allocation84_spill] sm:$0xff] }
 0x453   : > { %v2062_v16 = vadd.f32 %v1988_v52, %v1934_v41  ;;  %v3780_v26 = vpop.f32.mrf.mxu1  ;;  %v2059_v36 = vadd.f32 %v1979_v2, %v1931_v25  ;;  %v1940_v33 = vmul.f32 %v6700_v60, %v1908_v17  ;;  %v1907_v52 = vld [vmem:[#allocation4 + $0x78] sm:$0xff]  ;;  %v2331_v56 = vmul.f32 %v6096_v61, %v2139_v10  ;;  %v2142_v17 = vld [vmem:[#allocation5 + $0xd0] sm:$0xff]  ;;  %v1916_v60 = vld [vmem:[#allocation4 + $0xc0] sm:$0xff] }
 0x454   : > { %2712 = vst [vmem:[#allocation5 + $0x40] sm:$0xff] %v2680_v21  ;;  %v3781_v0 = vadd.f32 %v3780_v26, %v3779_v42  ;;  %v6701_v42 = vld [vmem:[#allocation82_spill] sm:$0xff]  ;;  %v2140_v26 = vld [vmem:[#allocation5 + $0xc0] sm:$0xff] }
 0x455   : > { %2095 = vst.msk [vmem:[#allocation4 + $0x50] sm:$0xff] %vm2084_vm1, %v2062_v16  ;;  %2092 = vst.msk [vmem:[#allocation4 + $0x38] sm:$0xff] %vm2084_vm1, %v2059_v36  ;;  %v3782_v48 = vpop.f32.mrf.mxu1  ;;  %v1937_v14 = vmul.f32 %v6701_v42, %v1905_v18  ;;  %v1910_v21 = vld [vmem:[#allocation4 + $0x90] sm:$0xff] }
 0x456   : > { %v2681_v55 = vadd.f32 %v3781_v0, %v2328_v30  ;;  %v1994_v6 = vpop.xlane.xlu1 %1993  ;;  %v1985_v45 = vpop.xlane.xlu0 %1984  ;;  %v1942_v30 = vmul.f32 %v5880_v43, %v1910_v21  ;;  %v6702_v0 = vld [vmem:[#allocation83_spill] sm:$0xff] }
 0x457   : > { %v2064_v38 = vadd.f32 %v1994_v6, %v1936_v39  ;;  %v3783_v63 = vpop.f32.mrf.mxu1  ;;  %v2061_v29 = vadd.f32 %v1985_v45, %v1933_v59  ;;  %v1939_v44 = vmul.f32 %v6702_v0, %v1907_v52  ;;  %v1909_v59 = vld [vmem:[#allocation4 + $0x88] sm:$0xff]  ;;  %v2332_v45 = vmul.f32 %v6094_v7, %v2140_v26  ;;  %v6707_v52 = vld [vmem:[#allocation92_spill] sm:$0xff] }
 0x458   : > { %2713 = vst [vmem:[#allocation5 + $0xc8] sm:$0xff] %v2681_v55  ;;  %v3784_v4 = vadd.f32 %v3783_v63, %v3782_v48 }
 0x459   : > { %2097 = vst.msk [vmem:[#allocation4 + $0x60] sm:$0xff] %vm2084_vm1, %v2064_v38  ;;  %2094 = vst.msk [vmem:[#allocation4 + $0x48] sm:$0xff] %vm2084_vm1, %v2061_v29  ;;  %v3785_v62 = vpop.f32.mrf.mxu1  ;;  %v6703_v38 = vld [vmem:[#allocation89_spill] sm:$0xff] }
 0x45a   : > { %v2682_v49 = vadd.f32 %v3784_v4, %v2329_v35  ;;  %v2000_v9 = vpop.xlane.xlu1 %1999  ;;  %v1991_v8 = vpop.xlane.xlu0 %1990  ;;  %v1944_v63 = vmul.f32 %v6703_v38, %v1912_v12  ;;  %v6704_v29 = vld [vmem:[#allocation85_spill] sm:$0xff] }
 0x45b   : > { %v2066_v27 = vadd.f32 %v2000_v9, %v1938_v57  ;;  %v3786_v54 = vpop.f32.mrf.mxu1  ;;  %v2063_v5 = vadd.f32 %v1991_v8, %v1935_v51  ;;  %v1941_v35 = vmul.f32 %v6704_v29, %v1909_v59  ;;  %v1914_v57 = vld [vmem:[#allocation4 + $0xb0] sm:$0xff]  ;;  %v2333_v9 = vmul.f32 %v6100_v24, %v2141_v34  ;;  %v1920_v34 = vld [vmem:[#allocation4 + $0xe0] sm:$0xff] }
 0x45c   : > { %2714 = vst [vmem:[#allocation5 + $0xe0] sm:$0xff] %v2682_v49  ;;  %v3787_v22 = vadd.f32 %v3786_v54, %v3785_v62 }
 0x45d   : > { %2099 = vst.msk [vmem:[#allocation4 + $0x70] sm:$0xff] %vm2084_vm1, %v2066_v27  ;;  %2096 = vst.msk [vmem:[#allocation4 + $0x58] sm:$0xff] %vm2084_vm1, %v2063_v5  ;;  %v3788_v46 = vpop.f32.mrf.mxu1  ;;  %v6705_v27 = vld [vmem:[#allocation91_spill] sm:$0xff]  ;;  %v6706_v5 = vld [vmem:[#allocation86_spill] sm:$0xff] }
 0x45e   : > { %v2683_v41 = vadd.f32 %v3787_v22, %v2330_v13  ;;  %v2006_v3 = vpop.xlane.xlu1 %2005  ;;  %v1997_v25 = vpop.xlane.xlu0 %1996  ;;  %v1946_v54 = vmul.f32 %v6705_v27, %v1914_v57  ;;  %v1943_v13 = vmul.f32 %v6706_v5, %v1911_v40  ;;  %v1922_v27 = vld [vmem:[#allocation4 + $0xf0] sm:$0xff]  ;;  %v6711_v5 = vld [vmem:[#allocation93_spill] sm:$0xff] }
 0x45f   : > { %v2068_v2 = vadd.f32 %v2006_v3, %v1940_v33  ;;  %v3789_v11 = vpop.f32.mrf.mxu1  ;;  %v2065_v19 = vadd.f32 %v1997_v25, %v1937_v14  ;;  %v1913_v33 = vld [vmem:[#allocation4 + $0xa8] sm:$0xff]  ;;  %v2143_v25 = vld [vmem:[#allocation5 + $0x10] sm:$0xff] }
 0x460   : > { %2715 = vst [vmem:[#allocation5 + $0x90] sm:$0xff] %v2683_v41  ;;  %v3790_v16 = vadd.f32 %v3789_v11, %v3788_v46  ;;  %v2334_v41 = vmul.f32 %v6098_v20, %v2142_v17  ;;  %v6708_v11 = vld [vmem:[#allocation90_spill] sm:$0xff] }
 0x461   : > { %2101 = vst.msk [vmem:[#allocation4 + $0x80] sm:$0xff] %vm2084_vm1, %v2068_v2  ;;  %2098 = vst.msk [vmem:[#allocation4 + $0x68] sm:$0xff] %vm2084_vm1, %v2065_v19  ;;  %v3791_v36 = vpop.f32.mrf.mxu1  ;;  %v1948_v2 = vmul.f32 %v6707_v52, %v1916_v60  ;;  %v1945_v19 = vmul.f32 %v6708_v11, %v1913_v33 }
 0x462   : > { %v2684_v48 = vadd.f32 %v3790_v16, %v2331_v56  ;;  %v2012_v1 = vpop.xlane.xlu1 %2011  ;;  %v2003_v39 = vpop.xlane.xlu0 %2002 }
 0x463   : > { %v2070_v55 = vadd.f32 %v2012_v1, %v1942_v30  ;;  %v3792_v6 = vpop.f32.mrf.mxu1  ;;  %v2067_v61 = vadd.f32 %v2003_v39, %v1939_v44  ;;  %v1915_v30 = vld [vmem:[#allocation4 + $0xb8] sm:$0xff]  ;;  %v2144_v39 = vld [vmem:[#allocation5 + $0x28] sm:$0xff] }
 0x464   : > { %2716 = vst [vmem:[#allocation5 + $0x70] sm:$0xff] %v2684_v48  ;;  %v3793_v23 = vadd.f32 %v3792_v6, %v3791_v36  ;;  %v1918_v36 = vld [vmem:[#allocation4 + $0xd0] sm:$0xff]  ;;  %v2335_v48 = vmul.f32 %v6104_v53, %v2143_v25  ;;  %v2336_v29 = vmul.f32 %v6102_v47, %v2144_v39 }
 0x465   : > { %2103 = vst.msk [vmem:[#allocation4 + $0x90] sm:$0xff] %vm2084_vm1, %v2070_v55  ;;  %2100 = vst.msk [vmem:[#allocation4 + $0x78] sm:$0xff] %vm2084_vm1, %v2067_v61  ;;  %v3794_v43 = vpop.f32.mrf.mxu1  ;;  %v1950_v59 = vmul.f32 %v6014_v28, %v1918_v36  ;;  %v6709_v55 = vld [vmem:[#allocation36_spill] sm:$0xff] }
 0x466   : > { %v2685_v4 = vadd.f32 %v3793_v23, %v2332_v45  ;;  %v2018_v15 = vpop.xlane.xlu1 %2017  ;;  %v2009_v62 = vpop.xlane.xlu0 %2008  ;;  %v1947_v6 = vmul.f32 %v6709_v55, %v1915_v30 }
 0x467   : > { %v2072_v51 = vadd.f32 %v2018_v15, %v1944_v63  ;;  %v3795_v49 = vpop.f32.mrf.mxu1  ;;  %v2069_v7 = vadd.f32 %v2009_v62, %v1941_v35  ;;  %v1952_v15 = vmul.f32 %v6027_v32, %v1920_v34  ;;  %v6710_v62 = vld [vmem:[#allocation37_spill] sm:$0xff] }
 0x468   : > { %2717 = vst [vmem:[#allocation5 + $0xc0] sm:$0xff] %v2685_v4  ;;  %v3796_v8 = vadd.f32 %v3795_v49, %v3794_v43  ;;  %v1917_v43 = vld [vmem:[#allocation4 + $0xc8] sm:$0xff]  ;;  %v2145_v4 = vld [vmem:[#allocation5 + $0xa0] sm:$0xff] }
 0x469   : > { %2105 = vst.msk [vmem:[#allocation4 + $0xa0] sm:$0xff] %vm2084_vm1, %v2072_v51  ;;  %2102 = vst.msk [vmem:[#allocation4 + $0x88] sm:$0xff] %vm2084_vm1, %v2069_v7  ;;  %v3797_v18 = vpop.f32.mrf.mxu1  ;;  %v1949_v57 = vmul.f32 %v6710_v62, %v1917_v43  ;;  %v1919_v7 = vld [vmem:[#allocation4 + $0xd8] sm:$0xff]  ;;  %v2337_v47 = vmul.f32 %v6108_v37, %v2145_v4 }
 0x46a   : > { %v2686_v22 = vadd.f32 %v3796_v8, %v2333_v9  ;;  %v2024_v10 = vpop.xlane.xlu1 %2023  ;;  %v2015_v46 = vpop.xlane.xlu0 %2014 }
 0x46b   : > { %v2074_v42 = vadd.f32 %v2024_v10, %v1946_v54  ;;  %v3798_v14 = vpop.f32.mrf.mxu1  ;;  %v2071_v24 = vadd.f32 %v2015_v46, %v1943_v13  ;;  %v2146_v54 = vld [vmem:[#allocation5 + $0xf8] sm:$0xff]  ;;  %v1951_v13 = vmul.f32 %v6711_v5, %v1919_v7  ;;  %v1921_v46 = vld [vmem:[#allocation4 + $0xe8] sm:$0xff] }
 0x46c   : > { %2718 = vst [vmem:[#allocation5 + $0xa8] sm:$0xff] %v2686_v22  ;;  %v3799_v3 = vadd.f32 %v3798_v14, %v3797_v18  ;;  %v2338_v37 = vmul.f32 %v6106_v31, %v2146_v54 }
 0x46d   : > { %2107 = vst.msk [vmem:[#allocation4 + $0xb0] sm:$0xff] %vm2084_vm1, %v2074_v42  ;;  %2104 = vst.msk [vmem:[#allocation4 + $0x98] sm:$0xff] %vm2084_vm1, %v2071_v24  ;;  %v3800_v21 = vpop.f32.mrf.mxu1  ;;  %v1954_v42 = vmul.f32 %v6079_v50, %v1922_v27 }
 0x46e   : > { %v2687_v56 = vadd.f32 %v3799_v3, %v2334_v41  ;;  %v2030_v16 = vpop.xlane.xlu1 %2029  ;;  %v2021_v26 = vpop.xlane.xlu0 %2020  ;;  %v6712_v3 = vld [vmem:[#allocation94_spill] sm:$0xff] }
 0x46f   : > { %v2076_v0 = vadd.f32 %v2030_v16, %v1948_v2  ;;  %v3801_v44 = vpop.f32.mrf.mxu1  ;;  %v2073_v20 = vadd.f32 %v2021_v26, %v1945_v19  ;;  %v1953_v25 = vmul.f32 %v6712_v3, %v1921_v46  ;;  %v1923_v2 = vld [vmem:[#allocation4 + $0xf8] sm:$0xff] }
 0x470   : > { %2719 = vst [vmem:[#allocation5 + $0xd0] sm:$0xff] %v2687_v56  ;;  %v3802_v1 = vadd.f32 %v3801_v44, %v3800_v21  ;;  %v1955_v50 = vmul.f32 %v6076_v58, %v1923_v2  ;;  %v2147_v56 = vld [vmem:[#allocation5 + $0x20] sm:$0xff]  ;;  %v2148_v44 = vld [vmem:[#allocation5 + $0x98] sm:$0xff] }
 0x471   : > { %2109 = vst.msk [vmem:[#allocation4 + $0xc0] sm:$0xff] %vm2084_vm1, %v2076_v0  ;;  %2106 = vst.msk [vmem:[#allocation4 + $0xa8] sm:$0xff] %vm2084_vm1, %v2073_v20  ;;  %v3803_v12 = vpop.f32.mrf.mxu1 }
 0x472   : > { %v2688_v61 = vadd.f32 %v3802_v1, %v2335_v48  ;;  %v2036_v45 = vpop.xlane.xlu1 %2035  ;;  %v2027_v23 = vpop.xlane.xlu0 %2026 }
 0x473   : > { %v3804_v38 = vpop.f32.mrf.mxu1  ;;  %v2078_v63 = vadd.f32 %v2036_v45, %v1950_v59  ;;  %v2075_v53 = vadd.f32 %v2027_v23, %v1947_v6 }
 0x474   : > { %2720 = vst [vmem:[#allocation5 + $0x10] sm:$0xff] %v2688_v61  ;;  %v3805_v35 = vadd.f32 %v3804_v38, %v3803_v12 }
 0x475   : > { %2111 = vst.msk [vmem:[#allocation4 + $0xd0] sm:$0xff] %vm2084_vm1, %v2078_v63  ;;  %2108 = vst.msk [vmem:[#allocation4 + $0xb8] sm:$0xff] %vm2084_vm1, %v2075_v53  ;;  %v3806_v28 = vpop.f32.mrf.mxu1 }
 0x476   : > { %v2689_v40 = vadd.f32 %v3805_v35, %v2336_v29  ;;  %v2042_v51 = vpop.xlane.xlu1 %2041  ;;  %v2033_v49 = vpop.xlane.xlu0 %2032 }
 0x477   : > { %v3807_v9 = vpop.f32.mrf.mxu1  ;;  %v2080_v8 = vadd.f32 %v2042_v51, %v1952_v15  ;;  %v2077_v17 = vadd.f32 %v2033_v49, %v1949_v57 }
 0x478   : > { %2721 = vst [vmem:[#allocation5 + $0x28] sm:$0xff] %v2689_v40  ;;  %v3808_v18 = vadd.f32 %v3807_v9, %v3806_v28 }
 0x479   : > { %2113 = vst.msk [vmem:[#allocation4 + $0xe0] sm:$0xff] %vm2084_vm1, %v2080_v8  ;;  %2110 = vst.msk [vmem:[#allocation4 + $0xc8] sm:$0xff] %vm2084_vm1, %v2077_v17  ;;  %v3809_v32 = vpop.f32.mrf.mxu1 }
 0x47a   : > { %v2690_v22 = vadd.f32 %v3808_v18, %v2337_v47  ;;  %v2039_v10 = vpop.xlane.xlu0 %2038 }
 0x47b   : > { %v3810_v60 = vpop.f32.mrf.mxu1  ;;  %v2079_v33 = vadd.f32 %v2039_v10, %v1951_v13 }
 0x47c   : > { %2722 = vst [vmem:[#allocation5 + $0xa0] sm:$0xff] %v2690_v22  ;;  %v3811_v14 = vadd.f32 %v3810_v60, %v3809_v32  ;;  %v2048_v24 = vpop.xlane.xlu1 %2047 }
 0x47d   : > { %2112 = vst.msk [vmem:[#allocation4 + $0xd8] sm:$0xff] %vm2084_vm1, %v2079_v33  ;;  %v2082_v41 = vadd.f32 %v2048_v24, %v1954_v42 }
 0x47e   : > { %v2691_v21 = vadd.f32 %v3811_v14, %v2338_v37  ;;  %v2045_v52 = vpop.xlane.xlu0 %2044 }
 0x47f   : > { %2115 = vst.msk [vmem:[#allocation4 + $0xf0] sm:$0xff] %vm2084_vm1, %v2082_v41  ;;  %v2081_v11 = vadd.f32 %v2045_v52, %v1953_v25 }
 0x480   : > { %2723 = vst [vmem:[#allocation5 + $0xf8] sm:$0xff] %v2691_v21  ;;  %v2307_v20 = vpop.permute.xlu1 %2306 }
 0x481   : > { %2114 = vst.msk [vmem:[#allocation4 + $0xe8] sm:$0xff] %vm2084_vm1, %v2081_v11  ;;  %v2340_v12 = vmul.f32 %v2307_v20, %v2148_v44 }
 0x482   : > { %v2051_v31 = vpop.xlane.xlu0 %2050 }
 0x483   : > { %v2083_v19 = vadd.f32 %v2051_v31, %v1955_v50 }
 0x485   : > { %2116 = vst.msk [vmem:[#allocation4 + $0xf8] sm:$0xff] %vm2084_vm1, %v2083_v19 }
 0x48a   : > { %v2302_v16 = vpop.permute.xlu0 %2301 }
 0x48b   : > { %v2339_v30 = vmul.f32 %v2302_v16, %v2147_v56 }
 0x4b4   : > { %v3812_v26 = vpop.f32.mrf.mxu1 }
 0x4b6   : > { %v3813_v36 = vpop.f32.mrf.mxu1 }
 0x4b7   : > { %v3814_v0 = vadd.f32 %v3813_v36, %v3812_v26 }
 0x4b8   : > { %v3815_v48 = vpop.f32.mrf.mxu1 }
 0x4b9   : > { %v2692_v1 = vadd.f32 %v3814_v0, %v2339_v30 }
 0x4ba   : > { %v3816_v39 = vpop.f32.mrf.mxu1 }
 0x4bb   : > { %2724 = vst [vmem:[#allocation5 + $0x20] sm:$0xff] %v2692_v1  ;;  %v3817_v59 = vadd.f32 %v3816_v39, %v3815_v48  ;;  %2761 = sbr.rel (%p3444_p10) target bundleno = 1421 (0x58d), region = 60 }
 0x4bd   : > { %v2693_v55 = vadd.f32 %v3817_v59, %v2340_v12 }
 0x4bf   : > { %2725 = vst [vmem:[#allocation5 + $0x98] sm:$0xff] %v2693_v55 }
 0x4c0   : > { %v2764_v58 = vld [vmem:[#allocation4 + $0x10] sm:$0xff]  ;;  %v2762_v6 = vld [vmem:[#allocation4] sm:$0xff]  ;;  %v2765_v61 = vld [vmem:[#allocation4 + $0x18] sm:$0xff]  ;;  %v4588_v45 = vmov 0  }
 0x4c1   : > { %4229 = vset.pattern.permute.xlu1 %v4588_v45  ;;  %4228 = vset.pattern.permute.xlu0 %v4588_v45  ;;  %vm2796_vm2 = vcmp.eq.f32.partialorder %v2764_v58, 0.0  ;;  %vm2794_vm3 = vcmp.eq.f32.partialorder %v2762_v6, 0.0  ;;  %vm2797_vm4 = vcmp.eq.f32.partialorder %v2765_v61, 0.0  ;;  %v2763_v23 = vld [vmem:[#allocation4 + $0x8] sm:$0xff]  ;;  %v2766_v43 = vld [vmem:[#allocation4 + $0x20] sm:$0xff]  ;;  %v2769_v35 = vld [vmem:[#allocation4 + $0x38] sm:$0xff] }
 0x4c2   : > { %v2767_v34 = vld [vmem:[#allocation4 + $0x28] sm:$0xff]  ;;  %v2828_v38 = vsel %vm2796_vm2, 1.0, %v2764_v58  ;;  %v2826_v63 = vsel %vm2794_vm3, 1.0, %v2762_v6  ;;  %v2829_v53 = vsel %vm2797_vm4, 1.0, %v2765_v61  ;;  %vm2795_vm5 = vcmp.eq.f32.partialorder %v2763_v23, 0.0  ;;  %v2768_v4 = vld [vmem:[#allocation4 + $0x30] sm:$0xff] }
 0x4c3   : > { %4230 = vrcp.f32 %v2828_v38  ;;  %v2827_v29 = vsel %vm2795_vm5, 1.0, %v2763_v23  ;;  %vm2799_vm6 = vcmp.eq.f32.partialorder %v2767_v34, 0.0  ;;  %vm2798_vm7 = vcmp.eq.f32.partialorder %v2766_v43, 0.0  ;;  %v2771_v62 = vld [vmem:[#allocation4 + $0x48] sm:$0xff]  ;;  %v2770_v57 = vld [vmem:[#allocation4 + $0x40] sm:$0xff]  ;;  %v2773_v49 = vld [vmem:[#allocation4 + $0x58] sm:$0xff] }
 0x4c4   : > { %4232 = vrcp.f32 %v2826_v63  ;;  %v2831_v28 = vsel %vm2799_vm6, 1.0, %v2767_v34  ;;  %v2830_v15 = vsel %vm2798_vm7, 1.0, %v2766_v43  ;;  %vm2801_vm8 = vcmp.eq.f32.partialorder %v2769_v35, 0.0  ;;  %v2772_v7 = vld [vmem:[#allocation4 + $0x50] sm:$0xff]  ;;  %v2775_v47 = vld [vmem:[#allocation4 + $0x68] sm:$0xff]  ;;  %v2774_v27 = vld [vmem:[#allocation4 + $0x60] sm:$0xff] }
 0x4c5   : > { %4234 = vrcp.f32 %v2829_v53  ;;  %vm2800_vm9 = vcmp.eq.f32.partialorder %v2768_v4, 0.0  ;;  %v2833_v40 = vsel %vm2801_vm8, 1.0, %v2769_v35  ;;  %vm2803_vm10 = vcmp.eq.f32.partialorder %v2771_v62, 0.0  ;;  %v2777_v22 = vld [vmem:[#allocation4 + $0x78] sm:$0xff]  ;;  %v2776_v10 = vld [vmem:[#allocation4 + $0x70] sm:$0xff]  ;;  %v2779_v37 = vld [vmem:[#allocation4 + $0x88] sm:$0xff] }
 0x4c6   : > { %4236 = vrcp.f32 %v2827_v29  ;;  %v2832_v51 = vsel %vm2800_vm9, 1.0, %v2768_v4  ;;  %vm2802_vm11 = vcmp.eq.f32.partialorder %v2770_v57, 0.0  ;;  %v2835_v9 = vsel %vm2803_vm10, 1.0, %v2771_v62  ;;  %v2778_v14 = vld [vmem:[#allocation4 + $0x80] sm:$0xff]  ;;  %v2781_v21 = vld [vmem:[#allocation4 + $0x98] sm:$0xff]  ;;  %v2780_v52 = vld [vmem:[#allocation4 + $0x90] sm:$0xff] }
 0x4c7   : > { %4238 = vrcp.f32 %v2831_v28  ;;  %v2834_v8 = vsel %vm2802_vm11, 1.0, %v2770_v57  ;;  %vm2805_vm12 = vcmp.eq.f32.partialorder %v2773_v49, 0.0  ;;  %vm2804_vm13 = vcmp.eq.f32.partialorder %v2772_v7, 0.0  ;;  %v2783_v19 = vld [vmem:[#allocation4 + $0xa8] sm:$0xff]  ;;  %v2782_v56 = vld [vmem:[#allocation4 + $0xa0] sm:$0xff]  ;;  %v2785_v0 = vld [vmem:[#allocation4 + $0xb8] sm:$0xff] }
 0x4c8   : > { %4240 = vrcp.f32 %v2830_v15  ;;  %v2837_v32 = vsel %vm2805_vm12, 1.0, %v2773_v49  ;;  %v2836_v13 = vsel %vm2804_vm13, 1.0, %v2772_v7  ;;  %vm2807_vm14 = vcmp.eq.f32.partialorder %v2775_v47, 0.0  ;;  %v2784_v44 = vld [vmem:[#allocation4 + $0xb0] sm:$0xff]  ;;  %v2787_v12 = vld [vmem:[#allocation4 + $0xc8] sm:$0xff]  ;;  %v2786_v59 = vld [vmem:[#allocation4 + $0xc0] sm:$0xff] }
 0x4c9   : > { %4242 = vrcp.f32 %v2833_v40  ;;  %vm2806_vm15 = vcmp.eq.f32.partialorder %v2774_v27, 0.0  ;;  %v2839_v60 = vsel %vm2807_vm14, 1.0, %v2775_v47  ;;  %vm2809_vm0 = vcmp.eq.f32.partialorder %v2777_v22, 0.0  ;;  %v2789_v45 = vld [vmem:[#allocation4 + $0xd8] sm:$0xff]  ;;  %v2788_v23 = vld [vmem:[#allocation4 + $0xd0] sm:$0xff]  ;;  %v2791_v53 = vld [vmem:[#allocation4 + $0xe8] sm:$0xff] }
 0x4ca   : > { %4244 = vrcp.f32 %v2832_v51  ;;  %v2838_v42 = vsel %vm2806_vm15, 1.0, %v2774_v27  ;;  %vm2808_vm1 = vcmp.eq.f32.partialorder %v2776_v10, 0.0  ;;  %v2841_v41 = vsel %vm2809_vm0, 1.0, %v2777_v22  ;;  %v2790_v29 = vld [vmem:[#allocation4 + $0xe0] sm:$0xff]  ;;  %v2793_v62 = vld [vmem:[#allocation4 + $0xf8] sm:$0xff]  ;;  %v2792_v57 = vld [vmem:[#allocation4 + $0xf0] sm:$0xff] }
 0x4cb   : > { %4246 = vrcp.f32 %v2835_v9  ;;  %v2840_v25 = vsel %vm2808_vm1, 1.0, %v2776_v10  ;;  %vm2811_vm2 = vcmp.eq.f32.partialorder %v2779_v37, 0.0  ;;  %vm2810_vm3 = vcmp.eq.f32.partialorder %v2778_v14, 0.0 }
 0x4cc   : > { %4248 = vrcp.f32 %v2834_v8  ;;  %v2843_v11 = vsel %vm2811_vm2, 1.0, %v2779_v37  ;;  %v2842_v31 = vsel %vm2810_vm3, 1.0, %v2778_v14  ;;  %vm2813_vm4 = vcmp.eq.f32.partialorder %v2781_v21, 0.0 }
 0x4cd   : > { %4250 = vrcp.f32 %v2837_v32  ;;  %vm2812_vm5 = vcmp.eq.f32.partialorder %v2780_v52, 0.0  ;;  %v2845_v26 = vsel %vm2813_vm4, 1.0, %v2781_v21  ;;  %vm2815_vm6 = vcmp.eq.f32.partialorder %v2783_v19, 0.0 }
 0x4ce   : > { %4252 = vrcp.f32 %v2836_v13  ;;  %v2844_v30 = vsel %vm2812_vm5, 1.0, %v2780_v52  ;;  %vm2814_vm7 = vcmp.eq.f32.partialorder %v2782_v56, 0.0  ;;  %v2847_v48 = vsel %vm2815_vm6, 1.0, %v2783_v19 }
 0x4cf   : > { %4254 = vrcp.f32 %v2839_v60  ;;  %v2846_v39 = vsel %vm2814_vm7, 1.0, %v2782_v56  ;;  %vm2817_vm8 = vcmp.eq.f32.partialorder %v2785_v0, 0.0  ;;  %vm2816_vm9 = vcmp.eq.f32.partialorder %v2784_v44, 0.0  ;;  %v2890_v60 = vld [vmem:[#allocation5 + $0xb0] sm:$0xff] }
 0x4d0   : > { %v4231_v17 = vpop.eup %4230  ;;  %4256 = vrcp.f32 %v2838_v42  ;;  %v2849_v58 = vsel %vm2817_vm8, 1.0, %v2785_v0  ;;  %v2848_v61 = vsel %vm2816_vm9, 1.0, %v2784_v44  ;;  %vm2819_vm10 = vcmp.eq.f32.partialorder %v2787_v12, 0.0 }
 0x4d1   : > { %v4233_v18 = vpop.eup %4232  ;;  %2934 = vperm.xlu1 %4229, %v4231_v17   ;;  %4258 = vrcp.f32 %v2841_v41  ;;  %vm2818_vm11 = vcmp.eq.f32.partialorder %v2786_v59, 0.0  ;;  %v2851_v43 = vsel %vm2819_vm10, 1.0, %v2787_v12  ;;  %vm2821_vm12 = vcmp.eq.f32.partialorder %v2789_v45, 0.0  ;;  %v2891_v41 = vld [vmem:[#allocation5] sm:$0xff] }
 0x4d2   : > { %v4235_v54 = vpop.eup %4234  ;;  %2924 = vperm.xlu0 %4228, %v4233_v18   ;;  %4260 = vrcp.f32 %v2840_v25  ;;  %v2850_v63 = vsel %vm2818_vm11, 1.0, %v2786_v59  ;;  %vm2820_vm13 = vcmp.eq.f32.partialorder %v2788_v23, 0.0  ;;  %v2853_v4 = vsel %vm2821_vm12, 1.0, %v2789_v45 }
 0x4d3   : > { %v4237_v5 = vpop.eup %4236  ;;  %4262 = vrcp.f32 %v2843_v11  ;;  %v2852_v15 = vsel %vm2820_vm13, 1.0, %v2788_v23  ;;  %vm2823_vm14 = vcmp.eq.f32.partialorder %v2791_v53, 0.0  ;;  %vm2822_vm15 = vcmp.eq.f32.partialorder %v2790_v29, 0.0  ;;  %v2894_v11 = vld [vmem:[#allocation5 + $0x50] sm:$0xff] }
 0x4d4   : > { %v4239_v46 = vpop.eup %4238  ;;  %4264 = vrcp.f32 %v2842_v31  ;;  %v2855_v51 = vsel %vm2823_vm14, 1.0, %v2791_v53  ;;  %v2854_v7 = vsel %vm2822_vm15, 1.0, %v2790_v29  ;;  %vm2825_vm0 = vcmp.eq.f32.partialorder %v2793_v62, 0.0 }
 0x4d5   : > { %2939 = vperm.xlu1 %4229, %v4235_v54   ;;  %v4241_v33 = vpop.eup %4240  ;;  %4266 = vrcp.f32 %v2845_v26  ;;  %vm2824_vm1 = vcmp.eq.f32.partialorder %v2792_v57, 0.0  ;;  %v2857_v8 = vsel %vm2825_vm0, 1.0, %v2793_v62  ;;  %v2896_v26 = vld [vmem:[#allocation5 + $0x30] sm:$0xff] }
 0x4d6   : > { %2929 = vperm.xlu0 %4228, %v4237_v5   ;;  %v4243_v24 = vpop.eup %4242  ;;  %4268 = vrcp.f32 %v2844_v30  ;;  %v2856_v47 = vsel %vm2824_vm1, 1.0, %v2792_v57 }
 0x4d7   : > { %v4245_v3 = vpop.eup %4244  ;;  %4270 = vrcp.f32 %v2847_v48  ;;  %v2898_v48 = vld [vmem:[#allocation5 + $0x80] sm:$0xff] }
 0x4d8   : > { %v4247_v2 = vpop.eup %4246  ;;  %4272 = vrcp.f32 %v2846_v39 }
 0x4d9   : > { %2949 = vperm.xlu1 %4229, %v4239_v46   ;;  %v4249_v50 = vpop.eup %4248  ;;  %4274 = vrcp.f32 %v2849_v58  ;;  %v2892_v46 = vld [vmem:[#allocation5 + $0xd8] sm:$0xff]  ;;  %v2900_v58 = vld [vmem:[#allocation5 + $0xe8] sm:$0xff] }
 0x4da   : > { %2944 = vperm.xlu0 %4228, %v4241_v33   ;;  %v4251_v16 = vpop.eup %4250  ;;  %4276 = vrcp.f32 %v2848_v61 }
 0x4db   : > { %v4253_v36 = vpop.eup %4252  ;;  %4278 = vrcp.f32 %v2851_v43  ;;  %v2902_v43 = vld [vmem:[#allocation5 + $0x60] sm:$0xff] }
 0x4dc   : > { %v4255_v20 = vpop.eup %4254  ;;  %4280 = vrcp.f32 %v2850_v63 }
 0x4dd   : > { %2959 = vperm.xlu1 %4229, %v4243_v24   ;;  %v4257_v1 = vpop.eup %4256  ;;  %4282 = vrcp.f32 %v2853_v4  ;;  %v2893_v24 = vld [vmem:[#allocation5 + $0x18] sm:$0xff]  ;;  %v2904_v4 = vld [vmem:[#allocation5 + $0x8] sm:$0xff] }
 0x4de   : > { %2954 = vperm.xlu0 %4228, %v4245_v3   ;;  %v4259_v55 = vpop.eup %4258  ;;  %4284 = vrcp.f32 %v2852_v15 }
 0x4df   : > { %v4261_v6 = vpop.eup %4260  ;;  %4286 = vrcp.f32 %v2855_v51  ;;  %v2906_v51 = vld [vmem:[#allocation5 + $0x38] sm:$0xff] }
 0x4e0   : > { %v4263_v34 = vpop.eup %4262  ;;  %4288 = vrcp.f32 %v2854_v7 }
 0x4e1   : > { %2969 = vperm.xlu1 %4229, %v4247_v2   ;;  %v4265_v38 = vpop.eup %4264  ;;  %4290 = vrcp.f32 %v2857_v8  ;;  %v2895_v2 = vld [vmem:[#allocation5 + $0x68] sm:$0xff] }
 0x4e2   : > { %2964 = vperm.xlu0 %4228, %v4249_v50   ;;  %v4267_v35 = vpop.eup %4266  ;;  %4292 = vrcp.f32 %v2856_v47  ;;  %v2908_v47 = vld [vmem:[#allocation5 + $0x40] sm:$0xff] }
 0x4e3   : > { %v4269_v28 = vpop.eup %4268 }
 0x4e4   : > { %v4271_v40 = vpop.eup %4270 }
 0x4e5   : > { %2979 = vperm.xlu1 %4229, %v4251_v16   ;;  %v4273_v49 = vpop.eup %4272  ;;  %v2897_v16 = vld [vmem:[#allocation5 + $0x48] sm:$0xff] }
 0x4e6   : > { %2974 = vperm.xlu0 %4228, %v4253_v36   ;;  %v4275_v9 = vpop.eup %4274 }
 0x4e7   : > { %v4277_v17 = vpop.eup %4276 }
 0x4e8   : > { %v4279_v18 = vpop.eup %4278 }
 0x4e9   : > { %2989 = vperm.xlu1 %4229, %v4255_v20   ;;  %v4281_v27 = vpop.eup %4280  ;;  %v2899_v20 = vld [vmem:[#allocation5 + $0x88] sm:$0xff] }
 0x4ea   : > { %2984 = vperm.xlu0 %4228, %v4257_v1   ;;  %v4283_v54 = vpop.eup %4282 }
 0x4eb   : > { %v4285_v32 = vpop.eup %4284 }
 0x4ec   : > { %v4287_v5 = vpop.eup %4286 }
 0x4ed   : > { %2999 = vperm.xlu1 %4229, %v4259_v55   ;;  %v4289_v13 = vpop.eup %4288  ;;  %v2901_v55 = vld [vmem:[#allocation5 + $0xb8] sm:$0xff] }
 0x4ee   : > { %2994 = vperm.xlu0 %4228, %v4261_v6   ;;  %v4291_v22 = vpop.eup %4290 }
 0x4ef   : > { %v4293_v10 = vpop.eup %4292 }
 0x4f1   : > { %3009 = vperm.xlu1 %4229, %v4263_v34   ;;  %v2903_v34 = vld [vmem:[#allocation5 + $0xf0] sm:$0xff] }
 0x4f2   : > { %3004 = vperm.xlu0 %4228, %v4265_v38  }
 0x4f5   : > { %3019 = vperm.xlu1 %4229, %v4267_v35   ;;  %v2905_v35 = vld [vmem:[#allocation5 + $0x78] sm:$0xff] }
 0x4f6   : > { %3014 = vperm.xlu0 %4228, %v4269_v28  }
 0x4f9   : > { %3029 = vperm.xlu1 %4229, %v4271_v40   ;;  %v2907_v40 = vld [vmem:[#allocation5 + $0x58] sm:$0xff] }
 0x4fa   : > { %3024 = vperm.xlu0 %4228, %v4273_v49  }
 0x4fd   : > { %3039 = vperm.xlu1 %4229, %v4275_v9  }
 0x4fe   : > { %3034 = vperm.xlu0 %4228, %v4277_v17   ;;  %v2909_v17 = vld [vmem:[#allocation5 + $0xc8] sm:$0xff] }
 0x501   : > { %3049 = vperm.xlu1 %4229, %v4279_v18  }
 0x502   : > { %3044 = vperm.xlu0 %4228, %v4281_v27  }
 0x505   : > { %3059 = vperm.xlu1 %4229, %v4283_v54  }
 0x506   : > { %3054 = vperm.xlu0 %4228, %v4285_v32  }
 0x509   : > { %3069 = vperm.xlu1 %4229, %v4287_v5   ;;  %v2911_v5 = vld [vmem:[#allocation5 + $0x90] sm:$0xff] }
 0x50a   : > { %3064 = vperm.xlu0 %4228, %v4289_v13   ;;  %v2910_v13 = vld [vmem:[#allocation5 + $0xe0] sm:$0xff] }
 0x50d   : > { %3079 = vperm.xlu1 %4229, %v4291_v22  }
 0x50e   : > { %3074 = vperm.xlu0 %4228, %v4293_v10  }
 0x54c   : > { %v2935_v33 = vpop.permute.xlu1 %2934 }
 0x54d   : > { %v3084_v42 = vmul.f32 %v2935_v33, %v2892_v46  ;;  %v2925_v37 = vpop.permute.xlu0 %2924  ;;  %v2913_v33 = vld [vmem:[#allocation5 + $0xc0] sm:$0xff] }
 0x54e   : > { %v3082_v14 = vmul.f32 %v2925_v37, %v2890_v60 }
 0x54f   : > { %3116 = vst [vmem:[%s4957_s28 + $0x10] sm:$0xff] %v3084_v42  ;;  %v2912_v42 = vld [vmem:[#allocation5 + $0x70] sm:$0xff] }
 0x550   : > { %3114 = vst [vmem:[%s4957_s28] sm:$0xff] %v3082_v14  ;;  %v2940_v3 = vpop.permute.xlu1 %2939 }
 0x551   : > { %v3085_v25 = vmul.f32 %v2940_v3, %v2893_v24  ;;  %v2930_v21 = vpop.permute.xlu0 %2929  ;;  %v2915_v3 = vld [vmem:[#allocation5 + $0xd0] sm:$0xff] }
 0x552   : > { %v3083_v52 = vmul.f32 %v2930_v21, %v2891_v41 }
 0x553   : > { %3117 = vst [vmem:[%s4957_s28 + $0x18] sm:$0xff] %v3085_v25  ;;  %v2914_v25 = vld [vmem:[#allocation5 + $0xa8] sm:$0xff] }
 0x554   : > { %3115 = vst [vmem:[%s4957_s28 + $0x8] sm:$0xff] %v3083_v52  ;;  %v2950_v50 = vpop.permute.xlu1 %2949 }
 0x555   : > { %v3087_v31 = vmul.f32 %v2950_v50, %v2895_v2  ;;  %v2945_v19 = vpop.permute.xlu0 %2944  ;;  %v2917_v50 = vld [vmem:[#allocation5 + $0x28] sm:$0xff] }
 0x556   : > { %v3086_v56 = vmul.f32 %v2945_v19, %v2894_v11 }
 0x557   : > { %3119 = vst [vmem:[%s4957_s28 + $0x28] sm:$0xff] %v3087_v31  ;;  %v2916_v31 = vld [vmem:[#allocation5 + $0x10] sm:$0xff] }
 0x558   : > { %3118 = vst [vmem:[%s4957_s28 + $0x20] sm:$0xff] %v3086_v56  ;;  %v2960_v36 = vpop.permute.xlu1 %2959 }
 0x559   : > { %v3089_v30 = vmul.f32 %v2960_v36, %v2897_v16  ;;  %v2955_v0 = vpop.permute.xlu0 %2954  ;;  %v2919_v36 = vld [vmem:[#allocation5 + $0xf8] sm:$0xff] }
 0x55a   : > { %v3088_v44 = vmul.f32 %v2955_v0, %v2896_v26 }
 0x55b   : > { %3121 = vst [vmem:[%s4957_s28 + $0x38] sm:$0xff] %v3089_v30  ;;  %v2918_v30 = vld [vmem:[#allocation5 + $0xa0] sm:$0xff] }
 0x55c   : > { %3120 = vst [vmem:[%s4957_s28 + $0x30] sm:$0xff] %v3088_v44  ;;  %v2970_v1 = vpop.permute.xlu1 %2969 }
 0x55d   : > { %v3091_v39 = vmul.f32 %v2970_v1, %v2899_v20  ;;  %v2965_v12 = vpop.permute.xlu0 %2964  ;;  %v2921_v1 = vld [vmem:[#allocation5 + $0x98] sm:$0xff] }
 0x55e   : > { %v3090_v59 = vmul.f32 %v2965_v12, %v2898_v48 }
 0x55f   : > { %3123 = vst [vmem:[%s4957_s28 + $0x48] sm:$0xff] %v3091_v39  ;;  %v2920_v39 = vld [vmem:[#allocation5 + $0x20] sm:$0xff] }
 0x560   : > { %3122 = vst [vmem:[%s4957_s28 + $0x40] sm:$0xff] %v3090_v59  ;;  %v2980_v6 = vpop.permute.xlu1 %2979 }
 0x561   : > { %v3093_v61 = vmul.f32 %v2980_v6, %v2901_v55  ;;  %v2975_v45 = vpop.permute.xlu0 %2974 }
 0x562   : > { %v3092_v23 = vmul.f32 %v2975_v45, %v2900_v58 }
 0x563   : > { %3125 = vst [vmem:[%s4957_s28 + $0x58] sm:$0xff] %v3093_v61 }
 0x564   : > { %3124 = vst [vmem:[%s4957_s28 + $0x50] sm:$0xff] %v3092_v23  ;;  %v2990_v38 = vpop.permute.xlu1 %2989 }
 0x565   : > { %v3095_v63 = vmul.f32 %v2990_v38, %v2903_v34  ;;  %v2985_v53 = vpop.permute.xlu0 %2984 }
 0x566   : > { %v3094_v29 = vmul.f32 %v2985_v53, %v2902_v43 }
 0x567   : > { %3127 = vst [vmem:[%s4957_s28 + $0x68] sm:$0xff] %v3095_v63 }
 0x568   : > { %3126 = vst [vmem:[%s4957_s28 + $0x60] sm:$0xff] %v3094_v29  ;;  %v3000_v28 = vpop.permute.xlu1 %2999 }
 0x569   : > { %v3097_v15 = vmul.f32 %v3000_v28, %v2905_v35  ;;  %v2995_v62 = vpop.permute.xlu0 %2994 }
 0x56a   : > { %v3096_v57 = vmul.f32 %v2995_v62, %v2904_v4 }
 0x56b   : > { %3129 = vst [vmem:[%s4957_s28 + $0x78] sm:$0xff] %v3097_v15 }
 0x56c   : > { %3128 = vst [vmem:[%s4957_s28 + $0x70] sm:$0xff] %v3096_v57  ;;  %v3010_v49 = vpop.permute.xlu1 %3009 }
 0x56d   : > { %v3099_v7 = vmul.f32 %v3010_v49, %v2907_v40  ;;  %v3005_v9 = vpop.permute.xlu0 %3004 }
 0x56e   : > { %v3098_v8 = vmul.f32 %v3005_v9, %v2906_v51 }
 0x56f   : > { %3131 = vst [vmem:[%s4957_s28 + $0x88] sm:$0xff] %v3099_v7 }
 0x570   : > { %3130 = vst [vmem:[%s4957_s28 + $0x80] sm:$0xff] %v3098_v8  ;;  %v3020_v18 = vpop.permute.xlu1 %3019 }
 0x571   : > { %v3101_v27 = vmul.f32 %v3020_v18, %v2909_v17  ;;  %v3015_v54 = vpop.permute.xlu0 %3014 }
 0x572   : > { %v3100_v32 = vmul.f32 %v3015_v54, %v2908_v47 }
 0x573   : > { %3133 = vst [vmem:[%s4957_s28 + $0x98] sm:$0xff] %v3101_v27 }
 0x574   : > { %3132 = vst [vmem:[%s4957_s28 + $0x90] sm:$0xff] %v3100_v32  ;;  %v3030_v22 = vpop.permute.xlu1 %3029 }
 0x575   : > { %v3103_v10 = vmul.f32 %v3030_v22, %v2911_v5  ;;  %v3025_v46 = vpop.permute.xlu0 %3024 }
 0x576   : > { %v3102_v60 = vmul.f32 %v3025_v46, %v2910_v13 }
 0x577   : > { %3135 = vst [vmem:[%s4957_s28 + $0xa8] sm:$0xff] %v3103_v10 }
 0x578   : > { %3134 = vst [vmem:[%s4957_s28 + $0xa0] sm:$0xff] %v3102_v60  ;;  %v3040_v37 = vpop.permute.xlu1 %3039 }
 0x579   : > { %v3105_v14 = vmul.f32 %v3040_v37, %v2913_v33  ;;  %v3035_v24 = vpop.permute.xlu0 %3034 }
 0x57a   : > { %v3104_v41 = vmul.f32 %v3035_v24, %v2912_v42 }
 0x57b   : > { %3137 = vst [vmem:[%s4957_s28 + $0xb8] sm:$0xff] %v3105_v14 }
 0x57c   : > { %3136 = vst [vmem:[%s4957_s28 + $0xb0] sm:$0xff] %v3104_v41  ;;  %v3050_v21 = vpop.permute.xlu1 %3049 }
 0x57d   : > { %v3107_v52 = vmul.f32 %v3050_v21, %v2915_v3  ;;  %v3045_v2 = vpop.permute.xlu0 %3044 }
 0x57e   : > { %v3106_v11 = vmul.f32 %v3045_v2, %v2914_v25 }
 0x57f   : > { %3139 = vst [vmem:[%s4957_s28 + $0xc8] sm:$0xff] %v3107_v52 }
 0x580   : > { %3138 = vst [vmem:[%s4957_s28 + $0xc0] sm:$0xff] %v3106_v11  ;;  %v3060_v19 = vpop.permute.xlu1 %3059 }
 0x581   : > { %v3109_v56 = vmul.f32 %v3060_v19, %v2917_v50  ;;  %v3055_v16 = vpop.permute.xlu0 %3054 }
 0x582   : > { %v3108_v26 = vmul.f32 %v3055_v16, %v2916_v31 }
 0x583   : > { %3141 = vst [vmem:[%s4957_s28 + $0xd8] sm:$0xff] %v3109_v56 }
 0x584   : > { %3140 = vst [vmem:[%s4957_s28 + $0xd0] sm:$0xff] %v3108_v26  ;;  %v3070_v0 = vpop.permute.xlu1 %3069 }
 0x585   : > { %v3111_v44 = vmul.f32 %v3070_v0, %v2919_v36  ;;  %v3065_v20 = vpop.permute.xlu0 %3064 }
 0x586   : > { %v3110_v48 = vmul.f32 %v3065_v20, %v2918_v30 }
 0x587   : > { %3143 = vst [vmem:[%s4957_s28 + $0xe8] sm:$0xff] %v3111_v44 }
 0x588   : > { %3142 = vst [vmem:[%s4957_s28 + $0xe0] sm:$0xff] %v3110_v48  ;;  %v3080_v12 = vpop.permute.xlu1 %3079 }
 0x589   : > { %v3113_v59 = vmul.f32 %v3080_v12, %v2921_v1  ;;  %v3075_v55 = vpop.permute.xlu0 %3074 }
 0x58a   : > { %v3112_v58 = vmul.f32 %v3075_v55, %v2920_v39 }
 0x58b   : > { %3145 = vst [vmem:[%s4957_s28 + $0xf8] sm:$0xff] %v3113_v59 }
 0x58c   : > { %3144 = vst [vmem:[%s4957_s28 + $0xf0] sm:$0xff] %v3112_v58 }
 0x58d PF: > { %s6714_s3 = sld [smem:[#allocation25_spill]]  ;;  %s3162_s18 = sshll.u32 %s4957_s28, 4  ;;  %s6224_s18 = int_to_ptr.vmem [resolvable:$true] %s3162_s18 }
 0x58e   : > { %s6715_s12 = sld [smem:[#allocation26_spill]]  ;;  %s3147_s14 = scalar_lea.sflag [#allocation8], %s4929_s24 }
 0x58f   : > { %s6716_s16 = sld [smem:[#allocation33_spill]]  ;;  %s4406_s4 = scalar_lea.vmem %s6224_s18, 4096 }
 0x590   : > { %s6717_s1 = sld [smem:[#allocation110_spill]]  ;;  %p4407_p11 = scmp.ne.s32.totalorder %s6224_s18, %s4406_s4 }
 0x591   : > { %s4589_s11 = smov [#allocation14]  }
 0x592   : > { %s4410_s21 = sshll.u32 %s4589_s11, 4  ;;  %s4411_s21 = int_to_ptr.vmem [resolvable:$false] %s4410_s21 }
 0x593   : > { %s3446_s8 = sshll.u32 %s6714_s3, 5  ;;  %s4412_s5 = scalar_lea.vmem %s4411_s21, 8192 }
 0x594   : > { %s3447_s7 = sshll.u32 %s6715_s12, 6  ;;  %p4413_p3 = scmp.lt.s32.totalorder %s6224_s18, %s4411_s21 }
 0x595   : > { %s3159_s6 = sadd.s32 %s3447_s7, %s3446_s8  ;;  %p6718_p1 = scmp.ne.s32.totalorder %s6716_s16, 0 }
 0x596   : > { %s3448_s26 = sshll.u32 %s3159_s6, 7  ;;  %p4414_p5 = scmp.lt.s32.totalorder %s4412_s5, %s4406_s4 }
 0x597   : > { %s6229_s2 = scalar_lea.hbm %s6717_s1, %s3448_s26  ;;  %p4408_p2 = pnand %p4407_p11, %p6718_p1 }
 0x598   : > { %p4415_p7 = por %p4414_p5, %p4413_p3 }
 0x599   : > { %p4409_p0 = pneg %p4408_p2 }
 0x59b   : > { %p4416_p13 = pnand %p4415_p7, %p4409_p0 }
 0x59d   : > { %4419 = shalt.err (!%p4416_p13)
}
 0x59e   : > { %s4420_s28 = scalar_lea.hbm %s6229_s2, 4096  ;;  %s4424_s3 = scalar_lea.hbm %s6717_s1, 16384 }
 0x59f   : > { %p4421_p8 = scmp.ne.s32.totalorder %s6229_s2, %s4420_s28  ;;  %p4425_p12 = scmp.lt.s32.totalorder %s6229_s2, %s6717_s1 }
 0x5a0   : > { %p4426_p6 = scmp.lt.s32.totalorder %s4424_s3, %s4420_s28 }
 0x5a1   : > { %p4422_p4 = pnand %p4421_p8, %p6718_p1 }
 0x5a2   : > { %p4427_p10 = por %p4426_p6, %p4425_p12 }
 0x5a3   : > { %p4423_p9 = pneg %p4422_p4 }
 0x5a5   : > { %p4428_p11 = pnand %p4427_p10, %p4423_p9 }
 0x5a7   : > { %4431 = shalt.err (!%p4428_p11)
}
 0x5a8   : > { %s4590_s7 = smov 128   ;;  %s4591_s6 = smov 8  }
 0x5a9   : > { %3826 = dma.vmem_to_hbm [thread:$0]  (%p6718_p1), %s6224_s18, 4096, %s6229_s2, %s3147_s14, %s4590_s7, %s4590_s7, %s4591_s6  }
 0x5aa PF: > { %s6719_s26 = sld [smem:[#allocation22_spill]]  ;;  %p3846_p2 = scmp.ge.s32.totalorder %s4574_s30, 2 }
 0x5ab   : > { %s6720_s19 = sld [smem:[#allocation35_spill]] }
 0x5b0   : > { %s3177_s9 = sand.u32 1, %s6719_s26  }
 0x5b1   : > { %p6721_p0 = scmp.ne.s32.totalorder %s6720_s19, 0  ;;  %s3178_s4 = scalar_lea.sflag [#allocation8], %s3177_s9 }
 0x5b3   : > { %p3842_p3 = pnand %p3846_p2, %p6721_p0 }
 0x5b5   : > { %p3843_p5 = pneg %p3842_p3 }
 0x5b7   : > { %4509 = dma.done.wait (%p3843_p5), %s3178_s4, 4096  }
 0x5b8   : > { %4511 = vsyncadd (%p3843_p5), %s3178_s4, 4294963200  ;;  %s26_s30 = sadd.s32 1, %s4574_s30   ;;  %s6723_s24 = sld [smem:[#allocation20_spill]] }
 0x5b9   : > { %p6259_p7 = scmp.ge.s32.totalorder %s26_s30, 10   ;;  %s6724_s18 = sld [smem:[#allocation21_spill]] }
 0x5ba   : > { %s6725_s21 = sld [smem:[#allocation23_spill]]  ;;  %s6726_s2 = smov %s4829_s15 }
 0x5bb   : > { %s6727_s14 = sld [smem:[#allocation27_spill]]  ;;  %s6732_s16 = smov %s4522_s17 }
 0x5bc   : > { %s6728_s5 = sld [smem:[#allocation28_spill]]  ;;  %s6733_s17 = smov %s4891_s13 }
 0x5bd   : > { %s6729_s28 = sld [smem:[#allocation32_spill]]  ;;  %s6734_s19 = smov %s4534_s20 }
 0x5be   : > { %s6730_s10 = sld [smem:[#allocation34_spill]]  ;;  %s6731_s15 = smov %s6723_s24 }
 0x5bf   : > { %s6735_s20 = smov %s4834_s25  ;;  %s6736_s22 = smov %s4546_s23 }
 0x5c0   : > { %s6737_s23 = smov %s6726_s2  ;;  %s6738_s24 = smov %s4562_s27 }
 0x5c1   : > { %s6739_s25 = smov %s6727_s14  ;;  %s6740_s26 = smov %s4570_s29 }
 0x5c2   : > { %s6741_s27 = smov %s6728_s5  ;;  %25 = sbr.rel (!%p6259_p7) target bundleno = 20 (0x14), region = 126 }
 0x5c4   : > { %s6742_s29 = smov %s6730_s10 }
 0x5c7   :  { %3183 = vsyncpa [#allocation7], 1 }
 0x5c8   :  { %3185 = vsyncpa [#allocation7 + $0x1], 1 }
 0x5c9   :  { %3186 = vsyncpa [#allocation10], 1 }
 0x5ca   :  { %3188 = vsyncpa [#allocation10 + $0x1], 1 }
 0x5cb   :  { %3189 = vsyncpa [#allocation13], 1 }
 0x5cc   :  { %3191 = vsyncpa [#allocation13 + $0x1], 1 }
 0x5cd   :  { %3192 = vsyncpa [#allocation8], 1 }
 0x5ce   :  { %3194 = vsyncpa [#allocation8 + $0x1], 1 }

</bundles_post_ra>
